<compile_context>
chip_gen: v7x
topology: tpu7x:2x2x1
jax: 0.10.0
libtpu: 0.0.40
codegen_flags: <defaults>
</compile_context>

<pallas_src>
import functools

import jax
import jax.numpy as jnp
from jax import lax
from jax.experimental import pallas as pl
from jax.experimental.pallas import tpu as pltpu

Z_DIM = 64
LRELU_SLOPE = 0.2
BN_EPS = 1e-5
HID = 1024            # per-head hidden width of fc_mu[0] / fc_sigma[0]
FEAT = 128 * 7 * 7    # 6272


# ----------------------------------------------------------------------------
# Pallas kernel: fused (mu||sigma) FC1 + BatchNorm1d + LeakyReLU + FC2 heads
# ----------------------------------------------------------------------------
def _fc_fused_kernel(a_ref, w1_ref, g_ref, b_ref, w2_ref, b2_ref,
                     out_ref, acc_ref, *, negative_slope, eps):
    """grid = (n_tiles, k_tiles); k (reduction over FEAT=6272) innermost.

    acc_ref: VMEM scratch accumulator (M, tn) f32, reset at k == 0.
    Epilogue (last k): train-mode BatchNorm1d + LeakyReLU on the full-batch
    resident block, then the block-diagonal FC2 head(s) owned by this n tile
    are applied and stored into the (halves, M, 64) output block.
    """
    k = pl.program_id(1)

    @pl.when(k == 0)
    def _():
        acc_ref[...] = jnp.zeros_like(acc_ref)

    # bf16 x bf16 -> MXU with f32 accumulation.  The dominant weight tile is
    # streamed from HBM already in bf16 and fed to the MXU directly; only the
    # tiny (M, tk) activation tile is cast.
    acc_ref[...] += jnp.dot(a_ref[...].astype(jnp.bfloat16), w1_ref[...],
                            preferred_element_type=jnp.float32)

    @pl.when(k == pl.num_programs(1) - 1)
    def _():
        y = acc_ref[...]
        # Train-mode BatchNorm1d: batch statistics, biased variance.  The FC1
        # bias is omitted entirely — it cancels exactly under mean subtraction.
        mean = jnp.mean(y, axis=0, keepdims=True)
        var = jnp.mean((y - mean) ** 2, axis=0, keepdims=True)
        y = (y - mean) * lax.rsqrt(var + eps) * g_ref[...] + b_ref[...]
        y = jnp.where(y >= 0, y, negative_slope * y)
        yb = y.astype(jnp.bfloat16)

        halves = w2_ref.shape[0]        # heads owned by this n tile (1 or 2)
        for h in range(halves):         # static Python loop (unrolled)
            out_ref[h] = (jnp.dot(yb[:, h * HID:(h + 1) * HID], w2_ref[h],
                                  preferred_element_type=jnp.float32)
                          + b2_ref[h])


def encoder_heads(feat, fc1_w, bn1_g, bn1_b, fc2_w, fc2_b, *, tn, tk=896):
    """feat:(M,6272) f32; fc1_w:(6272,2048) bf16; bn1_*:(2048,) f32;
    fc2_w:(2,1024,64) bf16; fc2_b:(2,1,64) f32  ->  mu, sigma each (M,64) f32.
    """
    M, K = feat.shape
    N = fc1_w.shape[1]
    assert K % tk == 0 and N % tn == 0 and tn % HID == 0
    num_n, num_k = N // tn, K // tk
    halves = tn // HID                  # 1 (v7x, two N tiles) or 2 (v5e/v6e)

    kernel = functools.partial(_fc_fused_kernel,
                               negative_slope=LRELU_SLOPE, eps=BN_EPS)
    out = pl.pallas_call(
        kernel,
        out_shape=jax.ShapeDtypeStruct((2, M, Z_DIM), jnp.float32),
        grid_spec=pltpu.PrefetchScalarGridSpec(
            num_scalar_prefetch=0,
            grid=(num_n, num_k),
            in_specs=[
                pl.BlockSpec((M, tk), lambda n, k: (0, k)),           # feat
                pl.BlockSpec((tk, tn), lambda n, k: (k, n)),          # fc1_w bf16
                pl.BlockSpec((1, tn), lambda n, k: (0, n)),           # bn1 gamma
                pl.BlockSpec((1, tn), lambda n, k: (0, n)),           # bn1 beta
                pl.BlockSpec((halves, HID, Z_DIM), lambda n, k: (n, 0, 0)),  # fc2_w
                pl.BlockSpec((halves, 1, Z_DIM), lambda n, k: (n, 0, 0)),    # fc2_b
            ],
            out_specs=pl.BlockSpec((halves, M, Z_DIM), lambda n, k: (n, 0, 0)),
            scratch_shapes=[pltpu.VMEM((M, tn), jnp.float32)],
        ),
        compiler_params=pltpu.CompilerParams(
            dimension_semantics=("parallel", "arbitrary")),
    )(feat, fc1_w, bn1_g.reshape(1, N), bn1_b.reshape(1, N), fc2_w, fc2_b)
    return out[0], out[1]


def _default_tn():
    # v7x has 2 TensorCores per chip: keep two 1024-wide N tiles so the
    # megacore shards the dominant fc1 weight stream across both cores.
    # v5e / v6e (single TC): one 2048-wide N tile => grid (1, 7), fewer steps.
    try:
        kind = jax.devices()[0].device_kind.lower()
    except Exception:
        kind = ""
    return HID if ("v7" in kind or "7x" in kind) else 2 * HID


# ----------------------------------------------------------------------------
# Parameter repacking (one-time, off the critical path)
# ----------------------------------------------------------------------------
def prepare_params(p):
    def permute_fc1_rows(w):
        # PyTorch's x.view(-1, 128*7*7) flattens NCHW -> row order (c, h, w);
        # we keep the conv output in NHWC, so permute the weight rows to
        # (h, w, c) once here => no runtime transpose on the critical path.
        return w.reshape(128, 7, 7, -1).transpose(1, 2, 0, 3).reshape(FEAT, -1)

    fc1_w = jnp.concatenate([permute_fc1_rows(p["fc_mu1_w"]),
                             permute_fc1_rows(p["fc_sig1_w"])], axis=1)
    fc2_w = jnp.stack([p["fc_mu2_w"], p["fc_sig2_w"]], axis=0)        # (2,1024,64)
    fc2_b = jnp.stack([p["fc_mu2_b"], p["fc_sig2_b"]], axis=0)[:, None, :]

    return {
        "conv1_w_hwio": jnp.transpose(p["conv1_w"], (2, 3, 1, 0)),    # (4,4,1,64)
        "conv1_b": p["conv1_b"],
        "conv2_w_hwio": jnp.transpose(p["conv2_w"], (2, 3, 1, 0)),    # (4,4,64,128)
        # conv2_b / fc1 biases intentionally dropped: they cancel under
        # train-mode batch-stat BatchNorm.
        "bn2_g": p["bn2_g"], "bn2_b": p["bn2_b"],
        "fc1_w": fc1_w.astype(jnp.bfloat16),                          # (6272,2048)
        "bn1_g": jnp.concatenate([p["bn_mu_g"], p["bn_sig_g"]]),
        "bn1_b": jnp.concatenate([p["bn_mu_b"], p["bn_sig_b"]]),
        "fc2_w": fc2_w.astype(jnp.bfloat16),                          # (2,1024,64)
        "fc2_b": fc2_b.astype(jnp.float32),                           # (2,1,64)
    }


# ----------------------------------------------------------------------------
# Forward pass
# ----------------------------------------------------------------------------
def encoder_forward(x_nchw, kp, *, tn=None):
    if tn is None:
        tn = _default_tn()
    x = jnp.transpose(x_nchw, (0, 2, 3, 1)).astype(jnp.float32)       # NHWC
    N = x.shape[0]

    # conv1 + LeakyReLU and conv2 + BatchNorm2d + LeakyReLU: negligible weight
    # traffic / FLOPs (grid would be (1,1)), so per the perf review they are
    # left to XLA (which fuses the elementwise tail) instead of paying two
    # extra pallas_call launches.
    h = lax.conv_general_dilated(x, kp["conv1_w_hwio"], (2, 2), ((1, 1), (1, 1)),
                                 dimension_numbers=("NHWC", "HWIO", "NHWC"))
    h = h + kp["conv1_b"]
    h = jnp.where(h >= 0, h, LRELU_SLOPE * h)                          # (N,14,14,64)

    h = lax.conv_general_dilated(h, kp["conv2_w_hwio"], (2, 2), ((1, 1), (1, 1)),
                                 dimension_numbers=("NHWC", "HWIO", "NHWC"))
    # conv2 bias omitted: cancels exactly under train-mode batch-stat BN.
    mean = jnp.mean(h, axis=(0, 1, 2), keepdims=True)
    var = jnp.mean((h - mean) ** 2, axis=(0, 1, 2), keepdims=True)     # biased var
    h = (h - mean) * lax.rsqrt(var + BN_EPS) * kp["bn2_g"] + kp["bn2_b"]
    h = jnp.where(h >= 0, h, LRELU_SLOPE * h)                          # (N,7,7,128)

    # x.view(-1, 128*7*7): absorbed by the pre-permuted fc1 weight rows, so a
    # plain contiguous NHWC reshape is enough (no runtime transpose).
    feat = h.reshape(N, FEAT)                                          # (N, 6272)

    # One fused Pallas call: FC1(mu||sigma) + BN1d + LeakyReLU + FC2 heads.
    return encoder_heads(feat, kp["fc1_w"], kp["bn1_g"], kp["bn1_b"],
                         kp["fc2_w"], kp["fc2_b"], tn=tn)


# Module-order reference on the RAW params (includes the pre-BN biases that the
# fast path drops — they cancel under train-mode BN, so results must match).
# Activations/weights are cast to bf16 at the FC matmuls to mirror the Pallas
# numerics.
# TODO(synk): this mirrors the bf16 casts, so it is not an independent f32
# oracle for bf16 rounding error vs a true f32 PyTorch module.
def reference_forward(x_nchw, p):
    x = jnp.transpose(x_nchw, (0, 2, 3, 1)).astype(jnp.float32)
    N = x.shape[0]

    def conv(h, w, b):
        w_hwio = jnp.transpose(w, (2, 3, 1, 0))
        h = lax.conv_general_dilated(h, w_hwio, (2, 2), ((1, 1), (1, 1)),
                                     dimension_numbers=("NHWC", "HWIO", "NHWC"))
        return h + b

    def lrelu(h):
        return jnp.where(h >= 0, h, LRELU_SLOPE * h)

    def bn(h, g, b, axes):
        mean = jnp.mean(h, axis=axes, keepdims=True)
        var = jnp.mean((h - mean) ** 2, axis=axes, keepdims=True)
        return (h - mean) * lax.rsqrt(var + BN_EPS) * g + b

    h = lrelu(conv(x, p["conv1_w"], p["conv1_b"]))
    h = lrelu(bn(conv(h, p["conv2_w"], p["conv2_b"]),
                 p["bn2_g"], p["bn2_b"], (0, 1, 2)))
    # PyTorch x.view(-1, 128*7*7): NCHW (c,h,w) feature order.
    feat = jnp.transpose(h, (0, 3, 1, 2)).reshape(N, FEAT)

    def head(w1, b1, g, b, w2, b2):
        y = jnp.dot(feat.astype(jnp.bfloat16), w1.astype(jnp.bfloat16),
                    preferred_element_type=jnp.float32) + b1
        y = lrelu(bn(y, g, b, (0,)))
        return jnp.dot(y.astype(jnp.bfloat16), w2.astype(jnp.bfloat16),
                       preferred_element_type=jnp.float32) + b2

    mu = head(p["fc_mu1_w"], p["fc_mu1_b"], p["bn_mu_g"], p["bn_mu_b"],
              p["fc_mu2_w"], p["fc_mu2_b"])
    sigma = head(p["fc_sig1_w"], p["fc_sig1_b"], p["bn_sig_g"], p["bn_sig_b"],
                 p["fc_sig2_w"], p["fc_sig2_b"])
    return mu, sigma


# ----------------------------------------------------------------------------
# Deterministic synthetic parameters (shapes from Encoder.__init__, 'mnist')
# ----------------------------------------------------------------------------
def make_params(key):
    ks = jax.random.split(key, 12)
    f32 = jnp.float32

    def normal(k, shape, scale):
        return (scale * jax.random.normal(k, shape)).astype(f32)

    return {
        "conv1_w": normal(ks[0], (64, 1, 4, 4), 0.05),
        "conv1_b": normal(ks[1], (64,), 0.05),
        "conv2_w": normal(ks[2], (128, 64, 4, 4), 0.02),
        "conv2_b": normal(ks[3], (128,), 0.02),
        "bn2_g": jnp.ones((128,), f32),
        "bn2_b": jnp.zeros((128,), f32),
        "fc_mu1_w": normal(ks[4], (FEAT, 1024), 0.01),     # matmul-ready (in,out)
        "fc_mu1_b": normal(ks[5], (1024,), 0.01),
        "bn_mu_g": jnp.ones((1024,), f32),
        "bn_mu_b": jnp.zeros((1024,), f32),
        "fc_mu2_w": normal(ks[6], (1024, Z_DIM), 0.02),
        "fc_mu2_b": normal(ks[7], (Z_DIM,), 0.02),
        "fc_sig1_w": normal(ks[8], (FEAT, 1024), 0.01),
        "fc_sig1_b": normal(ks[9], (1024,), 0.01),
        "bn_sig_g": jnp.ones((1024,), f32),
        "bn_sig_b": jnp.zeros((1024,), f32),
        "fc_sig2_w": normal(ks[10], (1024, Z_DIM), 0.02),
        "fc_sig2_b": normal(ks[11], (Z_DIM,), 0.02),
    }


if __name__ == "__main__":
    # MNIST architecture is fixed at 28x28x1; batch kept small.
    x = jax.random.normal(jax.random.PRNGKey(0), (2, 1, 28, 28), dtype=jnp.float32)
    params = make_params(jax.random.PRNGKey(42))
    kp = prepare_params(params)       # one-time repack (permute / fuse / bf16)

    tn = _default_tn()                # chip-aware N tiling (resolved pre-trace)
    fwd = jax.jit(functools.partial(encoder_forward, tn=tn))
    mu, sigma = fwd(x, kp)
    jax.block_until_ready((mu, sigma))

    assert mu.shape == (2, Z_DIM) and sigma.shape == (2, Z_DIM)
    assert bool(jnp.all(jnp.isfinite(mu))) and bool(jnp.all(jnp.isfinite(sigma)))

    mu_r, sigma_r = jax.jit(reference_forward)(x, params)
    jax.block_until_ready((mu_r, sigma_r))
    assert bool(jnp.allclose(mu, mu_r, atol=2e-2, rtol=2e-2))
    assert bool(jnp.allclose(sigma, sigma_r, atol=2e-2, rtol=2e-2))

    # TODO(synk): BatchNorm uses training-mode batch statistics (PyTorch default
    # for a freshly-constructed module); eval-mode running stats would be a
    # fixed affine and is not modeled here.
    # TODO(synk): the fused BN epilogue requires the full batch resident in one
    # M block; large batches need an M-tiled / two-pass BN variant.
    # TODO(synk): for repeated invocations, fc1_w (~12.8 MB bf16) could be
    # pinned in VMEM across calls (cross-call DMA future); not implemented.
    print("KERNEL_OK")
</pallas_src>

<mosaic_0001>
module attributes {stable_mosaic.version = 11 : i64} {
  func.func @_fc_fused_kernel(%arg0: i32, %arg1: i32, %arg2: memref<2x896xf32, #tpu.memory_space<vmem>>, %arg3: memref<896x2048xbf16, #tpu.memory_space<vmem>>, %arg4: memref<1x2048xf32, #tpu.memory_space<vmem>>, %arg5: memref<1x2048xf32, #tpu.memory_space<vmem>>, %arg6: memref<2x1024x64xbf16, #tpu.memory_space<vmem>>, %arg7: memref<2x1x64xf32, #tpu.memory_space<vmem>>, %arg8: memref<2x2x64xf32, #tpu.memory_space<vmem>>, %arg9: memref<2x2048xf32, #tpu.memory_space<vmem>>) attributes {dimension_semantics = [#tpu.dimension_semantics<parallel>, #tpu.dimension_semantics<arbitrary>], iteration_bounds = array<i64: 1, 7>, scalar_prefetch = 0 : i64, scratch_operands = 1 : i64, tpu.core_type = #tpu.core_type<tc>, window_params = [{transform_indices = @transform_0, window_bounds = array<i64: 2, 896>}, {transform_indices = @transform_1, window_bounds = array<i64: 896, 2048>}, {transform_indices = @transform_2, window_bounds = array<i64: 1, 2048>}, {transform_indices = @transform_3, window_bounds = array<i64: 1, 2048>}, {transform_indices = @transform_4, window_bounds = array<i64: 2, 1024, 64>}, {transform_indices = @transform_5, window_bounds = array<i64: 2, 1, 64>}, {transform_indices = @transform_6, window_bounds = array<i64: 2, 2, 64>}]} {
    %c0_i32 = arith.constant 0 : i32
    %0 = arith.cmpi eq, %arg1, %c0_i32 : i32
    %1 = arith.extui %0 : i1 to i32
    %c0_i32_0 = arith.constant 0 : i32
    %2 = arith.cmpi ne, %1, %c0_i32_0 : i32
    scf.if %2 {
      %cst_9 = arith.constant 0.000000e+00 : f32
      %13 = vector.broadcast %cst_9 : f32 to vector<2x2048xf32>
      %c0_10 = arith.constant 0 : index
      %c0_11 = arith.constant 0 : index
      %14 = vector.load %arg9[%c0_10, %c0_11] : memref<2x2048xf32, #tpu.memory_space<vmem>>, vector<2x2048xf32>
      tpu.vector_store %arg9[%c0_10, %c0_11], %13 {strides = array<i32>} : memref<2x2048xf32, #tpu.memory_space<vmem>>, vector<2x2048xf32>,
    } else {
    }
    %c0 = arith.constant 0 : index
    %c0_1 = arith.constant 0 : index
    %3 = vector.load %arg9[%c0, %c0_1] : memref<2x2048xf32, #tpu.memory_space<vmem>>, vector<2x2048xf32>
    %c0_2 = arith.constant 0 : index
    %c0_3 = arith.constant 0 : index
    %4 = vector.load %arg2[%c0_2, %c0_3] : memref<2x896xf32, #tpu.memory_space<vmem>>, vector<2x896xf32>
    %5 = arith.truncf %4 : vector<2x896xf32> to vector<2x896xbf16>
    %c0_4 = arith.constant 0 : index
    %c0_5 = arith.constant 0 : index
    %6 = vector.load %arg3[%c0_4, %c0_5] : memref<896x2048xbf16, #tpu.memory_space<vmem>>, vector<896x2048xbf16>
    %cst = arith.constant dense<0.000000e+00> : vector<2x2048xf32>
    %7 = tpu.matmul %5, %6, %cst {dimension_numbers = #tpu.dot_dimension_numbers<[1], [0], [0], [1], [0, 0, 1, 1], [], []>} : vector<2x896xbf16>, vector<896x2048xbf16>, vector<2x2048xf32> -> vector<2x2048xf32>
    %8 = arith.addf %3, %7 : vector<2x2048xf32>
    %c0_6 = arith.constant 0 : index
    %c0_7 = arith.constant 0 : index
    %9 = vector.load %arg9[%c0_6, %c0_7] : memref<2x2048xf32, #tpu.memory_space<vmem>>, vector<2x2048xf32>
    tpu.vector_store %arg9[%c0_6, %c0_7], %8 {strides = array<i32>} : memref<2x2048xf32, #tpu.memory_space<vmem>>, vector<2x2048xf32>,
    %c6_i32 = arith.constant 6 : i32
    %10 = arith.cmpi eq, %arg1, %c6_i32 : i32
    %11 = arith.extui %10 : i1 to i32
    %c0_i32_8 = arith.constant 0 : i32
    %12 = arith.cmpi ne, %11, %c0_i32_8 : i32
    scf.if %12 {
      %c0_9 = arith.constant 0 : index
      %c0_10 = arith.constant 0 : index
      %13 = vector.load %arg9[%c0_9, %c0_10] : memref<2x2048xf32, #tpu.memory_space<vmem>>, vector<2x2048xf32>
      %cst_11 = arith.constant dense<0.000000e+00> : vector<2048xf32>
      %14 = vector.multi_reduction <add>, %13, %cst_11 [0] : vector<2x2048xf32> to vector<2048xf32>
      %15 = vector.shape_cast %14 : vector<2048xf32> to vector<1x2048xf32>
      %cst_12 = arith.constant 2.000000e+00 : f32
      %16 = vector.broadcast %cst_12 : f32 to vector<1x2048xf32>
      %17 = arith.divf %15, %16 : vector<1x2048xf32>
      %18 = vector.broadcast %17 : vector<1x2048xf32> to vector<2x2048xf32>
      %19 = arith.subf %13, %18 : vector<2x2048xf32>
      %20 = arith.mulf %19, %19 : vector<2x2048xf32>
      %cst_13 = arith.constant dense<0.000000e+00> : vector<2048xf32>
      %21 = vector.multi_reduction <add>, %20, %cst_13 [0] : vector<2x2048xf32> to vector<2048xf32>
      %22 = vector.shape_cast %21 : vector<2048xf32> to vector<1x2048xf32>
      %cst_14 = arith.constant 2.000000e+00 : f32
      %23 = vector.broadcast %cst_14 : f32 to vector<1x2048xf32>
      %24 = arith.divf %22, %23 : vector<1x2048xf32>
      %25 = vector.broadcast %17 : vector<1x2048xf32> to vector<2x2048xf32>
      %26 = arith.subf %13, %25 : vector<2x2048xf32>
      %cst_15 = arith.constant 9.99999974E-6 : f32
      %27 = vector.broadcast %cst_15 : f32 to vector<1x2048xf32>
      %28 = arith.addf %24, %27 : vector<1x2048xf32>
      %29 = math.rsqrt %28 : vector<1x2048xf32>
      %30 = vector.broadcast %29 : vector<1x2048xf32> to vector<2x2048xf32>
      %31 = arith.mulf %26, %30 : vector<2x2048xf32>
      %c0_16 = arith.constant 0 : index
      %c0_17 = arith.constant 0 : index
      %32 = vector.load %arg4[%c0_16, %c0_17] : memref<1x2048xf32, #tpu.memory_space<vmem>>, vector<1x2048xf32>
      %33 = vector.broadcast %32 : vector<1x2048xf32> to vector<2x2048xf32>
      %34 = arith.mulf %31, %33 : vector<2x2048xf32>
      %c0_18 = arith.constant 0 : index
      %c0_19 = arith.constant 0 : index
      %35 = vector.load %arg5[%c0_18, %c0_19] : memref<1x2048xf32, #tpu.memory_space<vmem>>, vector<1x2048xf32>
      %36 = vector.broadcast %35 : vector<1x2048xf32> to vector<2x2048xf32>
      %37 = arith.addf %34, %36 : vector<2x2048xf32>
      %cst_20 = arith.constant 0.000000e+00 : f32
      %38 = vector.broadcast %cst_20 : f32 to vector<2x2048xf32>
      %39 = arith.cmpf oge, %37, %38 : vector<2x2048xf32>
      %cst_21 = arith.constant 2.000000e-01 : f32
      %40 = vector.broadcast %cst_21 : f32 to vector<2x2048xf32>
      %41 = arith.mulf %40, %37 : vector<2x2048xf32>
      %42 = arith.select %39, %37, %41 : vector<2x2048xi1>, vector<2x2048xf32>
      %43 = arith.truncf %42 : vector<2x2048xf32> to vector<2x2048xbf16>
      %44 = vector.extract_strided_slice %43 {offsets = [0, 0], sizes = [2, 1024], strides = [1, 1]} : vector<2x2048xbf16> to vector<2x1024xbf16>
      %c0_22 = arith.constant 0 : index
      %c0_23 = arith.constant 0 : index
      %c0_24 = arith.constant 0 : index
      %45 = vector.load %arg6[%c0_22, %c0_23, %c0_24] : memref<2x1024x64xbf16, #tpu.memory_space<vmem>>, vector<1x1024x64xbf16>
      %46 = vector.shape_cast %45 : vector<1x1024x64xbf16> to vector<1024x64xbf16>
      %cst_25 = arith.constant dense<0.000000e+00> : vector<2x64xf32>
      %47 = tpu.matmul %44, %46, %cst_25 {dimension_numbers = #tpu.dot_dimension_numbers<[1], [0], [0], [1], [0, 0, 1, 1], [], []>} : vector<2x1024xbf16>, vector<1024x64xbf16>, vector<2x64xf32> -> vector<2x64xf32>
      %c0_26 = arith.constant 0 : index
      %c0_27 = arith.constant 0 : index
      %c0_28 = arith.constant 0 : index
      %48 = vector.load %arg7[%c0_26, %c0_27, %c0_28] : memref<2x1x64xf32, #tpu.memory_space<vmem>>, vector<1x1x64xf32>
      %49 = vector.shape_cast %48 : vector<1x1x64xf32> to vector<1x64xf32>
      %50 = vector.broadcast %49 : vector<1x64xf32> to vector<2x64xf32>
      %51 = arith.addf %47, %50 : vector<2x64xf32>
      %c0_29 = arith.constant 0 : index
      %c0_30 = arith.constant 0 : index
      %c0_31 = arith.constant 0 : index
      %52 = vector.load %arg8[%c0_29, %c0_30, %c0_31] : memref<2x2x64xf32, #tpu.memory_space<vmem>>, vector<1x2x64xf32>
      %53 = vector.shape_cast %52 : vector<1x2x64xf32> to vector<2x64xf32>
      %54 = vector.shape_cast %51 : vector<2x64xf32> to vector<1x2x64xf32>
      tpu.vector_store %arg8[%c0_29, %c0_30, %c0_31], %54 {strides = array<i32>} : memref<2x2x64xf32, #tpu.memory_space<vmem>>, vector<1x2x64xf32>,
      %55 = vector.extract_strided_slice %43 {offsets = [0, 1024], sizes = [2, 1024], strides = [1, 1]} : vector<2x2048xbf16> to vector<2x1024xbf16>
      %c1 = arith.constant 1 : index
      %c0_32 = arith.constant 0 : index
      %c0_33 = arith.constant 0 : index
      %56 = vector.load %arg6[%c1, %c0_32, %c0_33] : memref<2x1024x64xbf16, #tpu.memory_space<vmem>>, vector<1x1024x64xbf16>
      %57 = vector.shape_cast %56 : vector<1x1024x64xbf16> to vector<1024x64xbf16>
      %cst_34 = arith.constant dense<0.000000e+00> : vector<2x64xf32>
      %58 = tpu.matmul %55, %57, %cst_34 {dimension_numbers = #tpu.dot_dimension_numbers<[1], [0], [0], [1], [0, 0, 1, 1], [], []>} : vector<2x1024xbf16>, vector<1024x64xbf16>, vector<2x64xf32> -> vector<2x64xf32>
      %c1_35 = arith.constant 1 : index
      %c0_36 = arith.constant 0 : index
      %c0_37 = arith.constant 0 : index
      %59 = vector.load %arg7[%c1_35, %c0_36, %c0_37] : memref<2x1x64xf32, #tpu.memory_space<vmem>>, vector<1x1x64xf32>
      %60 = vector.shape_cast %59 : vector<1x1x64xf32> to vector<1x64xf32>
      %61 = vector.broadcast %60 : vector<1x64xf32> to vector<2x64xf32>
      %62 = arith.addf %58, %61 : vector<2x64xf32>
      %c1_38 = arith.constant 1 : index
      %c0_39 = arith.constant 0 : index
      %c0_40 = arith.constant 0 : index
      %63 = vector.load %arg8[%c1_38, %c0_39, %c0_40] : memref<2x2x64xf32, #tpu.memory_space<vmem>>, vector<1x2x64xf32>
      %64 = vector.shape_cast %63 : vector<1x2x64xf32> to vector<2x64xf32>
      %65 = vector.shape_cast %62 : vector<2x64xf32> to vector<1x2x64xf32>
      tpu.vector_store %arg8[%c1_38, %c0_39, %c0_40], %65 {strides = array<i32>} : memref<2x2x64xf32, #tpu.memory_space<vmem>>, vector<1x2x64xf32>,
    } else {
    }
    return
  }
  func.func @transform_0(%arg0: i32, %arg1: i32) -> (i32, i32) {
    %c0_i32 = arith.constant 0 : i32
    %c0_i32_0 = arith.constant 0 : i32
    return %c0_i32, %arg1 : i32, i32
  }
  func.func @transform_1(%arg0: i32, %arg1: i32) -> (i32, i32) {
    %c0_i32 = arith.constant 0 : i32
    return %arg1, %arg0 : i32, i32
  }
  func.func @transform_2(%arg0: i32, %arg1: i32) -> (i32, i32) {
    %c0_i32 = arith.constant 0 : i32
    %c0_i32_0 = arith.constant 0 : i32
    return %c0_i32, %arg0 : i32, i32
  }
  func.func @transform_3(%arg0: i32, %arg1: i32) -> (i32, i32) {
    %c0_i32 = arith.constant 0 : i32
    %c0_i32_0 = arith.constant 0 : i32
    return %c0_i32, %arg0 : i32, i32
  }
  func.func @transform_4(%arg0: i32, %arg1: i32) -> (i32, i32, i32) {
    %c0_i32 = arith.constant 0 : i32
    %c0_i32_0 = arith.constant 0 : i32
    %c0_i32_1 = arith.constant 0 : i32
    return %arg0, %c0_i32, %c0_i32_0 : i32, i32, i32
  }
  func.func @transform_5(%arg0: i32, %arg1: i32) -> (i32, i32, i32) {
    %c0_i32 = arith.constant 0 : i32
    %c0_i32_0 = arith.constant 0 : i32
    %c0_i32_1 = arith.constant 0 : i32
    return %arg0, %c0_i32, %c0_i32_0 : i32, i32, i32
  }
  func.func @transform_6(%arg0: i32, %arg1: i32) -> (i32, i32, i32) {
    %c0_i32 = arith.constant 0 : i32
    %c0_i32_0 = arith.constant 0 : i32
    %c0_i32_1 = arith.constant 0 : i32
    return %arg0, %c0_i32, %c0_i32_0 : i32, i32, i32
  }
}

</mosaic_0001>

<bundles_post_ra>
// kernel: encoder_forward.1
= control target key start
LH: loop header
LB: loop body
LE: loop exit
PB: predicated region body
PF: predicated region fallthrough
CT: control target
= control target key end

     0   :  { %11 = vsyncpa [#allocation4], 0  ;;  %s13617_s0 = inlined_call_operand.vmem [shape: f32[2,6272], index: 0, kind: input, shape index: {}]   ;;  %s13618_s1 = inlined_call_operand.hbm [shape: bf16[6272,2048], index: 1, kind: input, shape index: {}]   ;;  %s13619_s2 = inlined_call_operand.hbm [shape: f32[1,2048], index: 2, kind: input, shape index: {}]   ;;  %s13620_s3 = inlined_call_operand.hbm [shape: f32[1,2048], index: 3, kind: input, shape index: {}]   ;;  %s13621_s4 = inlined_call_operand.vmem [shape: bf16[2,1024,64], index: 4, kind: input, shape index: {}]   ;;  %s13622_s5 = inlined_call_operand.hbm [shape: f32[2,1,64], index: 5, kind: input, shape index: {}]   ;;  %s13623_s6 = inlined_call_operand.vmem [shape: f32[2,2,64], index: 6, kind: output, shape index: {}]  }
   0x1   :  { %13 = vsyncpa [#allocation4 + $0x1], 0 }
   0x2   :  { %14 = vsyncpa [#allocation6], 0 }
   0x3   :  { %15 = vsyncpa [#allocation9], 0  ;;  %s11753_s21 = smov 0   ;;  %s11755_s22 = smov 0  }
   0x4   :  { %s11757_s23 = smov 0   ;;  %s11759_s24 = smov 0  }
   0x5   :  { %s11761_s25 = smov 0   ;;  %s11763_s26 = smov 0  }
   0x6 LB: > { %s9822_s27 = sadd.s32 4294967295, %s11705_s26   ;;  %p81_p0 = scmp.ne.s32.totalorder %s11689_s22, %s11685_s21  ;;  %s11705_s26 = sphi %s11763_s26, %s21_s26   ;;  %s11701_s25 = sphi %s11761_s25, %s13641_s25   ;;  %s11697_s24 = sphi %s11759_s24, %s13640_s24   ;;  %s11693_s23 = sphi %s11757_s23, %s13639_s23   ;;  %s11689_s22 = sphi %s11755_s22, %s13638_s22   ;;  %s11685_s21 = sphi %s11753_s21, %s13637_s21  }
   0x7   : > { %p11783_p1 = scmp.eq.s32.totalorder %s9822_s27, 0  ;;  %p9823_p2 = scmp.ge.s32.totalorder %s11705_s26, 1 }
   0x8   : > { %p222_p3 = scmp.lt.s32.totalorder %s11705_s26, 8  ;;  %s11707_s7 = smov [#allocation5]  }
   0x9   : > { %s13628_s28 = scalar_select %p11783_p1, 1, 0 }
   0xa   : > { %p11791_p4 = por %p11783_p1, %p81_p0  ;;  %p11795_p5 = pnand %p9823_p2, %p222_p3 }
   0xb   : > { %s238_s8 = sshll.u32 %s11707_s7, 4  ;;  %s11708_s9 = smov [#allocation7]   ;;  %s239_s8 = int_to_ptr.vmem [resolvable:$true] %s238_s8 }
   0xc   : > { %s13629_s29 = scalar_select %p11791_p4, 1, 0 }
   0xd   : > { %s13630_s30 = scalar_select %p11795_p5, 1, 0 }
   0xe   : > { %p11288_p6 = pneg %p11795_p5  ;;  %s252_s10 = sshll.u32 %s11708_s9, 4  ;;  %s11807_s10 = int_to_ptr.vmem [resolvable:$true] %s252_s10 }
   0xf   : > { %s11709_s12 = smov [#allocation8]   ;;  %s11533_s16 = scalar_lea.hbm %s13619_s2, 256 }
  0x10   : > { %p11803_p7 = pnand %p11288_p6, %p11783_p1  ;;  %s275_s13 = sshll.u32 %s11709_s12, 4  ;;  %s11809_s13 = int_to_ptr.vmem [resolvable:$true] %s275_s13 }
  0x11   : > { %p11534_p8 = scmp.ne.s32.totalorder %s13619_s2, %s11533_s16  ;;  %p11540_p12 = scmp.lt.u32.totalorder %s11533_s16, %s13619_s2 }
  0x12   : > { %p11819_p9 = pneg %p11803_p7 }
  0x14   : > { %p11536_p10 = pnand %p11819_p9, %p11534_p8 }
  0x16   : > { %p11537_p11 = pneg %p11536_p10 }
  0x18   : > { %p11542_p13 = pnand %p11540_p12, %p11537_p11 }
  0x1a   : > { %11545 = shalt.err (!%p11542_p13)
}
  0x1b   : > { %s11546_s27 = scalar_lea.vmem %s239_s8, 256  ;;  %p11554_p6 = scmp.lt.s32.totalorder %s239_s8, %s239_s8 }
  0x1c   : > { %p11547_p0 = scmp.ne.s32.totalorder %s239_s8, %s11546_s27  ;;  %p11555_p1 = scmp.lt.s32.totalorder %s11546_s27, %s11546_s27 }
  0x1e   : > { %p11549_p2 = pnand %p11547_p0, %p11819_p9  ;;  %p11556_p4 = por %p11555_p1, %p11554_p6 }
  0x20   : > { %p11550_p3 = pneg %p11549_p2 }
  0x22   : > { %p11557_p5 = pnand %p11556_p4, %p11550_p3 }
  0x24   : > { %11560 = shalt.err (!%p11557_p5)
}
  0x25   : > { %11291 = dma.hbm_to_vmem [thread:$0]  (!%p11803_p7), %s13619_s2, 256, %s239_s8, [#allocation6]  }
  0x26   : > { %s11561_s15 = scalar_lea.hbm %s13620_s3, 256 }
  0x27   : > { %p11562_p8 = scmp.ne.s32.totalorder %s13620_s3, %s11561_s15  ;;  %p11568_p4 = scmp.lt.u32.totalorder %s11561_s15, %s13620_s3 }
  0x29   : > { %p11564_p10 = pnand %p11562_p8, %p11819_p9 }
  0x2b   : > { %p11565_p1 = pneg %p11564_p10 }
  0x2d   : > { %p11570_p5 = pnand %p11568_p4, %p11565_p1 }
  0x2f   : > { %11573 = shalt.err (!%p11570_p5)
}
  0x30   : > { %s11574_s8 = scalar_lea.vmem %s11807_s10, 256  ;;  %p11582_p0 = scmp.lt.s32.totalorder %s11807_s10, %s11807_s10 }
  0x31   : > { %p11575_p11 = scmp.ne.s32.totalorder %s11807_s10, %s11574_s8  ;;  %p11583_p2 = scmp.lt.s32.totalorder %s11574_s8, %s11574_s8 }
  0x33   : > { %p11577_p12 = pnand %p11575_p11, %p11819_p9  ;;  %p11584_p3 = por %p11583_p2, %p11582_p0 }
  0x35   : > { %p11578_p13 = pneg %p11577_p12 }
  0x37   : > { %p11585_p6 = pnand %p11584_p3, %p11578_p13 }
  0x39   : > { %11588 = shalt.err (!%p11585_p6)
}
  0x3a   : > { %11294 = dma.hbm_to_vmem [thread:$0]  (!%p11803_p7), %s13620_s3, 256, %s11807_s10, [#allocation6]  }
  0x3b   : > { %s11589_s12 = scalar_lea.hbm %s13622_s5, 32 }
  0x3c   : > { %p11590_p8 = scmp.ne.s32.totalorder %s13622_s5, %s11589_s12  ;;  %p11596_p4 = scmp.lt.u32.totalorder %s11589_s12, %s13622_s5 }
  0x3e   : > { %p11592_p10 = pnand %p11590_p8, %p11819_p9 }
  0x40   : > { %p11593_p1 = pneg %p11592_p10 }
  0x42   : > { %p11598_p5 = pnand %p11596_p4, %p11593_p1 }
  0x44   : > { %11601 = shalt.err (!%p11598_p5)
}
  0x45   : > { %s11602_s10 = scalar_lea.vmem %s11809_s13, 32  ;;  %p11610_p0 = scmp.lt.s32.totalorder %s11809_s13, %s11809_s13 }
  0x46   : > { %p11603_p11 = scmp.ne.s32.totalorder %s11809_s13, %s11602_s10  ;;  %p11611_p2 = scmp.lt.s32.totalorder %s11602_s10, %s11602_s10 }
  0x48   : > { %p11605_p12 = pnand %p11603_p11, %p11819_p9  ;;  %p11612_p3 = por %p11611_p2, %p11610_p0 }
  0x4a   : > { %p11606_p13 = pneg %p11605_p12 }
  0x4c   : > { %p11613_p6 = pnand %p11612_p3, %p11606_p13 }
  0x4e   : > { %11616 = shalt.err (!%p11613_p6)
}
  0x4f   : > { %s11710_s18 = smov 16   ;;  %s11711_s19 = smov 1  }
  0x50   : > { %11297 = dma.hbm_to_vmem [thread:$0]  (!%p11803_p7), %s13622_s5, 32, %s11809_s13, [#allocation9], %s11710_s18, %s11710_s18, %s11711_s19  }
  0x51   : > { %s68_s21 = sadd.s32 1, %s11693_s23  ;;  %s30_s27 = sadd.s32 1, %s11701_s25 }
  0x52   : > { %p75_p9 = scmp.ne.s32.totalorder %s11693_s23, %s11689_s22  ;;  %p31_p8 = scmp.ge.s32.totalorder %s30_s27, 7 }
  0x53   : > { %p76_p10 = scmp.eq.s32.totalorder %s11705_s26, 0  ;;  %p11305_p1 = scmp.lt.s32.totalorder %s11705_s26, 7 }
  0x54   : > { %s298_s7 = sand.u32 1, %s11693_s23   ;;  %s13643_s27 = smov (%p31_p8, %s30_s27), 0 }
  0x55   : > { %p77_p4 = por %p76_p10, %p75_p9  ;;  %s63_s9 = ssub.s32 %s11701_s25, %s13643_s27 }
  0x56   : > { %s11272_s12 = smul.u32 7168, %s298_s7  ;;  %p66_p5 = scmp.eq.s32.totalorder %s63_s9, 0 }
  0x57   : > { %s10999_s11 = smul.u32 114688, %s11701_s25  ;;  %p11893_p11 = pnand %p11305_p1, %p77_p4 }
  0x58   : > { %s11898_s13 = scalar_select %p66_p5, %s11693_s23, %s68_s21  }
  0x59   : > { %s11903_s17 = scalar_lea.hbm %s13618_s1, %s10999_s11  ;;  %s302_s10 = scalar_lea.vmem [#allocation3], %s11272_s12 }
  0x5a   : > { %s312_s18 = sshll.u32 %s302_s10, 4  ;;  %s11907_s19 = scalar_lea.sflag [#allocation4], %s298_s7  ;;  %s11905_s18 = int_to_ptr.vmem [resolvable:$true] %s312_s18 }
  0x5b   : > { %s11617_s20 = scalar_lea.hbm %s11903_s17, 114688  ;;  %p11619_p12 = pneg %p11893_p11 }
  0x5c   : > { %p11618_p7 = scmp.ne.s32.totalorder %s11903_s17, %s11617_s20  ;;  %s11622_s9 = scalar_lea.hbm %s13618_s1, 802816 }
  0x5d   : > { %p11623_p2 = scmp.lt.u32.totalorder %s11903_s17, %s13618_s1  ;;  %p11624_p3 = scmp.lt.u32.totalorder %s11622_s9, %s11617_s20 }
  0x5e   : > { %p11620_p13 = pnand %p11619_p12, %p11618_p7  ;;  %p11626_p9 = scmp.lt.u32.totalorder %s11617_s20, %s11903_s17 }
  0x5f   : > { %p11625_p6 = por %p11624_p3, %p11623_p2 }
  0x60   : > { %p11621_p0 = pneg %p11620_p13 }
  0x61   : > { %p11627_p8 = por %p11626_p9, %p11625_p6 }
  0x63   : > { %p11628_p10 = pnand %p11627_p8, %p11621_p0 }
  0x65   : > { %11631 = shalt.err (!%p11628_p10)
}
  0x66   : > { %s11632_s7 = scalar_lea.vmem %s11905_s18, 114688  ;;  %s11712_s12 = smov [#allocation3]  }
  0x67   : > { %p11633_p1 = scmp.ne.s32.totalorder %s11905_s18, %s11632_s7  ;;  %s11637_s16 = sshll.u32 %s11712_s12, 4  ;;  %s11638_s16 = int_to_ptr.vmem [resolvable:$false] %s11637_s16 }
  0x68   : > { %s11639_s10 = scalar_lea.vmem %s11638_s16, 229376  ;;  %p11640_p7 = scmp.lt.s32.totalorder %s11905_s18, %s11638_s16 }
  0x69   : > { %p11635_p4 = pnand %p11633_p1, %p11619_p12  ;;  %p11641_p13 = scmp.lt.s32.totalorder %s11639_s10, %s11632_s7 }
  0x6b   : > { %p11636_p5 = pneg %p11635_p4  ;;  %p11642_p2 = por %p11641_p13, %p11640_p7 }
  0x6d   : > { %p11643_p3 = pnand %p11642_p2, %p11636_p5 }
  0x6f   : > { %11646 = shalt.err (!%p11643_p3)
}
  0x70   : > { %s11713_s20 = smov 1024   ;;  %s11714_s8 = smov 64  }
  0x71   : > { %11301 = dma.hbm_to_vmem [thread:$0]  (!%p11893_p11), %s11903_s17, 114688, %s11905_s18, %s11907_s19, %s11713_s20, %s11713_s20, %s11714_s8  }
  0x72   : > { %p13634_p12 = scmp.ne.s32.totalorder %s13630_s30, 0 }
  0x73   : > { %s326_s21 = sand.u32 (!%p13634_p12), 1, %s11689_s22   ;;  %p13635_p0 = scmp.ne.s32.totalorder (!%p13634_p12), %s13629_s29, 0 }
  0x74   : > { %324 = sbr.rel (%p13634_p12) target bundleno = 1661 (0x67d), region = 44  ;;  %s327_s11 = scalar_lea.sflag (!%p13634_p12), [#allocation4], %s326_s21 }
  0x75   : > { %s11273_s9 = smul.u32 (!%p13634_p12), 7168, %s326_s21 }
  0x77   : > { %s11938_s15 = scalar_lea.vmem (!%p13634_p12), [#allocation3], %s11273_s9 }
  0x7b   : > { %11672 = dma.done.wait (%p13635_p0), %s327_s11, 114688  }
  0x7c   : > { %11674 = vsyncadd (%p13635_p0), %s327_s11, 4294852608  ;;  %p13636_p6 = scmp.ne.s32.totalorder %s13628_s28, 0 }
  0x7e   : > { %11676 = dma.done.wait (%p13636_p6), [#allocation6], 512  }
  0x7f   : > { %11678 = vsyncadd (%p13636_p6), [#allocation6], 4294966784 }
  0x80   : > { %11680 = dma.done.wait (%p13636_p6), [#allocation9], 32  }
  0x81   : > { %11682 = vsyncadd (%p13636_p6), [#allocation9], 4294967264  ;;  %s382_s30 = smul.u32 7, %s11697_s24  ;;  %p9836_p9 = scmp.ne.s32.totalorder %s11697_s24, 0 }
  0x82   : > { %v11715_v0 = vmov (!%p9836_p9), 0.0  }
  0x83   : > { %p383_p11 = scmp.lt.s32.totalorder %s382_s30, 48  ;;  %410 = sbr.rel (%p9836_p9) target bundleno = 138 (0x8a), region = 64  ;;  %411 = vst [vmem:[#allocation2] sm:$0xff] (!%p9836_p9), %v11715_v0  ;;  %412 = vst [vmem:[#allocation2 + $0x8] sm:$0xff] (!%p9836_p9), %v11715_v0 }
  0x84   : > { %413 = vst [vmem:[#allocation2 + $0x10] sm:$0xff] (!%p9836_p9), %v11715_v0  ;;  %414 = vst [vmem:[#allocation2 + $0x18] sm:$0xff] (!%p9836_p9), %v11715_v0 }
  0x85   : > { %s13645_s30 = smov (!%p383_p11, %s382_s30), 48 }
  0x86   : > { %s9835_s14 = sshll.u32 %s13645_s30, 1 }
  0x87   : > { %s11956_s18 = scalar_lea.vmem %s13617_s0, %s9835_s14 }
  0x8a PF: > { %v470_v1 = vld [vmem:[%s11938_s15] sm:$0xff]  ;;  %v471_v3 = vld [vmem:[%s11938_s15 + $0x8] sm:$0xff]  ;;  %v11716_v33 = vmov 1983009808   ;;  %v427_v35 = vlaneseq  ;;  %p10733_p8 = scmp.ne.s32.totalorder %s11697_s24, 6 }
  0x8b   : > { %v478_v2 = vld [vmem:[%s11938_s15 + $0x40] sm:$0xff]  ;;  %v479_v5 = vld [vmem:[%s11938_s15 + $0x48] sm:$0xff]  ;;  %v425_v34 = vunpack.c.l.s4 %v11716_v33  ;;  %vm7350_vm0 = vcmask (!%p10733_p8), 1041408   ;;  %vm8999_vm5 = vcmask (!%p10733_p8), 517120  }
  0x8c   : > { %v9838_v4 = vcombine.high %v470_v1, %v478_v2  ;;  %v9837_v6 = vcombine.low %v470_v1, %v478_v2  ;;  %v486_v7 = vld [vmem:[%s11938_s15 + $0x80] sm:$0xff]  ;;  %v9840_v9 = vcombine.high %v471_v3, %v479_v5  ;;  %v9839_v10 = vcombine.low %v471_v3, %v479_v5  ;;  %v487_v12 = vld [vmem:[%s11938_s15 + $0x88] sm:$0xff] }
  0x8d   : > { %v494_v8 = vld [vmem:[%s11938_s15 + $0xc0] sm:$0xff]  ;;  %v495_v13 = vld [vmem:[%s11938_s15 + $0xc8] sm:$0xff]  ;;  %v426_v44 = vunpack.c.0.s8 %v425_v34  ;;  %v11981_v45 = vshrl.u32 %v427_v35, 7 }
  0x8e   : > { %v9854_v11 = vcombine.high %v486_v7, %v494_v8  ;;  %v502_v14 = vld [vmem:[%s11938_s15 + $0x100] sm:$0xff]  ;;  %5846 = vmatprep.subr.bf16.mxu0 %v9838_v4  ;;  %v9856_v15 = vcombine.high %v487_v12, %v495_v13  ;;  %v503_v17 = vld [vmem:[%s11938_s15 + $0x108] sm:$0xff]  ;;  %6010 = vmatprep.subr.bf16.mxu1 %v9840_v9  ;;  %v9853_v19 = vcombine.low %v486_v7, %v494_v8 }
  0x8f   : > { %v510_v16 = vld [vmem:[%s11938_s15 + $0x140] sm:$0xff]  ;;  %v511_v18 = vld [vmem:[%s11938_s15 + $0x148] sm:$0xff]  ;;  %5847 = vmatpush1.bf16.msra.mxu0 %v9837_v6  ;;  %6011 = vmatpush1.bf16.msra.mxu1 %v9839_v10  ;;  %v9855_v20 = vcombine.low %v487_v12, %v495_v13  ;;  %v11988_v54 = vsub.s32 %v426_v44, %v11981_v45 }
  0x90   : > { %5848 = vmatprep.subr.bf16.mxu0 %v9854_v11  ;;  %v9870_v21 = vcombine.high %v502_v14, %v510_v16  ;;  %6012 = vmatprep.subr.bf16.mxu1 %v9856_v15  ;;  %v9872_v22 = vcombine.high %v503_v17, %v511_v18  ;;  %v518_v23 = vld [vmem:[%s11938_s15 + $0x180] sm:$0xff]  ;;  %v519_v25 = vld [vmem:[%s11938_s15 + $0x188] sm:$0xff]  ;;  %v9869_v27 = vcombine.low %v502_v14, %v510_v16 }
  0x91   : > { %v526_v24 = vld [vmem:[%s11938_s15 + $0x1c0] sm:$0xff]  ;;  %v527_v26 = vld [vmem:[%s11938_s15 + $0x1c8] sm:$0xff]  ;;  %v9871_v28 = vcombine.low %v503_v17, %v511_v18 }
  0x92   : > { %v9886_v29 = vcombine.high %v518_v23, %v526_v24  ;;  %v9888_v30 = vcombine.high %v519_v25, %v527_v26  ;;  %v534_v31 = vld [vmem:[%s11938_s15 + $0x200] sm:$0xff]  ;;  %v535_v36 = vld [vmem:[%s11938_s15 + $0x208] sm:$0xff]  ;;  %v9885_v38 = vcombine.low %v518_v23, %v526_v24  ;;  %v9887_v39 = vcombine.low %v519_v25, %v527_v26 }
  0x93   : > { %5849 = vmatpush1.bf16.msra.mxu0 %v9853_v19  ;;  %6013 = vmatpush1.bf16.msra.mxu1 %v9855_v20  ;;  %v542_v32 = vld [vmem:[%s11938_s15 + $0x240] sm:$0xff]  ;;  %v543_v37 = vld [vmem:[%s11938_s15 + $0x248] sm:$0xff] }
  0x94   : > { %5850 = vmatprep.subr.bf16.mxu0 %v9870_v21  ;;  %6014 = vmatprep.subr.bf16.mxu1 %v9872_v22  ;;  %v9902_v40 = vcombine.high %v534_v31, %v542_v32  ;;  %v9904_v41 = vcombine.high %v535_v36, %v543_v37  ;;  %v550_v42 = vld [vmem:[%s11938_s15 + $0x280] sm:$0xff]  ;;  %v551_v46 = vld [vmem:[%s11938_s15 + $0x288] sm:$0xff]  ;;  %v9901_v48 = vcombine.low %v534_v31, %v542_v32 }
  0x95   : > { %v558_v43 = vld [vmem:[%s11938_s15 + $0x2c0] sm:$0xff]  ;;  %v559_v47 = vld [vmem:[%s11938_s15 + $0x2c8] sm:$0xff]  ;;  %v9903_v49 = vcombine.low %v535_v36, %v543_v37 }
  0x96   : > { %v9918_v50 = vcombine.high %v550_v42, %v558_v43  ;;  %v9920_v51 = vcombine.high %v551_v46, %v559_v47  ;;  %v566_v52 = vld [vmem:[%s11938_s15 + $0x300] sm:$0xff]  ;;  %v567_v55 = vld [vmem:[%s11938_s15 + $0x308] sm:$0xff]  ;;  %v9917_v57 = vcombine.low %v550_v42, %v558_v43  ;;  %v9919_v58 = vcombine.low %v551_v46, %v559_v47 }
  0x97   : > { %5851 = vmatpush1.bf16.msra.mxu0 %v9869_v27  ;;  %6015 = vmatpush1.bf16.msra.mxu1 %v9871_v28  ;;  %v574_v53 = vld [vmem:[%s11938_s15 + $0x340] sm:$0xff]  ;;  %v575_v56 = vld [vmem:[%s11938_s15 + $0x348] sm:$0xff] }
  0x98   : > { %5852 = vmatprep.subr.bf16.mxu0 %v9886_v29  ;;  %6016 = vmatprep.subr.bf16.mxu1 %v9888_v30  ;;  %v9934_v59 = vcombine.high %v566_v52, %v574_v53  ;;  %v11993_v60 = vld [vmem:[%s11956_s18] sm:$0xff]  ;;  %v9936_v61 = vcombine.high %v567_v55, %v575_v56  ;;  %v583_v1 = vld [vmem:[%s11938_s15 + $0x388] sm:$0xff]  ;;  %v9933_v3 = vcombine.low %v566_v52, %v574_v53 }
  0x99   : > { %v582_v62 = vld [vmem:[%s11938_s15 + $0x380] sm:$0xff]  ;;  %v11999_v0 = vrot.slane %v11993_v60, %v11988_v54  ;;  %v591_v2 = vld [vmem:[%s11938_s15 + $0x3c8] sm:$0xff]  ;;  %v9935_v5 = vcombine.low %v567_v55, %v575_v56 }
  0x9a   : > { %v590_v63 = vld [vmem:[%s11938_s15 + $0x3c0] sm:$0xff]  ;;  %v9952_v7 = vcombine.high %v583_v1, %v591_v2  ;;  %v599_v11 = vld [vmem:[%s11938_s15 + $0x408] sm:$0xff]  ;;  %v9951_v14 = vcombine.low %v583_v1, %v591_v2 }
  0x9b   : > { %5853 = vmatpush1.bf16.msra.mxu0 %v9885_v38  ;;  %6017 = vmatpush1.bf16.msra.mxu1 %v9887_v39  ;;  %v438_v4 = vcombine.high %v11999_v0, %v11999_v0  ;;  %v9950_v6 = vcombine.high %v582_v62, %v590_v63  ;;  %v598_v8 = vld [vmem:[%s11938_s15 + $0x400] sm:$0xff]  ;;  %v607_v12 = vld [vmem:[%s11938_s15 + $0x448] sm:$0xff]  ;;  %v9949_v13 = vcombine.low %v582_v62, %v590_v63 }
  0x9c   : > { %5854 = vmatprep.subr.bf16.mxu0 %v9902_v40  ;;  %6018 = vmatprep.subr.bf16.mxu1 %v9904_v41  ;;  %v606_v9 = vld [vmem:[%s11938_s15 + $0x440] sm:$0xff]  ;;  %v9968_v16 = vcombine.high %v599_v11, %v607_v12  ;;  %v615_v19 = vld [vmem:[%s11938_s15 + $0x488] sm:$0xff]  ;;  %v9967_v22 = vcombine.low %v599_v11, %v607_v12 }
  0x9d   : > { %v12007_v10 = vpack.c.bf16 %v438_v4, %v438_v4  ;;  %v9966_v15 = vcombine.high %v598_v8, %v606_v9  ;;  %v614_v17 = vld [vmem:[%s11938_s15 + $0x480] sm:$0xff]  ;;  %v623_v20 = vld [vmem:[%s11938_s15 + $0x4c8] sm:$0xff]  ;;  %v9965_v21 = vcombine.low %v598_v8, %v606_v9 }
  0x9e   : > { %v622_v18 = vld [vmem:[%s11938_s15 + $0x4c0] sm:$0xff]  ;;  %v9984_v24 = vcombine.high %v615_v19, %v623_v20  ;;  %v631_v27 = vld [vmem:[%s11938_s15 + $0x508] sm:$0xff]  ;;  %v9983_v30 = vcombine.low %v615_v19, %v623_v20 }
  0x9f   : > { %5855 = vmatpush1.bf16.msra.mxu0 %v9901_v48  ;;  %6019 = vmatpush1.bf16.msra.mxu1 %v9903_v49  ;;  %v9982_v23 = vcombine.high %v614_v17, %v622_v18  ;;  %v630_v25 = vld [vmem:[%s11938_s15 + $0x500] sm:$0xff]  ;;  %v639_v28 = vld [vmem:[%s11938_s15 + $0x548] sm:$0xff]  ;;  %v9981_v29 = vcombine.low %v614_v17, %v622_v18 }
  0xa0   : > { %5856 = vmatprep.subr.bf16.mxu0 %v9918_v50  ;;  %6020 = vmatprep.subr.bf16.mxu1 %v9920_v51  ;;  %v638_v26 = vld [vmem:[%s11938_s15 + $0x540] sm:$0xff]  ;;  %v10000_v32 = vcombine.high %v631_v27, %v639_v28  ;;  %v647_v35 = vld [vmem:[%s11938_s15 + $0x588] sm:$0xff]  ;;  %v9999_v38 = vcombine.low %v631_v27, %v639_v28 }
  0xa1   : > { %5878 = vmatprep.mubr.bf16.mxu0 %v12007_v10  ;;  %6042 = vmatprep.mubr.bf16.mxu1 %v12007_v10  ;;  %v9998_v31 = vcombine.high %v630_v25, %v638_v26  ;;  %v646_v33 = vld [vmem:[%s11938_s15 + $0x580] sm:$0xff]  ;;  %v655_v36 = vld [vmem:[%s11938_s15 + $0x5c8] sm:$0xff]  ;;  %v9997_v37 = vcombine.low %v630_v25, %v638_v26  ;;  %v12056_v26 = vpack.c.bf16 %v11999_v0, %v11999_v0 }
  0xa2   : > { %v654_v34 = vld [vmem:[%s11938_s15 + $0x5c0] sm:$0xff]  ;;  %v10016_v40 = vcombine.high %v647_v35, %v655_v36  ;;  %v663_v43 = vld [vmem:[%s11938_s15 + $0x608] sm:$0xff]  ;;  %v10015_v47 = vcombine.low %v647_v35, %v655_v36 }
  0xa3   : > { %5857 = vmatpush1.bf16.msra.mxu0 %v9917_v57  ;;  %6021 = vmatpush1.bf16.msra.mxu1 %v9919_v58  ;;  %v10014_v39 = vcombine.high %v646_v33, %v654_v34  ;;  %v662_v41 = vld [vmem:[%s11938_s15 + $0x600] sm:$0xff]  ;;  %v671_v44 = vld [vmem:[%s11938_s15 + $0x648] sm:$0xff]  ;;  %v10013_v46 = vcombine.low %v646_v33, %v654_v34 }
  0xa4   : > { %5858 = vmatprep.subr.bf16.mxu0 %v9934_v59  ;;  %6022 = vmatprep.subr.bf16.mxu1 %v9936_v61  ;;  %v670_v42 = vld [vmem:[%s11938_s15 + $0x640] sm:$0xff]  ;;  %v10032_v49 = vcombine.high %v663_v43, %v671_v44  ;;  %v679_v52 = vld [vmem:[%s11938_s15 + $0x688] sm:$0xff]  ;;  %v10031_v56 = vcombine.low %v663_v43, %v671_v44 }
  0xa5   : > { %v10030_v48 = vcombine.high %v662_v41, %v670_v42  ;;  %v678_v50 = vld [vmem:[%s11938_s15 + $0x680] sm:$0xff]  ;;  %v687_v53 = vld [vmem:[%s11938_s15 + $0x6c8] sm:$0xff]  ;;  %v10029_v55 = vcombine.low %v662_v41, %v670_v42 }
  0xa6   : > { %v686_v51 = vld [vmem:[%s11938_s15 + $0x6c0] sm:$0xff]  ;;  %v10048_v58 = vcombine.high %v679_v52, %v687_v53  ;;  %v695_v62 = vld [vmem:[%s11938_s15 + $0x708] sm:$0xff]  ;;  %v10047_v2 = vcombine.low %v679_v52, %v687_v53 }
  0xa7   : > { %5859 = vmatpush1.bf16.msra.mxu0 %v9933_v3  ;;  %6023 = vmatpush1.bf16.msra.mxu1 %v9935_v5  ;;  %v10046_v57 = vcombine.high %v678_v50, %v686_v51  ;;  %v694_v59 = vld [vmem:[%s11938_s15 + $0x700] sm:$0xff]  ;;  %v703_v63 = vld [vmem:[%s11938_s15 + $0x748] sm:$0xff]  ;;  %v10045_v1 = vcombine.low %v678_v50, %v686_v51 }
  0xa8   : > { %5860 = vmatprep.subr.bf16.mxu0 %v9950_v6  ;;  %6024 = vmatprep.subr.bf16.mxu1 %v9952_v7  ;;  %v702_v61 = vld [vmem:[%s11938_s15 + $0x740] sm:$0xff]  ;;  %v10064_v4 = vcombine.high %v695_v62, %v703_v63  ;;  %v423_v7 = vcombine.high %v11993_v60, %v11993_v60  ;;  %v711_v8 = vld [vmem:[%s11938_s15 + $0x788] sm:$0xff]  ;;  %v10063_v12 = vcombine.low %v695_v62, %v703_v63 }
  0xa9   : > { %v10062_v3 = vcombine.high %v694_v59, %v702_v61  ;;  %v710_v5 = vld [vmem:[%s11938_s15 + $0x780] sm:$0xff]  ;;  %v719_v9 = vld [vmem:[%s11938_s15 + $0x7c8] sm:$0xff]  ;;  %v10061_v11 = vcombine.low %v694_v59, %v702_v61 }
  0xaa   : > { %v718_v6 = vld [vmem:[%s11938_s15 + $0x7c0] sm:$0xff]  ;;  %v12046_v17 = vrot.slane %v423_v7, %v11988_v54  ;;  %v727_v60 = vld [vmem:[%s11938_s15 + $0x808] sm:$0xff]  ;;  %v10079_v20 = vcombine.low %v711_v8, %v719_v9 }
  0xab   : > { %5861 = vmatpush1.bf16.msra.mxu0 %v9949_v13  ;;  %6025 = vmatpush1.bf16.msra.mxu1 %v9951_v14  ;;  %v10078_v13 = vcombine.high %v710_v5, %v718_v6  ;;  %v10080_v14 = vcombine.high %v711_v8, %v719_v9  ;;  %v735_v18 = vld [vmem:[%s11938_s15 + $0x848] sm:$0xff]  ;;  %v10077_v19 = vcombine.low %v710_v5, %v718_v6  ;;  %v758_v33 = vld [vmem:[%s11938_s15 + $0x900] sm:$0xff] }
  0xac   : > { %5862 = vmatprep.subr.bf16.mxu0 %v9966_v15  ;;  %6026 = vmatprep.subr.bf16.mxu1 %v9968_v16  ;;  %v726_v15 = vld [vmem:[%s11938_s15 + $0x800] sm:$0xff]  ;;  %v439_v25 = vcombine.high %v12046_v17, %v12046_v17  ;;  %v743_v27 = vld [vmem:[%s11938_s15 + $0x888] sm:$0xff] }
  0xad   : > { %v734_v16 = vld [vmem:[%s11938_s15 + $0x840] sm:$0xff]  ;;  %v751_v28 = vld [vmem:[%s11938_s15 + $0x8c8] sm:$0xff] }
  0xae   : > { %v766_v34 = vld [vmem:[%s11938_s15 + $0x940] sm:$0xff]  ;;  %v12062_v35 = vpack.c.bf16 %v439_v25, %v439_v25  ;;  %v759_v0 = vld [vmem:[%s11938_s15 + $0x908] sm:$0xff] }
  0xaf   : > { %5863 = vmatpush1.bf16.msra.mxu0 %v9965_v21  ;;  %6027 = vmatpush1.bf16.msra.mxu1 %v9967_v22  ;;  %v10094_v21 = vcombine.high %v726_v15, %v734_v16  ;;  %v10096_v22 = vcombine.high %v727_v60, %v735_v18  ;;  %v767_v36 = vld [vmem:[%s11938_s15 + $0x948] sm:$0xff]  ;;  %v774_v41 = vld [vmem:[%s11938_s15 + $0x980] sm:$0xff] }
  0xb0   : > { %5864 = vmatprep.subr.bf16.mxu0 %v9982_v23  ;;  %6028 = vmatprep.subr.bf16.mxu1 %v9984_v24  ;;  %v742_v23 = vld [vmem:[%s11938_s15 + $0x880] sm:$0xff]  ;;  %v775_v43 = vld [vmem:[%s11938_s15 + $0x988] sm:$0xff] }
  0xb1   : > { %v750_v24 = vld [vmem:[%s11938_s15 + $0x8c0] sm:$0xff]  ;;  %v783_v44 = vld [vmem:[%s11938_s15 + $0x9c8] sm:$0xff] }
  0xb2   : > { %v782_v42 = vld [vmem:[%s11938_s15 + $0x9c0] sm:$0xff]  ;;  %v791_v52 = vld [vmem:[%s11938_s15 + $0xa08] sm:$0xff] }
  0xb3   : > { %5865 = vmatpush1.bf16.msra.mxu0 %v9981_v29  ;;  %6029 = vmatpush1.bf16.msra.mxu1 %v9983_v30  ;;  %v10093_v29 = vcombine.low %v726_v15, %v734_v16  ;;  %v10095_v30 = vcombine.low %v727_v60, %v735_v18  ;;  %v790_v50 = vld [vmem:[%s11938_s15 + $0xa00] sm:$0xff]  ;;  %v799_v53 = vld [vmem:[%s11938_s15 + $0xa48] sm:$0xff] }
  0xb4   : > { %5866 = vmatprep.subr.bf16.mxu0 %v9998_v31  ;;  %6030 = vmatprep.subr.bf16.mxu1 %v10000_v32  ;;  %v10110_v31 = vcombine.high %v742_v23, %v750_v24  ;;  %v10112_v32 = vcombine.high %v743_v27, %v751_v28  ;;  %v798_v51 = vld [vmem:[%s11938_s15 + $0xa40] sm:$0xff]  ;;  %v807_v62 = vld [vmem:[%s11938_s15 + $0xa88] sm:$0xff] }
  0xb5   : > { %v806_v59 = vld [vmem:[%s11938_s15 + $0xa80] sm:$0xff]  ;;  %v815_v63 = vld [vmem:[%s11938_s15 + $0xac8] sm:$0xff] }
  0xb6   : > { %v814_v61 = vld [vmem:[%s11938_s15 + $0xac0] sm:$0xff]  ;;  %v823_v7 = vld [vmem:[%s11938_s15 + $0xb08] sm:$0xff] }
  0xb7   : > { %5867 = vmatpush1.bf16.msra.mxu0 %v9997_v37  ;;  %6031 = vmatpush1.bf16.msra.mxu1 %v9999_v38  ;;  %v10109_v37 = vcombine.low %v742_v23, %v750_v24  ;;  %v10111_v38 = vcombine.low %v743_v27, %v751_v28  ;;  %v822_v5 = vld [vmem:[%s11938_s15 + $0xb00] sm:$0xff]  ;;  %v831_v8 = vld [vmem:[%s11938_s15 + $0xb48] sm:$0xff]  ;;  %v10173_v9 = vcombine.low %v806_v59, %v814_v61 }
  0xb8   : > { %5868 = vmatprep.subr.bf16.mxu0 %v10014_v39  ;;  %6032 = vmatprep.subr.bf16.mxu1 %v10016_v40  ;;  %v10126_v39 = vcombine.high %v758_v33, %v766_v34  ;;  %v10128_v40 = vcombine.high %v759_v0, %v767_v36  ;;  %v830_v6 = vld [vmem:[%s11938_s15 + $0xb40] sm:$0xff]  ;;  %v839_v16 = vld [vmem:[%s11938_s15 + $0xb88] sm:$0xff] }
  0xb9   : > { %v846_v15 = vld [vmem:[%s11938_s15 + $0xbc0] sm:$0xff]  ;;  %v847_v60 = vld [vmem:[%s11938_s15 + $0xbc8] sm:$0xff]  ;;  %v10189_v18 = vcombine.low %v822_v5, %v830_v6 }
  0xba   : > { %v862_v23 = vld [vmem:[%s11938_s15 + $0xc40] sm:$0xff]  ;;  %v855_v24 = vld [vmem:[%s11938_s15 + $0xc08] sm:$0xff]  ;;  %v10207_v28 = vcombine.low %v839_v16, %v847_v60 }
  0xbb   : > { %5869 = vmatpush1.bf16.msra.mxu0 %v10013_v46  ;;  %6033 = vmatpush1.bf16.msra.mxu1 %v10015_v47  ;;  %v10125_v46 = vcombine.low %v758_v33, %v766_v34  ;;  %v10127_v47 = vcombine.low %v759_v0, %v767_v36  ;;  %v863_v25 = vld [vmem:[%s11938_s15 + $0xc48] sm:$0xff] }
  0xbc   : > { %5870 = vmatprep.subr.bf16.mxu0 %v10030_v48  ;;  %6034 = vmatprep.subr.bf16.mxu1 %v10032_v49  ;;  %v10142_v48 = vcombine.high %v774_v41, %v782_v42  ;;  %v10144_v49 = vcombine.high %v775_v43, %v783_v44  ;;  %v871_v33 = vld [vmem:[%s11938_s15 + $0xc88] sm:$0xff]  ;;  %v10223_v36 = vcombine.low %v855_v24, %v863_v25 }
  0xbd   : > { %v879_v34 = vld [vmem:[%s11938_s15 + $0xcc8] sm:$0xff] }
  0xbf   : > { %5871 = vmatpush1.bf16.msra.mxu0 %v10029_v55  ;;  %6035 = vmatpush1.bf16.msra.mxu1 %v10031_v56  ;;  %v10141_v55 = vcombine.low %v774_v41, %v782_v42  ;;  %v10143_v56 = vcombine.low %v775_v43, %v783_v44  ;;  %v887_v41 = vld [vmem:[%s11938_s15 + $0xd08] sm:$0xff]  ;;  %v10239_v44 = vcombine.low %v871_v33, %v879_v34 }
  0xc0   : > { %5872 = vmatprep.subr.bf16.mxu0 %v10046_v57  ;;  %6036 = vmatprep.subr.bf16.mxu1 %v10048_v58  ;;  %v10158_v57 = vcombine.high %v790_v50, %v798_v51  ;;  %v10160_v58 = vcombine.high %v791_v52, %v799_v53  ;;  %v895_v42 = vld [vmem:[%s11938_s15 + $0xd48] sm:$0xff] }
  0xc3   : > { %5873 = vmatpush1.bf16.msra.mxu0 %v10045_v1  ;;  %6037 = vmatpush1.bf16.msra.mxu1 %v10047_v2  ;;  %v10157_v1 = vcombine.low %v790_v50, %v798_v51  ;;  %v10159_v2 = vcombine.low %v791_v52, %v799_v53  ;;  %v903_v50 = vld [vmem:[%s11938_s15 + $0xd88] sm:$0xff]  ;;  %v10255_v53 = vcombine.low %v887_v41, %v895_v42 }
  0xc4   : > { %5874 = vmatprep.subr.bf16.mxu0 %v10062_v3  ;;  %6038 = vmatprep.subr.bf16.mxu1 %v10064_v4  ;;  %v10174_v3 = vcombine.high %v806_v59, %v814_v61  ;;  %v10176_v4 = vcombine.high %v807_v62, %v815_v63  ;;  %v911_v51 = vld [vmem:[%s11938_s15 + $0xdc8] sm:$0xff] }
  0xc5   : > { %v919_v59 = vld [vmem:[%s11938_s15 + $0xe08] sm:$0xff] }
  0xc6   : > { %v927_v61 = vld [vmem:[%s11938_s15 + $0xe48] sm:$0xff] }
  0xc7   : > { %5875 = vmatpush1.bf16.msra.mxu0 %v10061_v11  ;;  %6039 = vmatpush1.bf16.msra.mxu1 %v10063_v12  ;;  %v10175_v11 = vcombine.low %v807_v62, %v815_v63  ;;  %v10190_v12 = vcombine.high %v822_v5, %v830_v6  ;;  %v10271_v63 = vcombine.low %v903_v50, %v911_v51  ;;  %v935_v5 = vld [vmem:[%s11938_s15 + $0xe88] sm:$0xff] }
  0xc8   : > { %5876 = vmatprep.subr.bf16.mxu0 %v10078_v13  ;;  %6040 = vmatprep.subr.bf16.mxu1 %v10080_v14  ;;  %v10192_v13 = vcombine.high %v823_v7, %v831_v8  ;;  %v838_v14 = vld [vmem:[%s11938_s15 + $0xb80] sm:$0xff]  ;;  %v943_v6 = vld [vmem:[%s11938_s15 + $0xec8] sm:$0xff] }
  0xc9   : > { %v10205_v27 = vcombine.low %v838_v14, %v846_v15 }
  0xcb   : > { %5877 = vmatpush1.bf16.msra.mxu0 %v10077_v19  ;;  %6041 = vmatpush1.bf16.msra.mxu1 %v10079_v20  ;;  %v10191_v19 = vcombine.low %v823_v7, %v831_v8  ;;  %v10206_v20 = vcombine.high %v838_v14, %v846_v15  ;;  %v10287_v8 = vcombine.low %v919_v59, %v927_v61  ;;  %v951_v14 = vld [vmem:[%s11938_s15 + $0xf08] sm:$0xff] }
  0xcc   : > { %5887 = vmatprep.subr.bf16.mxu0 %v10094_v21  ;;  %6051 = vmatprep.subr.bf16.mxu1 %v10096_v22  ;;  %v10208_v21 = vcombine.high %v839_v16, %v847_v60  ;;  %v854_v22 = vld [vmem:[%s11938_s15 + $0xc00] sm:$0xff]  ;;  %v959_v15 = vld [vmem:[%s11938_s15 + $0xf48] sm:$0xff]  ;;  %v10303_v60 = vcombine.low %v935_v5, %v943_v6 }
  0xcd   : > { %v10221_v0 = vcombine.low %v854_v22, %v862_v23 }
  0xce   : > { %5879 = vmatmul.mubr.bf16.vlgmr.msra.gmra.mrb[0].mxu0 %v12056_v26  ;;  %6043 = vmatmul.mubr.bf16.vlgmr.msra.gmra.mrb[0].mxu1 %v12056_v26 }
  0xcf   : > { %5888 = vmatpush1.bf16.msra.mxu0 %v10093_v29  ;;  %6052 = vmatpush1.bf16.msra.mxu1 %v10095_v30  ;;  %v10222_v29 = vcombine.high %v854_v22, %v862_v23  ;;  %v10224_v30 = vcombine.high %v855_v24, %v863_v25  ;;  %v967_v22 = vld [vmem:[%s11938_s15 + $0xf88] sm:$0xff] }
  0xd0   : > { %5889 = vmatprep.subr.bf16.mxu0 %v10110_v31  ;;  %6053 = vmatprep.subr.bf16.mxu1 %v10112_v32  ;;  %v870_v31 = vld [vmem:[%s11938_s15 + $0xc80] sm:$0xff]  ;;  %v975_v23 = vld [vmem:[%s11938_s15 + $0xfc8] sm:$0xff] }
  0xd1   : > { %5919 = vmatprep.mubr.bf16.mxu0 %v12062_v35  ;;  %6083 = vmatprep.mubr.bf16.mxu1 %v12062_v35  ;;  %v878_v32 = vld [vmem:[%s11938_s15 + $0xcc0] sm:$0xff]  ;;  %v12123_v24 = vld [vmem:[%s11956_s18 + $0x8] sm:$0x3f] }
  0xd2   : > { %v10237_v43 = vcombine.low %v870_v31, %v878_v32 }
  0xd3   : > { %5890 = vmatpush1.bf16.msra.mxu0 %v10109_v37  ;;  %6054 = vmatpush1.bf16.msra.mxu1 %v10111_v38  ;;  %v10238_v37 = vcombine.high %v870_v31, %v878_v32  ;;  %v10240_v38 = vcombine.high %v871_v33, %v879_v34  ;;  %v990_v31 = vld [vmem:[%s11938_s15 + $0x1040] sm:$0xff]  ;;  %v12129_v32 = vrot.slane %v12123_v24, %v11988_v54  ;;  %v983_v33 = vld [vmem:[%s11938_s15 + $0x1008] sm:$0xff] }
  0xd4   : > { %5891 = vmatprep.subr.bf16.mxu0 %v10126_v39  ;;  %6055 = vmatprep.subr.bf16.mxu1 %v10128_v40  ;;  %v886_v39 = vld [vmem:[%s11938_s15 + $0xd00] sm:$0xff]  ;;  %v991_v34 = vld [vmem:[%s11938_s15 + $0x1048] sm:$0xff] }
  0xd5   : > { %v894_v40 = vld [vmem:[%s11938_s15 + $0xd40] sm:$0xff] }
  0xd6   : > { %v10253_v52 = vcombine.low %v886_v39, %v894_v40 }
  0xd7   : > { %5892 = vmatpush1.bf16.msra.mxu0 %v10125_v46  ;;  %6056 = vmatpush1.bf16.msra.mxu1 %v10127_v47  ;;  %v10254_v46 = vcombine.high %v886_v39, %v894_v40  ;;  %v10256_v47 = vcombine.high %v887_v41, %v895_v42  ;;  %v998_v39 = vld [vmem:[%s11938_s15 + $0x1080] sm:$0xff]  ;;  %v455_v41 = vcombine.high %v12129_v32, %v12129_v32 }
  0xd8   : > { %5893 = vmatprep.subr.bf16.mxu0 %v10142_v48  ;;  %6057 = vmatprep.subr.bf16.mxu1 %v10144_v49  ;;  %v902_v48 = vld [vmem:[%s11938_s15 + $0xd80] sm:$0xff]  ;;  %v12139_v42 = vpack.c.bf16 %v12046_v17, %v12046_v17  ;;  %v1015_v17 = vld [vmem:[%s11938_s15 + $0x1108] sm:$0xff] }
  0xd9   : > { %v910_v49 = vld [vmem:[%s11938_s15 + $0xdc0] sm:$0xff] }
  0xda   : > { %v10269_v62 = vcombine.low %v902_v48, %v910_v49  ;;  %v1006_v40 = vld [vmem:[%s11938_s15 + $0x10c0] sm:$0xff] }
  0xdb   : > { %5894 = vmatpush1.bf16.msra.mxu0 %v10141_v55  ;;  %6058 = vmatpush1.bf16.msra.mxu1 %v10143_v56  ;;  %v10270_v55 = vcombine.high %v902_v48, %v910_v49  ;;  %v10272_v56 = vcombine.high %v903_v50, %v911_v51  ;;  %v10366_v48 = vcombine.high %v998_v39, %v1006_v40  ;;  %v1014_v50 = vld [vmem:[%s11938_s15 + $0x1100] sm:$0xff] }
  0xdc   : > { %5895 = vmatprep.subr.bf16.mxu0 %v10158_v57  ;;  %6059 = vmatprep.subr.bf16.mxu1 %v10160_v58  ;;  %v918_v57 = vld [vmem:[%s11938_s15 + $0xe00] sm:$0xff] }
  0xdd   : > { %v926_v58 = vld [vmem:[%s11938_s15 + $0xe40] sm:$0xff] }
  0xde   : > { %v10285_v7 = vcombine.low %v918_v57, %v926_v58  ;;  %v1022_v51 = vld [vmem:[%s11938_s15 + $0x1140] sm:$0xff] }
  0xdf   : > { %5896 = vmatpush1.bf16.msra.mxu0 %v10157_v1  ;;  %6060 = vmatpush1.bf16.msra.mxu1 %v10159_v2  ;;  %v10286_v1 = vcombine.high %v918_v57, %v926_v58  ;;  %v10288_v2 = vcombine.high %v919_v59, %v927_v61  ;;  %v10382_v57 = vcombine.high %v1014_v50, %v1022_v51  ;;  %v1030_v59 = vld [vmem:[%s11938_s15 + $0x1180] sm:$0xff] }
  0xe0   : > { %5897 = vmatprep.subr.bf16.mxu0 %v10174_v3  ;;  %6061 = vmatprep.subr.bf16.mxu1 %v10176_v4  ;;  %v934_v3 = vld [vmem:[%s11938_s15 + $0xe80] sm:$0xff] }
  0xe1   : > { %v942_v4 = vld [vmem:[%s11938_s15 + $0xec0] sm:$0xff] }
  0xe2   : > { %v10301_v16 = vcombine.low %v934_v3, %v942_v4  ;;  %v1038_v61 = vld [vmem:[%s11938_s15 + $0x11c0] sm:$0xff] }
  0xe3   : > { %5898 = vmatpush1.bf16.msra.mxu0 %v10173_v9  ;;  %6062 = vmatpush1.bf16.msra.mxu1 %v10175_v11  ;;  %v10302_v9 = vcombine.high %v934_v3, %v942_v4  ;;  %v10304_v11 = vcombine.high %v935_v5, %v943_v6  ;;  %v10398_v3 = vcombine.high %v1030_v59, %v1038_v61  ;;  %v1046_v5 = vld [vmem:[%s11938_s15 + $0x1200] sm:$0xff] }
  0xe4   : > { %5899 = vmatprep.subr.bf16.mxu0 %v10190_v12  ;;  %6063 = vmatprep.subr.bf16.mxu1 %v10192_v13  ;;  %v950_v12 = vld [vmem:[%s11938_s15 + $0xf00] sm:$0xff] }
  0xe5   : > { %v958_v13 = vld [vmem:[%s11938_s15 + $0xf40] sm:$0xff] }
  0xe6   : > { %v10317_v25 = vcombine.low %v950_v12, %v958_v13  ;;  %v1054_v6 = vld [vmem:[%s11938_s15 + $0x1240] sm:$0xff] }
  0xe7   : > { %5900 = vmatpush1.bf16.msra.mxu0 %v10189_v18  ;;  %6064 = vmatpush1.bf16.msra.mxu1 %v10191_v19  ;;  %v10318_v18 = vcombine.high %v950_v12, %v958_v13  ;;  %v10320_v19 = vcombine.high %v951_v14, %v959_v15  ;;  %v10414_v12 = vcombine.high %v1046_v5, %v1054_v6 }
  0xe8   : > { %5901 = vmatprep.subr.bf16.mxu0 %v10206_v20  ;;  %6065 = vmatprep.subr.bf16.mxu1 %v10208_v21  ;;  %v966_v20 = vld [vmem:[%s11938_s15 + $0xf80] sm:$0xff] }
  0xe9   : > { %v974_v21 = vld [vmem:[%s11938_s15 + $0xfc0] sm:$0xff] }
  0xeb   : > { %5902 = vmatpush1.bf16.msra.mxu0 %v10205_v27  ;;  %6066 = vmatpush1.bf16.msra.mxu1 %v10207_v28  ;;  %v10319_v27 = vcombine.low %v951_v14, %v959_v15  ;;  %v10334_v28 = vcombine.high %v966_v20, %v974_v21  ;;  %v1062_v14 = vld [vmem:[%s11938_s15 + $0x1280] sm:$0xff] }
  0xec   : > { %5903 = vmatprep.subr.bf16.mxu0 %v10222_v29  ;;  %6067 = vmatprep.subr.bf16.mxu1 %v10224_v30  ;;  %v10336_v29 = vcombine.high %v967_v22, %v975_v23  ;;  %v982_v30 = vld [vmem:[%s11938_s15 + $0x1000] sm:$0xff] }
  0xed   : > { %v1070_v15 = vld [vmem:[%s11938_s15 + $0x12c0] sm:$0xff] }
  0xef   : > { %5904 = vmatpush1.bf16.msra.mxu0 %v10221_v0  ;;  %6068 = vmatpush1.bf16.msra.mxu1 %v10223_v36  ;;  %v10333_v0 = vcombine.low %v966_v20, %v974_v21  ;;  %v10335_v36 = vcombine.low %v967_v22, %v975_v23  ;;  %v10430_v20 = vcombine.high %v1062_v14, %v1070_v15  ;;  %v1078_v22 = vld [vmem:[%s11938_s15 + $0x1300] sm:$0xff] }
  0xf0   : > { %5905 = vmatprep.subr.bf16.mxu0 %v10238_v37  ;;  %6069 = vmatprep.subr.bf16.mxu1 %v10240_v38  ;;  %v10350_v37 = vcombine.high %v982_v30, %v990_v31  ;;  %v10352_v38 = vcombine.high %v983_v33, %v991_v34  ;;  %v1086_v23 = vld [vmem:[%s11938_s15 + $0x1340] sm:$0xff] }
  0xf3   : > { %5906 = vmatpush1.bf16.msra.mxu0 %v10237_v43  ;;  %6070 = vmatpush1.bf16.msra.mxu1 %v10239_v44  ;;  %v999_v43 = vld [vmem:[%s11938_s15 + $0x1088] sm:$0xff] }
  0xf4   : > { %5907 = vmatprep.subr.bf16.mxu0 %v10254_v46  ;;  %6071 = vmatprep.subr.bf16.mxu1 %v10256_v47  ;;  %v1007_v44 = vld [vmem:[%s11938_s15 + $0x10c8] sm:$0xff]  ;;  %v10349_v46 = vcombine.low %v982_v30, %v990_v31  ;;  %v10351_v47 = vcombine.low %v983_v33, %v991_v34  ;;  %v10446_v30 = vcombine.high %v1078_v22, %v1086_v23  ;;  %v1094_v33 = vld [vmem:[%s11938_s15 + $0x1380] sm:$0xff] }
  0xf5   : > { %v10368_v49 = vcombine.high %v999_v43, %v1007_v44  ;;  %v1102_v34 = vld [vmem:[%s11938_s15 + $0x13c0] sm:$0xff] }
  0xf7   : > { %5908 = vmatpush1.bf16.msra.mxu0 %v10253_v52  ;;  %6072 = vmatpush1.bf16.msra.mxu1 %v10255_v53  ;;  %v12145_v52 = vpack.c.bf16 %v455_v41, %v455_v41  ;;  %v1023_v53 = vld [vmem:[%s11938_s15 + $0x1148] sm:$0xff]  ;;  %v1110_v41 = vld [vmem:[%s11938_s15 + $0x1400] sm:$0xff] }
  0xf8   : > { %5909 = vmatprep.subr.bf16.mxu0 %v10270_v55  ;;  %6073 = vmatprep.subr.bf16.mxu1 %v10272_v56  ;;  %v10365_v55 = vcombine.low %v998_v39, %v1006_v40  ;;  %v10367_v56 = vcombine.low %v999_v43, %v1007_v44  ;;  %v10384_v58 = vcombine.high %v1015_v17, %v1023_v53  ;;  %v1118_v43 = vld [vmem:[%s11938_s15 + $0x1440] sm:$0xff]  ;;  %v1111_v44 = vld [vmem:[%s11938_s15 + $0x1408] sm:$0xff] }
  0xf9   : > { %v10462_v39 = vcombine.high %v1094_v33, %v1102_v34 }
  0xfb   : > { %5910 = vmatpush1.bf16.msra.mxu0 %v10269_v62  ;;  %6074 = vmatpush1.bf16.msra.mxu1 %v10271_v63  ;;  %v1031_v62 = vld [vmem:[%s11938_s15 + $0x1188] sm:$0xff] }
  0xfc   : > { %5911 = vmatprep.subr.bf16.mxu0 %v10286_v1  ;;  %6075 = vmatprep.subr.bf16.mxu1 %v10288_v2  ;;  %v1039_v63 = vld [vmem:[%s11938_s15 + $0x11c8] sm:$0xff]  ;;  %v10381_v1 = vcombine.low %v1014_v50, %v1022_v51  ;;  %v10383_v2 = vcombine.low %v1015_v17, %v1023_v53  ;;  %v1126_v51 = vld [vmem:[%s11938_s15 + $0x1480] sm:$0xff] }
  0xfd   : > { %v10400_v4 = vcombine.high %v1031_v62, %v1039_v63  ;;  %v1134_v17 = vld [vmem:[%s11938_s15 + $0x14c0] sm:$0xff]  ;;  %v1127_v53 = vld [vmem:[%s11938_s15 + $0x1488] sm:$0xff] }
  0xff   : > { %5912 = vmatpush1.bf16.msra.mxu0 %v10285_v7  ;;  %6076 = vmatpush1.bf16.msra.mxu1 %v10287_v8  ;;  %v1047_v7 = vld [vmem:[%s11938_s15 + $0x1208] sm:$0xff] }
 0x100   : > { %5913 = vmatprep.subr.bf16.mxu0 %v10302_v9  ;;  %6077 = vmatprep.subr.bf16.mxu1 %v10304_v11  ;;  %v1055_v8 = vld [vmem:[%s11938_s15 + $0x1248] sm:$0xff]  ;;  %v10397_v9 = vcombine.low %v1030_v59, %v1038_v61  ;;  %v10399_v11 = vcombine.low %v1031_v62, %v1039_v63  ;;  %v1142_v61 = vld [vmem:[%s11938_s15 + $0x1500] sm:$0xff] }
 0x101   : > { %v10416_v13 = vcombine.high %v1047_v7, %v1055_v8  ;;  %v1150_v62 = vld [vmem:[%s11938_s15 + $0x1540] sm:$0xff]  ;;  %v1143_v63 = vld [vmem:[%s11938_s15 + $0x1508] sm:$0xff] }
 0x103   : > { %5914 = vmatpush1.bf16.msra.mxu0 %v10301_v16  ;;  %6078 = vmatpush1.bf16.msra.mxu1 %v10303_v60  ;;  %v1063_v16 = vld [vmem:[%s11938_s15 + $0x1288] sm:$0xff] }
 0x104   : > { %5915 = vmatprep.subr.bf16.mxu0 %v10318_v18  ;;  %6079 = vmatprep.subr.bf16.mxu1 %v10320_v19  ;;  %v1071_v60 = vld [vmem:[%s11938_s15 + $0x12c8] sm:$0xff]  ;;  %v10413_v18 = vcombine.low %v1046_v5, %v1054_v6  ;;  %v10415_v19 = vcombine.low %v1047_v7, %v1055_v8  ;;  %v1158_v6 = vld [vmem:[%s11938_s15 + $0x1580] sm:$0xff] }
 0x105   : > { %v10432_v21 = vcombine.high %v1063_v16, %v1071_v60  ;;  %v1166_v7 = vld [vmem:[%s11938_s15 + $0x15c0] sm:$0xff]  ;;  %v1159_v8 = vld [vmem:[%s11938_s15 + $0x1588] sm:$0xff] }
 0x107   : > { %5916 = vmatpush1.bf16.msra.mxu0 %v10317_v25  ;;  %6080 = vmatpush1.bf16.msra.mxu1 %v10319_v27  ;;  %v1079_v25 = vld [vmem:[%s11938_s15 + $0x1308] sm:$0xff] }
 0x108   : > { %5917 = vmatprep.subr.bf16.mxu0 %v10334_v28  ;;  %6081 = vmatprep.subr.bf16.mxu1 %v10336_v29  ;;  %v1087_v27 = vld [vmem:[%s11938_s15 + $0x1348] sm:$0xff]  ;;  %v10429_v28 = vcombine.low %v1062_v14, %v1070_v15  ;;  %v10431_v29 = vcombine.low %v1063_v16, %v1071_v60  ;;  %v1174_v15 = vld [vmem:[%s11938_s15 + $0x1600] sm:$0xff] }
 0x109   : > { %v10448_v31 = vcombine.high %v1079_v25, %v1087_v27  ;;  %v1182_v16 = vld [vmem:[%s11938_s15 + $0x1640] sm:$0xff]  ;;  %v1175_v60 = vld [vmem:[%s11938_s15 + $0x1608] sm:$0xff] }
 0x10b   : > { %5918 = vmatpush1.bf16.msra.mxu0 %v10333_v0  ;;  %6082 = vmatpush1.bf16.msra.mxu1 %v10335_v36  ;;  %v1095_v0 = vld [vmem:[%s11938_s15 + $0x1388] sm:$0xff] }
 0x10c   : > { %5928 = vmatprep.subr.bf16.mxu0 %v10350_v37  ;;  %6092 = vmatprep.subr.bf16.mxu1 %v10352_v38  ;;  %v1103_v36 = vld [vmem:[%s11938_s15 + $0x13c8] sm:$0xff]  ;;  %v10445_v37 = vcombine.low %v1078_v22, %v1086_v23  ;;  %v10447_v38 = vcombine.low %v1079_v25, %v1087_v27  ;;  %v1190_v23 = vld [vmem:[%s11938_s15 + $0x1680] sm:$0xff] }
 0x10d   : > { %v10464_v40 = vcombine.high %v1095_v0, %v1103_v36  ;;  %v1198_v25 = vld [vmem:[%s11938_s15 + $0x16c0] sm:$0xff]  ;;  %v1191_v27 = vld [vmem:[%s11938_s15 + $0x1688] sm:$0xff] }
 0x10e   : > { %5920 = vmatmul.mubr.bf16.vlgmr.msra.gmra.mrb[0].mxu0 %v12139_v42  ;;  %6084 = vmatmul.mubr.bf16.vlgmr.msra.gmra.mrb[0].mxu1 %v12139_v42 }
 0x10f   : > { %5929 = vmatpush1.bf16.msra.mxu0 %v10349_v46  ;;  %6093 = vmatpush1.bf16.msra.mxu1 %v10351_v47  ;;  %v1119_v46 = vld [vmem:[%s11938_s15 + $0x1448] sm:$0xff]  ;;  %v10461_v47 = vcombine.low %v1094_v33, %v1102_v34  ;;  %v1206_v34 = vld [vmem:[%s11938_s15 + $0x1700] sm:$0xff] }
 0x110   : > { %5930 = vmatprep.subr.bf16.mxu0 %v10366_v48  ;;  %6094 = vmatprep.subr.bf16.mxu1 %v10368_v49  ;;  %v10463_v48 = vcombine.low %v1095_v0, %v1103_v36  ;;  %v10478_v49 = vcombine.high %v1110_v41, %v1118_v43  ;;  %v10480_v50 = vcombine.high %v1111_v44, %v1119_v46  ;;  %v1214_v0 = vld [vmem:[%s11938_s15 + $0x1740] sm:$0xff]  ;;  %v1207_v36 = vld [vmem:[%s11938_s15 + $0x1708] sm:$0xff] }
 0x111   : > { %5960 = vmatprep.mubr.bf16.mxu0 %v12145_v52  ;;  %6124 = vmatprep.mubr.bf16.mxu1 %v12145_v52 }
 0x113   : > { %5931 = vmatpush1.bf16.msra.mxu0 %v10365_v55  ;;  %6095 = vmatpush1.bf16.msra.mxu1 %v10367_v56  ;;  %v1135_v55 = vld [vmem:[%s11938_s15 + $0x14c8] sm:$0xff]  ;;  %v10477_v56 = vcombine.low %v1110_v41, %v1118_v43  ;;  %v1222_v43 = vld [vmem:[%s11938_s15 + $0x1780] sm:$0xff] }
 0x114   : > { %5932 = vmatprep.subr.bf16.mxu0 %v10382_v57  ;;  %6096 = vmatprep.subr.bf16.mxu1 %v10384_v58  ;;  %v10479_v57 = vcombine.low %v1111_v44, %v1119_v46  ;;  %v10494_v58 = vcombine.high %v1126_v51, %v1134_v17  ;;  %v10496_v59 = vcombine.high %v1127_v53, %v1135_v55  ;;  %v1230_v44 = vld [vmem:[%s11938_s15 + $0x17c0] sm:$0xff]  ;;  %v1223_v46 = vld [vmem:[%s11938_s15 + $0x1788] sm:$0xff] }
 0x117   : > { %5933 = vmatpush1.bf16.msra.mxu0 %v10381_v1  ;;  %6097 = vmatpush1.bf16.msra.mxu1 %v10383_v2  ;;  %v1151_v1 = vld [vmem:[%s11938_s15 + $0x1548] sm:$0xff]  ;;  %v10493_v2 = vcombine.low %v1126_v51, %v1134_v17  ;;  %v1238_v17 = vld [vmem:[%s11938_s15 + $0x1800] sm:$0xff] }
 0x118   : > { %5934 = vmatprep.subr.bf16.mxu0 %v10398_v3  ;;  %6098 = vmatprep.subr.bf16.mxu1 %v10400_v4  ;;  %v10495_v3 = vcombine.low %v1127_v53, %v1135_v55  ;;  %v10510_v4 = vcombine.high %v1142_v61, %v1150_v62  ;;  %v10512_v5 = vcombine.high %v1143_v63, %v1151_v1  ;;  %v1246_v53 = vld [vmem:[%s11938_s15 + $0x1840] sm:$0xff]  ;;  %v1239_v55 = vld [vmem:[%s11938_s15 + $0x1808] sm:$0xff] }
 0x11b   : > { %5935 = vmatpush1.bf16.msra.mxu0 %v10397_v9  ;;  %6099 = vmatpush1.bf16.msra.mxu1 %v10399_v11  ;;  %v1167_v9 = vld [vmem:[%s11938_s15 + $0x15c8] sm:$0xff]  ;;  %v10509_v11 = vcombine.low %v1142_v61, %v1150_v62  ;;  %v1254_v62 = vld [vmem:[%s11938_s15 + $0x1880] sm:$0xff] }
 0x11c   : > { %5936 = vmatprep.subr.bf16.mxu0 %v10414_v12  ;;  %6100 = vmatprep.subr.bf16.mxu1 %v10416_v13  ;;  %v10511_v12 = vcombine.low %v1143_v63, %v1151_v1  ;;  %v10526_v13 = vcombine.high %v1158_v6, %v1166_v7  ;;  %v10528_v14 = vcombine.high %v1159_v8, %v1167_v9  ;;  %v1262_v63 = vld [vmem:[%s11938_s15 + $0x18c0] sm:$0xff] }
 0x11d   : > { %v12213_v1 = vpack.c.bf16 %v12129_v32, %v12129_v32  ;;  %v1279_v32 = vld [vmem:[%s11938_s15 + $0x1948] sm:$0xff] }
 0x11f   : > { %5937 = vmatpush1.bf16.msra.mxu0 %v10413_v18  ;;  %6101 = vmatpush1.bf16.msra.mxu1 %v10415_v19  ;;  %v1183_v18 = vld [vmem:[%s11938_s15 + $0x1648] sm:$0xff]  ;;  %v10525_v19 = vcombine.low %v1158_v6, %v1166_v7  ;;  %v10622_v6 = vcombine.high %v1254_v62, %v1262_v63 }
 0x120   : > { %5938 = vmatprep.subr.bf16.mxu0 %v10430_v20  ;;  %6102 = vmatprep.subr.bf16.mxu1 %v10432_v21  ;;  %v10527_v20 = vcombine.low %v1159_v8, %v1167_v9  ;;  %v10542_v21 = vcombine.high %v1174_v15, %v1182_v16  ;;  %v10544_v22 = vcombine.high %v1175_v60, %v1183_v18  ;;  %v1270_v8 = vld [vmem:[%s11938_s15 + $0x1900] sm:$0xff] }
 0x121   : > { %v1278_v9 = vld [vmem:[%s11938_s15 + $0x1940] sm:$0xff] }
 0x123   : > { %5939 = vmatpush1.bf16.msra.mxu0 %v10429_v28  ;;  %6103 = vmatpush1.bf16.msra.mxu1 %v10431_v29  ;;  %v1199_v28 = vld [vmem:[%s11938_s15 + $0x16c8] sm:$0xff]  ;;  %v10541_v29 = vcombine.low %v1174_v15, %v1182_v16  ;;  %v1286_v16 = vld [vmem:[%s11938_s15 + $0x1980] sm:$0xff] }
 0x124   : > { %5940 = vmatprep.subr.bf16.mxu0 %v10446_v30  ;;  %6104 = vmatprep.subr.bf16.mxu1 %v10448_v31  ;;  %v10543_v30 = vcombine.low %v1175_v60, %v1183_v18  ;;  %v10558_v31 = vcombine.high %v1190_v23, %v1198_v25  ;;  %v10560_v33 = vcombine.high %v1191_v27, %v1199_v28  ;;  %v1294_v60 = vld [vmem:[%s11938_s15 + $0x19c0] sm:$0xff]  ;;  %v11717_v18 = vmov 0  }
 0x127   : > { %5941 = vmatpush1.bf16.msra.mxu0 %v10445_v37  ;;  %6105 = vmatpush1.bf16.msra.mxu1 %v10447_v38  ;;  %v1215_v37 = vld [vmem:[%s11938_s15 + $0x1748] sm:$0xff]  ;;  %v10557_v38 = vcombine.low %v1190_v23, %v1198_v25  ;;  %v10654_v23 = vcombine.high %v1286_v16, %v1294_v60 }
 0x128   : > { %5942 = vmatprep.subr.bf16.mxu0 %v10462_v39  ;;  %6106 = vmatprep.subr.bf16.mxu1 %v10464_v40  ;;  %v10559_v39 = vcombine.low %v1191_v27, %v1199_v28  ;;  %v10574_v40 = vcombine.high %v1206_v34, %v1214_v0  ;;  %v10576_v41 = vcombine.high %v1207_v36, %v1215_v37  ;;  %v1302_v27 = vld [vmem:[%s11938_s15 + $0x1a00] sm:$0xff] }
 0x129   : > { %v1310_v28 = vld [vmem:[%s11938_s15 + $0x1a40] sm:$0xff] }
 0x12b   : > { %5943 = vmatpush1.bf16.msra.mxu0 %v10461_v47  ;;  %6107 = vmatpush1.bf16.msra.mxu1 %v10463_v48  ;;  %v1231_v47 = vld [vmem:[%s11938_s15 + $0x17c8] sm:$0xff]  ;;  %v10573_v48 = vcombine.low %v1206_v34, %v1214_v0  ;;  %v10670_v34 = vcombine.high %v1302_v27, %v1310_v28 }
 0x12c   : > { %5944 = vmatprep.subr.bf16.mxu0 %v10478_v49  ;;  %6108 = vmatprep.subr.bf16.mxu1 %v10480_v50  ;;  %v10575_v49 = vcombine.low %v1207_v36, %v1215_v37  ;;  %v10590_v50 = vcombine.high %v1222_v43, %v1230_v44  ;;  %v10592_v51 = vcombine.high %v1223_v46, %v1231_v47  ;;  %v1318_v36 = vld [vmem:[%s11938_s15 + $0x1a80] sm:$0xff] }
 0x12d   : > { %v1326_v37 = vld [vmem:[%s11938_s15 + $0x1ac0] sm:$0xff] }
 0x12f   : > { %5945 = vmatpush1.bf16.msra.mxu0 %v10477_v56  ;;  %6109 = vmatpush1.bf16.msra.mxu1 %v10479_v57  ;;  %v1247_v56 = vld [vmem:[%s11938_s15 + $0x1848] sm:$0xff]  ;;  %v10589_v57 = vcombine.low %v1222_v43, %v1230_v44  ;;  %v10686_v43 = vcombine.high %v1318_v36, %v1326_v37 }
 0x130   : > { %5946 = vmatprep.subr.bf16.mxu0 %v10494_v58  ;;  %6110 = vmatprep.subr.bf16.mxu1 %v10496_v59  ;;  %v10591_v58 = vcombine.low %v1223_v46, %v1231_v47  ;;  %v10606_v59 = vcombine.high %v1238_v17, %v1246_v53  ;;  %v10608_v61 = vcombine.high %v1239_v55, %v1247_v56  ;;  %v1334_v46 = vld [vmem:[%s11938_s15 + $0x1b00] sm:$0xff] }
 0x131   : > { %v1342_v47 = vld [vmem:[%s11938_s15 + $0x1b40] sm:$0xff] }
 0x133   : > { %5947 = vmatpush1.bf16.msra.mxu0 %v10493_v2  ;;  %6111 = vmatpush1.bf16.msra.mxu1 %v10495_v3  ;;  %v1255_v2 = vld [vmem:[%s11938_s15 + $0x1888] sm:$0xff] }
 0x134   : > { %5948 = vmatprep.subr.bf16.mxu0 %v10510_v4  ;;  %6112 = vmatprep.subr.bf16.mxu1 %v10512_v5  ;;  %v1263_v3 = vld [vmem:[%s11938_s15 + $0x18c8] sm:$0xff]  ;;  %v10605_v4 = vcombine.low %v1238_v17, %v1246_v53  ;;  %v10607_v5 = vcombine.low %v1239_v55, %v1247_v56  ;;  %v10702_v17 = vcombine.high %v1334_v46, %v1342_v47  ;;  %v1350_v55 = vld [vmem:[%s11938_s15 + $0x1b80] sm:$0xff] }
 0x135   : > { %v10624_v7 = vcombine.high %v1255_v2, %v1263_v3  ;;  %v1358_v56 = vld [vmem:[%s11938_s15 + $0x1bc0] sm:$0xff] }
 0x137   : > { %5949 = vmatpush1.bf16.msra.mxu0 %v10509_v11  ;;  %6113 = vmatpush1.bf16.msra.mxu1 %v10511_v12  ;;  %v1271_v11 = vld [vmem:[%s11938_s15 + $0x1908] sm:$0xff]  ;;  %v10621_v12 = vcombine.low %v1254_v62, %v1262_v63  ;;  %v10718_v63 = vcombine.high %v1350_v55, %v1358_v56 }
 0x138   : > { %5950 = vmatprep.subr.bf16.mxu0 %v10526_v13  ;;  %6114 = vmatprep.subr.bf16.mxu1 %v10528_v14  ;;  %v10623_v13 = vcombine.low %v1255_v2, %v1263_v3  ;;  %v10638_v14 = vcombine.high %v1270_v8, %v1278_v9  ;;  %v10640_v15 = vcombine.high %v1271_v11, %v1279_v32  ;;  %v472_v3 = vld [vmem:[%s11938_s15 + $0x10] sm:$0xff] }
 0x13b   : > { %5951 = vmatpush1.bf16.msra.mxu0 %v10525_v19  ;;  %6115 = vmatpush1.bf16.msra.mxu1 %v10527_v20  ;;  %v1287_v19 = vld [vmem:[%s11938_s15 + $0x1988] sm:$0xff] }
 0x13c   : > { %5952 = vmatprep.subr.bf16.mxu0 %v10542_v21  ;;  %6116 = vmatprep.subr.bf16.mxu1 %v10544_v22  ;;  %v1295_v20 = vld [vmem:[%s11938_s15 + $0x19c8] sm:$0xff]  ;;  %v10637_v21 = vcombine.low %v1270_v8, %v1278_v9  ;;  %v10639_v22 = vcombine.low %v1271_v11, %v1279_v32  ;;  %v488_v32 = vld [vmem:[%s11938_s15 + $0x90] sm:$0xff] }
 0x13d   : > { %v10656_v25 = vcombine.high %v1287_v19, %v1295_v20 }
 0x13f   : > { %5953 = vmatpush1.bf16.msra.mxu0 %v10541_v29  ;;  %6117 = vmatpush1.bf16.msra.mxu1 %v10543_v30  ;;  %v1303_v29 = vld [vmem:[%s11938_s15 + $0x1a08] sm:$0xff] }
 0x140   : > { %5954 = vmatprep.subr.bf16.mxu0 %v10558_v31  ;;  %6118 = vmatprep.subr.bf16.mxu1 %v10560_v33  ;;  %v1311_v30 = vld [vmem:[%s11938_s15 + $0x1a48] sm:$0xff]  ;;  %v10653_v31 = vcombine.low %v1286_v16, %v1294_v60  ;;  %v10655_v33 = vcombine.low %v1287_v19, %v1295_v20 }
 0x141   : > { %v10672_v0 = vcombine.high %v1303_v29, %v1311_v30 }
 0x143   : > { %5955 = vmatpush1.bf16.msra.mxu0 %v10557_v38  ;;  %6119 = vmatpush1.bf16.msra.mxu1 %v10559_v39  ;;  %v1319_v38 = vld [vmem:[%s11938_s15 + $0x1a88] sm:$0xff] }
 0x144   : > { %5956 = vmatprep.subr.bf16.mxu0 %v10574_v40  ;;  %6120 = vmatprep.subr.bf16.mxu1 %v10576_v41  ;;  %v1327_v39 = vld [vmem:[%s11938_s15 + $0x1ac8] sm:$0xff]  ;;  %v10669_v40 = vcombine.low %v1302_v27, %v1310_v28  ;;  %v10671_v41 = vcombine.low %v1303_v29, %v1311_v30 }
 0x145   : > { %v10688_v44 = vcombine.high %v1319_v38, %v1327_v39 }
 0x147   : > { %5957 = vmatpush1.bf16.msra.mxu0 %v10573_v48  ;;  %6121 = vmatpush1.bf16.msra.mxu1 %v10575_v49  ;;  %v1335_v48 = vld [vmem:[%s11938_s15 + $0x1b08] sm:$0xff] }
 0x148   : > { %5958 = vmatprep.subr.bf16.mxu0 %v10590_v50  ;;  %6122 = vmatprep.subr.bf16.mxu1 %v10592_v51  ;;  %v1343_v49 = vld [vmem:[%s11938_s15 + $0x1b48] sm:$0xff]  ;;  %v10685_v50 = vcombine.low %v1318_v36, %v1326_v37  ;;  %v10687_v51 = vcombine.low %v1319_v38, %v1327_v39 }
 0x149   : > { %v10704_v53 = vcombine.high %v1335_v48, %v1343_v49  ;;  %v10703_v62 = vcombine.low %v1335_v48, %v1343_v49 }
 0x14b   : > { %5959 = vmatpush1.bf16.msra.mxu0 %v10589_v57  ;;  %6123 = vmatpush1.bf16.msra.mxu1 %v10591_v58  ;;  %v1351_v57 = vld [vmem:[%s11938_s15 + $0x1b88] sm:$0xff] }
 0x14c   : > { %5969 = vmatprep.subr.bf16.mxu0 %v10606_v59  ;;  %6133 = vmatprep.subr.bf16.mxu1 %v10608_v61  ;;  %v1359_v58 = vld [vmem:[%s11938_s15 + $0x1bc8] sm:$0xff]  ;;  %v440_v59 = vcombine.high %v12123_v24, %v12123_v24  ;;  %v10701_v61 = vcombine.low %v1334_v46, %v1342_v47  ;;  %v10717_v24 = vcombine.low %v1350_v55, %v1358_v56 }
 0x14d   : > { %v10720_v2 = vcombine.high %v1351_v57, %v1359_v58  ;;  %v10719_v8 = vcombine.low %v1351_v57, %v1359_v58 }
 0x14e   : > { %5961 = vmatmul.mubr.bf16.vlgmr.msra.gmra.mrb[0].mxu0 %v12213_v1  ;;  %6125 = vmatmul.mubr.bf16.vlgmr.msra.gmra.mrb[0].mxu1 %v12213_v1 }
 0x14f   : > { %5970 = vmatpush1.bf16.msra.mxu0 %v10605_v4  ;;  %6134 = vmatpush1.bf16.msra.mxu1 %v10607_v5  ;;  %v480_v4 = vld [vmem:[%s11938_s15 + $0x50] sm:$0xff]  ;;  %v454_v5 = vrot.slane %v440_v59, %v11988_v54 }
 0x150   : > { %5971 = vmatprep.subr.bf16.mxu0 %v10622_v6  ;;  %6135 = vmatprep.subr.bf16.mxu1 %v10624_v7  ;;  %v473_v6 = vld [vmem:[%s11938_s15 + $0x18] sm:$0xff]  ;;  %v9842_v9 = vcombine.high %v472_v3, %v480_v4  ;;  %v9841_v16 = vcombine.low %v472_v3, %v480_v4  ;;  %v568_v59 = vld [vmem:[%s11938_s15 + $0x310] sm:$0xff] }
 0x151   : > { %6001 = vmatprep.mubr.bf16.mxu0 %v11717_v18  ;;  %6165 = vmatprep.mubr.bf16.mxu1 %v11717_v18  ;;  %v481_v7 = vld [vmem:[%s11938_s15 + $0x58] sm:$0xff] }
 0x152   : > { %v9844_v11 = vcombine.high %v473_v6, %v481_v7  ;;  %v9843_v60 = vcombine.low %v473_v6, %v481_v7  ;;  %v584_v6 = vld [vmem:[%s11938_s15 + $0x390] sm:$0xff] }
 0x153   : > { %5972 = vmatpush1.bf16.msra.mxu0 %v10621_v12  ;;  %6136 = vmatpush1.bf16.msra.mxu1 %v10623_v13  ;;  %v496_v12 = vld [vmem:[%s11938_s15 + $0xd0] sm:$0xff]  ;;  %v12254_v13 = vpack.c.bf16 %v454_v5, %v454_v5 }
 0x154   : > { %5973 = vmatprep.subr.bf16.mxu0 %v10638_v14  ;;  %6137 = vmatprep.subr.bf16.mxu1 %v10640_v15  ;;  %v489_v14 = vld [vmem:[%s11938_s15 + $0x98] sm:$0xff]  ;;  %v9858_v19 = vcombine.high %v488_v32, %v496_v12  ;;  %v9857_v27 = vcombine.low %v488_v32, %v496_v12  ;;  %v592_v7 = vld [vmem:[%s11938_s15 + $0x3d0] sm:$0xff] }
 0x155   : > { %v497_v15 = vld [vmem:[%s11938_s15 + $0xd8] sm:$0xff]  ;;  %v9954_v32 = vcombine.high %v584_v6, %v592_v7 }
 0x156   : > { %v9860_v20 = vcombine.high %v489_v14, %v497_v15  ;;  %v9859_v28 = vcombine.low %v489_v14, %v497_v15  ;;  %v600_v14 = vld [vmem:[%s11938_s15 + $0x410] sm:$0xff] }
 0x157   : > { %5974 = vmatpush1.bf16.msra.mxu0 %v10637_v21  ;;  %6138 = vmatpush1.bf16.msra.mxu1 %v10639_v22  ;;  %v504_v21 = vld [vmem:[%s11938_s15 + $0x110] sm:$0xff] }
 0x158   : > { %5975 = vmatprep.subr.bf16.mxu0 %v10654_v23  ;;  %6139 = vmatprep.subr.bf16.mxu1 %v10656_v25  ;;  %v512_v22 = vld [vmem:[%s11938_s15 + $0x150] sm:$0xff]  ;;  %v505_v23 = vld [vmem:[%s11938_s15 + $0x118] sm:$0xff] }
 0x159   : > { %v513_v25 = vld [vmem:[%s11938_s15 + $0x158] sm:$0xff]  ;;  %v9874_v29 = vcombine.high %v504_v21, %v512_v22  ;;  %v9873_v36 = vcombine.low %v504_v21, %v512_v22  ;;  %v608_v15 = vld [vmem:[%s11938_s15 + $0x450] sm:$0xff] }
 0x15a   : > { %v9876_v30 = vcombine.high %v505_v23, %v513_v25  ;;  %v9875_v37 = vcombine.low %v505_v23, %v513_v25  ;;  %v9970_v21 = vcombine.high %v600_v14, %v608_v15  ;;  %v616_v23 = vld [vmem:[%s11938_s15 + $0x490] sm:$0xff] }
 0x15b   : > { %5976 = vmatpush1.bf16.msra.mxu0 %v10653_v31  ;;  %6140 = vmatpush1.bf16.msra.mxu1 %v10655_v33  ;;  %v520_v31 = vld [vmem:[%s11938_s15 + $0x190] sm:$0xff] }
 0x15c   : > { %5977 = vmatprep.subr.bf16.mxu0 %v10670_v34  ;;  %6141 = vmatprep.subr.bf16.mxu1 %v10672_v0  ;;  %v528_v33 = vld [vmem:[%s11938_s15 + $0x1d0] sm:$0xff]  ;;  %v521_v34 = vld [vmem:[%s11938_s15 + $0x198] sm:$0xff] }
 0x15d   : > { %v529_v0 = vld [vmem:[%s11938_s15 + $0x1d8] sm:$0xff]  ;;  %v9890_v38 = vcombine.high %v520_v31, %v528_v33  ;;  %v9889_v46 = vcombine.low %v520_v31, %v528_v33  ;;  %v624_v25 = vld [vmem:[%s11938_s15 + $0x4d0] sm:$0xff] }
 0x15e   : > { %v9892_v39 = vcombine.high %v521_v34, %v529_v0  ;;  %v9891_v47 = vcombine.low %v521_v34, %v529_v0  ;;  %v9986_v31 = vcombine.high %v616_v23, %v624_v25  ;;  %v632_v34 = vld [vmem:[%s11938_s15 + $0x510] sm:$0xff] }
 0x15f   : > { %5978 = vmatpush1.bf16.msra.mxu0 %v10669_v40  ;;  %6142 = vmatpush1.bf16.msra.mxu1 %v10671_v41  ;;  %v536_v40 = vld [vmem:[%s11938_s15 + $0x210] sm:$0xff] }
 0x160   : > { %5979 = vmatprep.subr.bf16.mxu0 %v10686_v43  ;;  %6143 = vmatprep.subr.bf16.mxu1 %v10688_v44  ;;  %v544_v41 = vld [vmem:[%s11938_s15 + $0x250] sm:$0xff]  ;;  %v537_v43 = vld [vmem:[%s11938_s15 + $0x218] sm:$0xff] }
 0x161   : > { %v545_v44 = vld [vmem:[%s11938_s15 + $0x258] sm:$0xff]  ;;  %v9906_v48 = vcombine.high %v536_v40, %v544_v41  ;;  %v9905_v55 = vcombine.low %v536_v40, %v544_v41  ;;  %v640_v0 = vld [vmem:[%s11938_s15 + $0x550] sm:$0xff] }
 0x162   : > { %v9908_v49 = vcombine.high %v537_v43, %v545_v44  ;;  %v9907_v56 = vcombine.low %v537_v43, %v545_v44  ;;  %v10002_v40 = vcombine.high %v632_v34, %v640_v0  ;;  %v648_v43 = vld [vmem:[%s11938_s15 + $0x590] sm:$0xff] }
 0x163   : > { %5980 = vmatpush1.bf16.msra.mxu0 %v10685_v50  ;;  %6144 = vmatpush1.bf16.msra.mxu1 %v10687_v51  ;;  %v552_v50 = vld [vmem:[%s11938_s15 + $0x290] sm:$0xff] }
 0x164   : > { %5981 = vmatprep.subr.bf16.mxu0 %v10702_v17  ;;  %6145 = vmatprep.subr.bf16.mxu1 %v10704_v53  ;;  %v560_v51 = vld [vmem:[%s11938_s15 + $0x2d0] sm:$0xff]  ;;  %v553_v17 = vld [vmem:[%s11938_s15 + $0x298] sm:$0xff] }
 0x165   : > { %v561_v53 = vld [vmem:[%s11938_s15 + $0x2d8] sm:$0xff]  ;;  %v9922_v57 = vcombine.high %v552_v50, %v560_v51  ;;  %v656_v44 = vld [vmem:[%s11938_s15 + $0x5d0] sm:$0xff] }
 0x166   : > { %v9924_v58 = vcombine.high %v553_v17, %v561_v53  ;;  %v9923_v3 = vcombine.low %v553_v17, %v561_v53  ;;  %v664_v17 = vld [vmem:[%s11938_s15 + $0x610] sm:$0xff] }
 0x167   : > { %5982 = vmatpush1.bf16.msra.mxu0 %v10701_v61  ;;  %6146 = vmatpush1.bf16.msra.mxu1 %v10703_v62  ;;  %v576_v61 = vld [vmem:[%s11938_s15 + $0x350] sm:$0xff]  ;;  %v569_v62 = vld [vmem:[%s11938_s15 + $0x318] sm:$0xff] }
 0x168   : > { %5983 = vmatprep.subr.bf16.mxu0 %v10718_v63  ;;  %6147 = vmatprep.subr.bf16.mxu1 %v10720_v2  ;;  %v577_v63 = vld [vmem:[%s11938_s15 + $0x358] sm:$0xff]  ;;  %v9921_v2 = vcombine.low %v552_v50, %v560_v51  ;;  %v9938_v4 = vcombine.high %v568_v59, %v576_v61  ;;  %v10018_v50 = vcombine.high %v648_v43, %v656_v44  ;;  %v672_v53 = vld [vmem:[%s11938_s15 + $0x650] sm:$0xff] }
 0x169   : > { %v9940_v5 = vcombine.high %v569_v62, %v577_v63 }
 0x16b   : > { %5984 = vmatpush1.bf16.msra.mxu0 %v10717_v24  ;;  %6148 = vmatpush1.bf16.msra.mxu1 %v10719_v8  ;;  %v585_v24 = vld [vmem:[%s11938_s15 + $0x398] sm:$0xff] }
 0x16c   : > { %6174 = vmatprep.subr.bf16.mxu0 %v9842_v9  ;;  %6338 = vmatprep.subr.bf16.mxu1 %v9844_v11  ;;  %v593_v8 = vld [vmem:[%s11938_s15 + $0x3d8] sm:$0xff]  ;;  %v9937_v9 = vcombine.low %v568_v59, %v576_v61  ;;  %v9939_v11 = vcombine.low %v569_v62, %v577_v63  ;;  %v10034_v59 = vcombine.high %v664_v17, %v672_v53  ;;  %v680_v62 = vld [vmem:[%s11938_s15 + $0x690] sm:$0xff] }
 0x16d   : > { %v9956_v12 = vcombine.high %v585_v24, %v593_v8  ;;  %v688_v63 = vld [vmem:[%s11938_s15 + $0x6d0] sm:$0xff] }
 0x16e   : > { %6002 = vmatmul.mubr.bf16.vlgmr.msra.gmra.mrb[0].mxu0 %v12254_v13  ;;  %6166 = vmatmul.mubr.bf16.vlgmr.msra.gmra.mrb[0].mxu1 %v12254_v13 }
 0x16f   : > { %6175 = vmatpush1.bf16.msra.mxu0 %v9841_v16  ;;  %6339 = vmatpush1.bf16.msra.mxu1 %v9843_v60  ;;  %v601_v16 = vld [vmem:[%s11938_s15 + $0x418] sm:$0xff] }
 0x170   : > { %6176 = vmatprep.subr.bf16.mxu0 %v9858_v19  ;;  %6340 = vmatprep.subr.bf16.mxu1 %v9860_v20  ;;  %v609_v60 = vld [vmem:[%s11938_s15 + $0x458] sm:$0xff]  ;;  %v9953_v19 = vcombine.low %v584_v6, %v592_v7  ;;  %v9955_v20 = vcombine.low %v585_v24, %v593_v8  ;;  %v10050_v6 = vcombine.high %v680_v62, %v688_v63  ;;  %v696_v24 = vld [vmem:[%s11938_s15 + $0x710] sm:$0xff] }
 0x171   : > { %6206 = vmatprep.mubr.bf16.mxu0 %v12007_v10  ;;  %6370 = vmatprep.mubr.bf16.mxu1 %v12007_v10  ;;  %v9972_v22 = vcombine.high %v601_v16, %v609_v60  ;;  %v704_v8 = vld [vmem:[%s11938_s15 + $0x750] sm:$0xff] }
 0x173   : > { %6177 = vmatpush1.bf16.msra.mxu0 %v9857_v27  ;;  %6341 = vmatpush1.bf16.msra.mxu1 %v9859_v28  ;;  %v617_v27 = vld [vmem:[%s11938_s15 + $0x498] sm:$0xff] }
 0x174   : > { %6178 = vmatprep.subr.bf16.mxu0 %v9874_v29  ;;  %6342 = vmatprep.subr.bf16.mxu1 %v9876_v30  ;;  %v625_v28 = vld [vmem:[%s11938_s15 + $0x4d8] sm:$0xff]  ;;  %v9969_v29 = vcombine.low %v600_v14, %v608_v15  ;;  %v9971_v30 = vcombine.low %v601_v16, %v609_v60  ;;  %v10066_v14 = vcombine.high %v696_v24, %v704_v8  ;;  %v712_v16 = vld [vmem:[%s11938_s15 + $0x790] sm:$0xff] }
 0x175   : > { %v9988_v33 = vcombine.high %v617_v27, %v625_v28  ;;  %v720_v60 = vld [vmem:[%s11938_s15 + $0x7d0] sm:$0xff] }
 0x177   : > { %6179 = vmatpush1.bf16.msra.mxu0 %v9873_v36  ;;  %6343 = vmatpush1.bf16.msra.mxu1 %v9875_v37  ;;  %v633_v36 = vld [vmem:[%s11938_s15 + $0x518] sm:$0xff] }
 0x178   : > { %6180 = vmatprep.subr.bf16.mxu0 %v9890_v38  ;;  %6344 = vmatprep.subr.bf16.mxu1 %v9892_v39  ;;  %v641_v37 = vld [vmem:[%s11938_s15 + $0x558] sm:$0xff]  ;;  %v9985_v38 = vcombine.low %v616_v23, %v624_v25  ;;  %v9987_v39 = vcombine.low %v617_v27, %v625_v28  ;;  %v10082_v23 = vcombine.high %v712_v16, %v720_v60  ;;  %v728_v27 = vld [vmem:[%s11938_s15 + $0x810] sm:$0xff] }
 0x179   : > { %v10004_v41 = vcombine.high %v633_v36, %v641_v37  ;;  %v736_v28 = vld [vmem:[%s11938_s15 + $0x850] sm:$0xff] }
 0x17b   : > { %6181 = vmatpush1.bf16.msra.mxu0 %v9889_v46  ;;  %6345 = vmatpush1.bf16.msra.mxu1 %v9891_v47  ;;  %v649_v46 = vld [vmem:[%s11938_s15 + $0x598] sm:$0xff] }
 0x17c   : > { %6182 = vmatprep.subr.bf16.mxu0 %v9906_v48  ;;  %6346 = vmatprep.subr.bf16.mxu1 %v9908_v49  ;;  %v657_v47 = vld [vmem:[%s11938_s15 + $0x5d8] sm:$0xff]  ;;  %v10001_v48 = vcombine.low %v632_v34, %v640_v0  ;;  %v10003_v49 = vcombine.low %v633_v36, %v641_v37  ;;  %v10098_v34 = vcombine.high %v728_v27, %v736_v28  ;;  %v744_v36 = vld [vmem:[%s11938_s15 + $0x890] sm:$0xff] }
 0x17d   : > { %v10020_v51 = vcombine.high %v649_v46, %v657_v47  ;;  %v752_v37 = vld [vmem:[%s11938_s15 + $0x8d0] sm:$0xff] }
 0x17f   : > { %6183 = vmatpush1.bf16.msra.mxu0 %v9905_v55  ;;  %6347 = vmatpush1.bf16.msra.mxu1 %v9907_v56  ;;  %v665_v55 = vld [vmem:[%s11938_s15 + $0x618] sm:$0xff] }
 0x180   : > { %6184 = vmatprep.subr.bf16.mxu0 %v9922_v57  ;;  %6348 = vmatprep.subr.bf16.mxu1 %v9924_v58  ;;  %v673_v56 = vld [vmem:[%s11938_s15 + $0x658] sm:$0xff]  ;;  %v10017_v57 = vcombine.low %v648_v43, %v656_v44  ;;  %v10019_v58 = vcombine.low %v649_v46, %v657_v47  ;;  %v10114_v43 = vcombine.high %v744_v36, %v752_v37  ;;  %v760_v46 = vld [vmem:[%s11938_s15 + $0x910] sm:$0xff] }
 0x181   : > { %v10036_v61 = vcombine.high %v665_v55, %v673_v56  ;;  %v768_v47 = vld [vmem:[%s11938_s15 + $0x950] sm:$0xff] }
 0x183   : > { %6185 = vmatpush1.bf16.msra.mxu0 %v9921_v2  ;;  %6349 = vmatpush1.bf16.msra.mxu1 %v9923_v3  ;;  %v681_v2 = vld [vmem:[%s11938_s15 + $0x698] sm:$0xff] }
 0x184   : > { %6186 = vmatprep.subr.bf16.mxu0 %v9938_v4  ;;  %6350 = vmatprep.subr.bf16.mxu1 %v9940_v5  ;;  %v689_v3 = vld [vmem:[%s11938_s15 + $0x6d8] sm:$0xff]  ;;  %v10033_v4 = vcombine.low %v664_v17, %v672_v53  ;;  %v10035_v5 = vcombine.low %v665_v55, %v673_v56  ;;  %v10130_v17 = vcombine.high %v760_v46, %v768_v47  ;;  %v776_v55 = vld [vmem:[%s11938_s15 + $0x990] sm:$0xff] }
 0x185   : > { %v10052_v7 = vcombine.high %v681_v2, %v689_v3  ;;  %v784_v56 = vld [vmem:[%s11938_s15 + $0x9d0] sm:$0xff] }
 0x187   : > { %6187 = vmatpush1.bf16.msra.mxu0 %v9937_v9  ;;  %6351 = vmatpush1.bf16.msra.mxu1 %v9939_v11  ;;  %v697_v9 = vld [vmem:[%s11938_s15 + $0x718] sm:$0xff] }
 0x188   : > { %6188 = vmatprep.subr.bf16.mxu0 %v9954_v32  ;;  %6352 = vmatprep.subr.bf16.mxu1 %v9956_v12  ;;  %v705_v11 = vld [vmem:[%s11938_s15 + $0x758] sm:$0xff]  ;;  %v10049_v32 = vcombine.low %v680_v62, %v688_v63  ;;  %v10051_v12 = vcombine.low %v681_v2, %v689_v3  ;;  %v10146_v62 = vcombine.high %v776_v55, %v784_v56  ;;  %v792_v2 = vld [vmem:[%s11938_s15 + $0xa10] sm:$0xff] }
 0x189   : > { %v10068_v15 = vcombine.high %v697_v9, %v705_v11  ;;  %v800_v3 = vld [vmem:[%s11938_s15 + $0xa50] sm:$0xff] }
 0x18b   : > { %6189 = vmatpush1.bf16.msra.mxu0 %v9953_v19  ;;  %6353 = vmatpush1.bf16.msra.mxu1 %v9955_v20  ;;  %v713_v19 = vld [vmem:[%s11938_s15 + $0x798] sm:$0xff] }
 0x18c   : > { %6190 = vmatprep.subr.bf16.mxu0 %v9970_v21  ;;  %6354 = vmatprep.subr.bf16.mxu1 %v9972_v22  ;;  %v721_v20 = vld [vmem:[%s11938_s15 + $0x7d8] sm:$0xff]  ;;  %v10065_v21 = vcombine.low %v696_v24, %v704_v8  ;;  %v10067_v22 = vcombine.low %v697_v9, %v705_v11  ;;  %v10162_v24 = vcombine.high %v792_v2, %v800_v3  ;;  %v808_v9 = vld [vmem:[%s11938_s15 + $0xa90] sm:$0xff] }
 0x18d   : > { %v10084_v25 = vcombine.high %v713_v19, %v721_v20  ;;  %v816_v11 = vld [vmem:[%s11938_s15 + $0xad0] sm:$0xff] }
 0x18f   : > { %6191 = vmatpush1.bf16.msra.mxu0 %v9969_v29  ;;  %6355 = vmatpush1.bf16.msra.mxu1 %v9971_v30  ;;  %v729_v29 = vld [vmem:[%s11938_s15 + $0x818] sm:$0xff] }
 0x190   : > { %6192 = vmatprep.subr.bf16.mxu0 %v9986_v31  ;;  %6356 = vmatprep.subr.bf16.mxu1 %v9988_v33  ;;  %v737_v30 = vld [vmem:[%s11938_s15 + $0x858] sm:$0xff]  ;;  %v10081_v31 = vcombine.low %v712_v16, %v720_v60  ;;  %v10083_v33 = vcombine.low %v713_v19, %v721_v20  ;;  %v10178_v16 = vcombine.high %v808_v9, %v816_v11  ;;  %v824_v19 = vld [vmem:[%s11938_s15 + $0xb10] sm:$0xff] }
 0x191   : > { %v10100_v0 = vcombine.high %v729_v29, %v737_v30  ;;  %v832_v20 = vld [vmem:[%s11938_s15 + $0xb50] sm:$0xff] }
 0x193   : > { %6193 = vmatpush1.bf16.msra.mxu0 %v9985_v38  ;;  %6357 = vmatpush1.bf16.msra.mxu1 %v9987_v39  ;;  %v745_v38 = vld [vmem:[%s11938_s15 + $0x898] sm:$0xff] }
 0x194   : > { %6194 = vmatprep.subr.bf16.mxu0 %v10002_v40  ;;  %6358 = vmatprep.subr.bf16.mxu1 %v10004_v41  ;;  %v753_v39 = vld [vmem:[%s11938_s15 + $0x8d8] sm:$0xff]  ;;  %v10097_v40 = vcombine.low %v728_v27, %v736_v28  ;;  %v10099_v41 = vcombine.low %v729_v29, %v737_v30  ;;  %v10194_v27 = vcombine.high %v824_v19, %v832_v20  ;;  %v840_v29 = vld [vmem:[%s11938_s15 + $0xb90] sm:$0xff] }
 0x195   : > { %v10116_v44 = vcombine.high %v745_v38, %v753_v39  ;;  %v848_v30 = vld [vmem:[%s11938_s15 + $0xbd0] sm:$0xff] }
 0x197   : > { %6195 = vmatpush1.bf16.msra.mxu0 %v10001_v48  ;;  %6359 = vmatpush1.bf16.msra.mxu1 %v10003_v49  ;;  %v761_v48 = vld [vmem:[%s11938_s15 + $0x918] sm:$0xff] }
 0x198   : > { %6196 = vmatprep.subr.bf16.mxu0 %v10018_v50  ;;  %6360 = vmatprep.subr.bf16.mxu1 %v10020_v51  ;;  %v769_v49 = vld [vmem:[%s11938_s15 + $0x958] sm:$0xff]  ;;  %v10113_v50 = vcombine.low %v744_v36, %v752_v37  ;;  %v10115_v51 = vcombine.low %v745_v38, %v753_v39  ;;  %v10210_v36 = vcombine.high %v840_v29, %v848_v30  ;;  %v856_v38 = vld [vmem:[%s11938_s15 + $0xc10] sm:$0xff] }
 0x199   : > { %v10132_v53 = vcombine.high %v761_v48, %v769_v49  ;;  %v864_v39 = vld [vmem:[%s11938_s15 + $0xc50] sm:$0xff] }
 0x19b   : > { %6197 = vmatpush1.bf16.msra.mxu0 %v10017_v57  ;;  %6361 = vmatpush1.bf16.msra.mxu1 %v10019_v58  ;;  %v777_v57 = vld [vmem:[%s11938_s15 + $0x998] sm:$0xff] }
 0x19c   : > { %6198 = vmatprep.subr.bf16.mxu0 %v10034_v59  ;;  %6362 = vmatprep.subr.bf16.mxu1 %v10036_v61  ;;  %v785_v58 = vld [vmem:[%s11938_s15 + $0x9d8] sm:$0xff]  ;;  %v10129_v59 = vcombine.low %v760_v46, %v768_v47  ;;  %v10131_v61 = vcombine.low %v761_v48, %v769_v49  ;;  %v10226_v46 = vcombine.high %v856_v38, %v864_v39  ;;  %v872_v48 = vld [vmem:[%s11938_s15 + $0xc90] sm:$0xff] }
 0x19d   : > { %v10148_v63 = vcombine.high %v777_v57, %v785_v58  ;;  %v880_v49 = vld [vmem:[%s11938_s15 + $0xcd0] sm:$0xff] }
 0x19f   : > { %6199 = vmatpush1.bf16.msra.mxu0 %v10033_v4  ;;  %6363 = vmatpush1.bf16.msra.mxu1 %v10035_v5  ;;  %v793_v4 = vld [vmem:[%s11938_s15 + $0xa18] sm:$0xff] }
 0x1a0   : > { %6200 = vmatprep.subr.bf16.mxu0 %v10050_v6  ;;  %6364 = vmatprep.subr.bf16.mxu1 %v10052_v7  ;;  %v801_v5 = vld [vmem:[%s11938_s15 + $0xa58] sm:$0xff]  ;;  %v10145_v6 = vcombine.low %v776_v55, %v784_v56  ;;  %v10147_v7 = vcombine.low %v777_v57, %v785_v58  ;;  %v10242_v55 = vcombine.high %v872_v48, %v880_v49  ;;  %v888_v57 = vld [vmem:[%s11938_s15 + $0xd10] sm:$0xff] }
 0x1a1   : > { %v10164_v8 = vcombine.high %v793_v4, %v801_v5  ;;  %v896_v58 = vld [vmem:[%s11938_s15 + $0xd50] sm:$0xff] }
 0x1a3   : > { %6201 = vmatpush1.bf16.msra.mxu0 %v10049_v32  ;;  %6365 = vmatpush1.bf16.msra.mxu1 %v10051_v12  ;;  %v809_v32 = vld [vmem:[%s11938_s15 + $0xa98] sm:$0xff] }
 0x1a4   : > { %6202 = vmatprep.subr.bf16.mxu0 %v10066_v14  ;;  %6366 = vmatprep.subr.bf16.mxu1 %v10068_v15  ;;  %v817_v12 = vld [vmem:[%s11938_s15 + $0xad8] sm:$0xff]  ;;  %v10161_v14 = vcombine.low %v792_v2, %v800_v3  ;;  %v10163_v15 = vcombine.low %v793_v4, %v801_v5  ;;  %v10258_v2 = vcombine.high %v888_v57, %v896_v58  ;;  %v904_v4 = vld [vmem:[%s11938_s15 + $0xd90] sm:$0xff] }
 0x1a5   : > { %v10180_v60 = vcombine.high %v809_v32, %v817_v12  ;;  %v912_v5 = vld [vmem:[%s11938_s15 + $0xdd0] sm:$0xff] }
 0x1a7   : > { %6203 = vmatpush1.bf16.msra.mxu0 %v10065_v21  ;;  %6367 = vmatpush1.bf16.msra.mxu1 %v10067_v22  ;;  %v825_v21 = vld [vmem:[%s11938_s15 + $0xb18] sm:$0xff] }
 0x1a8   : > { %6204 = vmatprep.subr.bf16.mxu0 %v10082_v23  ;;  %6368 = vmatprep.subr.bf16.mxu1 %v10084_v25  ;;  %v833_v22 = vld [vmem:[%s11938_s15 + $0xb58] sm:$0xff]  ;;  %v10177_v23 = vcombine.low %v808_v9, %v816_v11  ;;  %v10179_v25 = vcombine.low %v809_v32, %v817_v12  ;;  %v10274_v9 = vcombine.high %v904_v4, %v912_v5  ;;  %v920_v32 = vld [vmem:[%s11938_s15 + $0xe10] sm:$0xff] }
 0x1a9   : > { %v10196_v28 = vcombine.high %v825_v21, %v833_v22  ;;  %v928_v12 = vld [vmem:[%s11938_s15 + $0xe50] sm:$0xff] }
 0x1ab   : > { %6205 = vmatpush1.bf16.msra.mxu0 %v10081_v31  ;;  %6369 = vmatpush1.bf16.msra.mxu1 %v10083_v33  ;;  %v841_v31 = vld [vmem:[%s11938_s15 + $0xb98] sm:$0xff] }
 0x1ac   : > { %6215 = vmatprep.subr.bf16.mxu0 %v10098_v34  ;;  %6379 = vmatprep.subr.bf16.mxu1 %v10100_v0  ;;  %v849_v33 = vld [vmem:[%s11938_s15 + $0xbd8] sm:$0xff]  ;;  %v10193_v34 = vcombine.low %v824_v19, %v832_v20  ;;  %v10195_v0 = vcombine.low %v825_v21, %v833_v22  ;;  %v10290_v19 = vcombine.high %v920_v32, %v928_v12  ;;  %v936_v21 = vld [vmem:[%s11938_s15 + $0xe90] sm:$0xff] }
 0x1ad   : > { %v10212_v37 = vcombine.high %v841_v31, %v849_v33  ;;  %v944_v22 = vld [vmem:[%s11938_s15 + $0xed0] sm:$0xff] }
 0x1ae   : > { %6207 = vmatmul.mubr.bf16.vlgmr.msra.gmra.mrb[4].mxu0 %v12056_v26  ;;  %6371 = vmatmul.mubr.bf16.vlgmr.msra.gmra.mrb[4].mxu1 %v12056_v26 }
 0x1af   : > { %6216 = vmatpush1.bf16.msra.mxu0 %v10097_v40  ;;  %6380 = vmatpush1.bf16.msra.mxu1 %v10099_v41  ;;  %v857_v40 = vld [vmem:[%s11938_s15 + $0xc18] sm:$0xff] }
 0x1b0   : > { %6217 = vmatprep.subr.bf16.mxu0 %v10114_v43  ;;  %6381 = vmatprep.subr.bf16.mxu1 %v10116_v44  ;;  %v865_v41 = vld [vmem:[%s11938_s15 + $0xc58] sm:$0xff]  ;;  %v10209_v43 = vcombine.low %v840_v29, %v848_v30  ;;  %v10211_v44 = vcombine.low %v841_v31, %v849_v33  ;;  %v10306_v29 = vcombine.high %v936_v21, %v944_v22  ;;  %v952_v31 = vld [vmem:[%s11938_s15 + $0xf10] sm:$0xff] }
 0x1b1   : > { %6247 = vmatprep.mubr.bf16.mxu0 %v12062_v35  ;;  %6411 = vmatprep.mubr.bf16.mxu1 %v12062_v35  ;;  %v10228_v47 = vcombine.high %v857_v40, %v865_v41  ;;  %v960_v33 = vld [vmem:[%s11938_s15 + $0xf50] sm:$0xff] }
 0x1b3   : > { %6218 = vmatpush1.bf16.msra.mxu0 %v10113_v50  ;;  %6382 = vmatpush1.bf16.msra.mxu1 %v10115_v51  ;;  %v873_v50 = vld [vmem:[%s11938_s15 + $0xc98] sm:$0xff] }
 0x1b4   : > { %6219 = vmatprep.subr.bf16.mxu0 %v10130_v17  ;;  %6383 = vmatprep.subr.bf16.mxu1 %v10132_v53  ;;  %v881_v51 = vld [vmem:[%s11938_s15 + $0xcd8] sm:$0xff]  ;;  %v10225_v17 = vcombine.low %v856_v38, %v864_v39  ;;  %v10227_v53 = vcombine.low %v857_v40, %v865_v41  ;;  %v10322_v38 = vcombine.high %v952_v31, %v960_v33  ;;  %v968_v40 = vld [vmem:[%s11938_s15 + $0xf90] sm:$0xff] }
 0x1b5   : > { %v10244_v56 = vcombine.high %v873_v50, %v881_v51  ;;  %v976_v41 = vld [vmem:[%s11938_s15 + $0xfd0] sm:$0xff] }
 0x1b7   : > { %6220 = vmatpush1.bf16.msra.mxu0 %v10129_v59  ;;  %6384 = vmatpush1.bf16.msra.mxu1 %v10131_v61  ;;  %v889_v59 = vld [vmem:[%s11938_s15 + $0xd18] sm:$0xff] }
 0x1b8   : > { %6221 = vmatprep.subr.bf16.mxu0 %v10146_v62  ;;  %6385 = vmatprep.subr.bf16.mxu1 %v10148_v63  ;;  %v897_v61 = vld [vmem:[%s11938_s15 + $0xd58] sm:$0xff]  ;;  %v10241_v62 = vcombine.low %v872_v48, %v880_v49  ;;  %v10243_v63 = vcombine.low %v873_v50, %v881_v51  ;;  %v10338_v48 = vcombine.high %v968_v40, %v976_v41  ;;  %v984_v50 = vld [vmem:[%s11938_s15 + $0x1010] sm:$0xff] }
 0x1b9   : > { %v10260_v3 = vcombine.high %v889_v59, %v897_v61  ;;  %v992_v51 = vld [vmem:[%s11938_s15 + $0x1050] sm:$0xff] }
 0x1bb   : > { %6222 = vmatpush1.bf16.msra.mxu0 %v10145_v6  ;;  %6386 = vmatpush1.bf16.msra.mxu1 %v10147_v7  ;;  %v905_v6 = vld [vmem:[%s11938_s15 + $0xd98] sm:$0xff] }
 0x1bc   : > { %6223 = vmatprep.subr.bf16.mxu0 %v10162_v24  ;;  %6387 = vmatprep.subr.bf16.mxu1 %v10164_v8  ;;  %v913_v7 = vld [vmem:[%s11938_s15 + $0xdd8] sm:$0xff]  ;;  %v10257_v24 = vcombine.low %v888_v57, %v896_v58  ;;  %v10259_v8 = vcombine.low %v889_v59, %v897_v61  ;;  %v10354_v57 = vcombine.high %v984_v50, %v992_v51  ;;  %v1000_v59 = vld [vmem:[%s11938_s15 + $0x1090] sm:$0xff] }
 0x1bd   : > { %v10276_v11 = vcombine.high %v905_v6, %v913_v7  ;;  %v1008_v61 = vld [vmem:[%s11938_s15 + $0x10d0] sm:$0xff] }
 0x1bf   : > { %6224 = vmatpush1.bf16.msra.mxu0 %v10161_v14  ;;  %6388 = vmatpush1.bf16.msra.mxu1 %v10163_v15  ;;  %v921_v14 = vld [vmem:[%s11938_s15 + $0xe18] sm:$0xff] }
 0x1c0   : > { %6225 = vmatprep.subr.bf16.mxu0 %v10178_v16  ;;  %6389 = vmatprep.subr.bf16.mxu1 %v10180_v60  ;;  %v929_v15 = vld [vmem:[%s11938_s15 + $0xe58] sm:$0xff]  ;;  %v10273_v16 = vcombine.low %v904_v4, %v912_v5  ;;  %v10275_v60 = vcombine.low %v905_v6, %v913_v7  ;;  %v10370_v4 = vcombine.high %v1000_v59, %v1008_v61  ;;  %v1016_v6 = vld [vmem:[%s11938_s15 + $0x1110] sm:$0xff] }
 0x1c1   : > { %v10292_v20 = vcombine.high %v921_v14, %v929_v15  ;;  %v1024_v7 = vld [vmem:[%s11938_s15 + $0x1150] sm:$0xff] }
 0x1c3   : > { %6226 = vmatpush1.bf16.msra.mxu0 %v10177_v23  ;;  %6390 = vmatpush1.bf16.msra.mxu1 %v10179_v25  ;;  %v937_v23 = vld [vmem:[%s11938_s15 + $0xe98] sm:$0xff] }
 0x1c4   : > { %6227 = vmatprep.subr.bf16.mxu0 %v10194_v27  ;;  %6391 = vmatprep.subr.bf16.mxu1 %v10196_v28  ;;  %v945_v25 = vld [vmem:[%s11938_s15 + $0xed8] sm:$0xff]  ;;  %v10289_v27 = vcombine.low %v920_v32, %v928_v12  ;;  %v10291_v28 = vcombine.low %v921_v14, %v929_v15  ;;  %v10386_v32 = vcombine.high %v1016_v6, %v1024_v7  ;;  %v1032_v14 = vld [vmem:[%s11938_s15 + $0x1190] sm:$0xff] }
 0x1c5   : > { %v10308_v30 = vcombine.high %v937_v23, %v945_v25  ;;  %v1040_v15 = vld [vmem:[%s11938_s15 + $0x11d0] sm:$0xff] }
 0x1c7   : > { %6228 = vmatpush1.bf16.msra.mxu0 %v10193_v34  ;;  %6392 = vmatpush1.bf16.msra.mxu1 %v10195_v0  ;;  %v953_v34 = vld [vmem:[%s11938_s15 + $0xf18] sm:$0xff] }
 0x1c8   : > { %6229 = vmatprep.subr.bf16.mxu0 %v10210_v36  ;;  %6393 = vmatprep.subr.bf16.mxu1 %v10212_v37  ;;  %v961_v0 = vld [vmem:[%s11938_s15 + $0xf58] sm:$0xff]  ;;  %v10305_v36 = vcombine.low %v936_v21, %v944_v22  ;;  %v10307_v37 = vcombine.low %v937_v23, %v945_v25  ;;  %v10402_v21 = vcombine.high %v1032_v14, %v1040_v15  ;;  %v1048_v23 = vld [vmem:[%s11938_s15 + $0x1210] sm:$0xff] }
 0x1c9   : > { %v10324_v39 = vcombine.high %v953_v34, %v961_v0  ;;  %v1056_v25 = vld [vmem:[%s11938_s15 + $0x1250] sm:$0xff] }
 0x1cb   : > { %6230 = vmatpush1.bf16.msra.mxu0 %v10209_v43  ;;  %6394 = vmatpush1.bf16.msra.mxu1 %v10211_v44  ;;  %v969_v43 = vld [vmem:[%s11938_s15 + $0xf98] sm:$0xff] }
 0x1cc   : > { %6231 = vmatprep.subr.bf16.mxu0 %v10226_v46  ;;  %6395 = vmatprep.subr.bf16.mxu1 %v10228_v47  ;;  %v977_v44 = vld [vmem:[%s11938_s15 + $0xfd8] sm:$0xff]  ;;  %v10321_v46 = vcombine.low %v952_v31, %v960_v33  ;;  %v10323_v47 = vcombine.low %v953_v34, %v961_v0  ;;  %v10418_v31 = vcombine.high %v1048_v23, %v1056_v25  ;;  %v1064_v34 = vld [vmem:[%s11938_s15 + $0x1290] sm:$0xff] }
 0x1cd   : > { %v10340_v49 = vcombine.high %v969_v43, %v977_v44  ;;  %v1072_v0 = vld [vmem:[%s11938_s15 + $0x12d0] sm:$0xff] }
 0x1cf   : > { %6232 = vmatpush1.bf16.msra.mxu0 %v10225_v17  ;;  %6396 = vmatpush1.bf16.msra.mxu1 %v10227_v53  ;;  %v985_v17 = vld [vmem:[%s11938_s15 + $0x1018] sm:$0xff] }
 0x1d0   : > { %6233 = vmatprep.subr.bf16.mxu0 %v10242_v55  ;;  %6397 = vmatprep.subr.bf16.mxu1 %v10244_v56  ;;  %v993_v53 = vld [vmem:[%s11938_s15 + $0x1058] sm:$0xff]  ;;  %v10337_v55 = vcombine.low %v968_v40, %v976_v41  ;;  %v10339_v56 = vcombine.low %v969_v43, %v977_v44  ;;  %v10434_v40 = vcombine.high %v1064_v34, %v1072_v0  ;;  %v1080_v43 = vld [vmem:[%s11938_s15 + $0x1310] sm:$0xff] }
 0x1d1   : > { %v10356_v58 = vcombine.high %v985_v17, %v993_v53  ;;  %v1088_v44 = vld [vmem:[%s11938_s15 + $0x1350] sm:$0xff] }
 0x1d3   : > { %6234 = vmatpush1.bf16.msra.mxu0 %v10241_v62  ;;  %6398 = vmatpush1.bf16.msra.mxu1 %v10243_v63  ;;  %v1001_v62 = vld [vmem:[%s11938_s15 + $0x1098] sm:$0xff] }
 0x1d4   : > { %6235 = vmatprep.subr.bf16.mxu0 %v10258_v2  ;;  %6399 = vmatprep.subr.bf16.mxu1 %v10260_v3  ;;  %v1009_v63 = vld [vmem:[%s11938_s15 + $0x10d8] sm:$0xff]  ;;  %v10353_v2 = vcombine.low %v984_v50, %v992_v51  ;;  %v10355_v3 = vcombine.low %v985_v17, %v993_v53  ;;  %v10450_v50 = vcombine.high %v1080_v43, %v1088_v44  ;;  %v1096_v17 = vld [vmem:[%s11938_s15 + $0x1390] sm:$0xff] }
 0x1d5   : > { %v10372_v5 = vcombine.high %v1001_v62, %v1009_v63  ;;  %v1104_v53 = vld [vmem:[%s11938_s15 + $0x13d0] sm:$0xff] }
 0x1d7   : > { %6236 = vmatpush1.bf16.msra.mxu0 %v10257_v24  ;;  %6400 = vmatpush1.bf16.msra.mxu1 %v10259_v8  ;;  %v1017_v24 = vld [vmem:[%s11938_s15 + $0x1118] sm:$0xff] }
 0x1d8   : > { %6237 = vmatprep.subr.bf16.mxu0 %v10274_v9  ;;  %6401 = vmatprep.subr.bf16.mxu1 %v10276_v11  ;;  %v1025_v8 = vld [vmem:[%s11938_s15 + $0x1158] sm:$0xff]  ;;  %v10369_v9 = vcombine.low %v1000_v59, %v1008_v61  ;;  %v10371_v11 = vcombine.low %v1001_v62, %v1009_v63  ;;  %v10466_v59 = vcombine.high %v1096_v17, %v1104_v53  ;;  %v1112_v62 = vld [vmem:[%s11938_s15 + $0x1410] sm:$0xff] }
 0x1d9   : > { %v10388_v12 = vcombine.high %v1017_v24, %v1025_v8  ;;  %v1120_v63 = vld [vmem:[%s11938_s15 + $0x1450] sm:$0xff] }
 0x1db   : > { %6238 = vmatpush1.bf16.msra.mxu0 %v10273_v16  ;;  %6402 = vmatpush1.bf16.msra.mxu1 %v10275_v60  ;;  %v1033_v16 = vld [vmem:[%s11938_s15 + $0x1198] sm:$0xff] }
 0x1dc   : > { %6239 = vmatprep.subr.bf16.mxu0 %v10290_v19  ;;  %6403 = vmatprep.subr.bf16.mxu1 %v10292_v20  ;;  %v1041_v60 = vld [vmem:[%s11938_s15 + $0x11d8] sm:$0xff]  ;;  %v10385_v19 = vcombine.low %v1016_v6, %v1024_v7  ;;  %v10387_v20 = vcombine.low %v1017_v24, %v1025_v8  ;;  %v10482_v6 = vcombine.high %v1112_v62, %v1120_v63  ;;  %v1128_v24 = vld [vmem:[%s11938_s15 + $0x1490] sm:$0xff] }
 0x1dd   : > { %v10404_v22 = vcombine.high %v1033_v16, %v1041_v60  ;;  %v1136_v8 = vld [vmem:[%s11938_s15 + $0x14d0] sm:$0xff] }
 0x1df   : > { %6240 = vmatpush1.bf16.msra.mxu0 %v10289_v27  ;;  %6404 = vmatpush1.bf16.msra.mxu1 %v10291_v28  ;;  %v1049_v27 = vld [vmem:[%s11938_s15 + $0x1218] sm:$0xff] }
 0x1e0   : > { %6241 = vmatprep.subr.bf16.mxu0 %v10306_v29  ;;  %6405 = vmatprep.subr.bf16.mxu1 %v10308_v30  ;;  %v1057_v28 = vld [vmem:[%s11938_s15 + $0x1258] sm:$0xff]  ;;  %v10401_v29 = vcombine.low %v1032_v14, %v1040_v15  ;;  %v10403_v30 = vcombine.low %v1033_v16, %v1041_v60  ;;  %v10498_v14 = vcombine.high %v1128_v24, %v1136_v8  ;;  %v1144_v16 = vld [vmem:[%s11938_s15 + $0x1510] sm:$0xff] }
 0x1e1   : > { %v10420_v33 = vcombine.high %v1049_v27, %v1057_v28  ;;  %v1152_v60 = vld [vmem:[%s11938_s15 + $0x1550] sm:$0xff] }
 0x1e3   : > { %6242 = vmatpush1.bf16.msra.mxu0 %v10305_v36  ;;  %6406 = vmatpush1.bf16.msra.mxu1 %v10307_v37  ;;  %v1065_v36 = vld [vmem:[%s11938_s15 + $0x1298] sm:$0xff] }
 0x1e4   : > { %6243 = vmatprep.subr.bf16.mxu0 %v10322_v38  ;;  %6407 = vmatprep.subr.bf16.mxu1 %v10324_v39  ;;  %v1073_v37 = vld [vmem:[%s11938_s15 + $0x12d8] sm:$0xff]  ;;  %v10417_v38 = vcombine.low %v1048_v23, %v1056_v25  ;;  %v10419_v39 = vcombine.low %v1049_v27, %v1057_v28  ;;  %v10514_v23 = vcombine.high %v1144_v16, %v1152_v60  ;;  %v1160_v27 = vld [vmem:[%s11938_s15 + $0x1590] sm:$0xff] }
 0x1e5   : > { %v10436_v41 = vcombine.high %v1065_v36, %v1073_v37  ;;  %v1168_v28 = vld [vmem:[%s11938_s15 + $0x15d0] sm:$0xff] }
 0x1e7   : > { %6244 = vmatpush1.bf16.msra.mxu0 %v10321_v46  ;;  %6408 = vmatpush1.bf16.msra.mxu1 %v10323_v47  ;;  %v1081_v46 = vld [vmem:[%s11938_s15 + $0x1318] sm:$0xff] }
 0x1e8   : > { %6245 = vmatprep.subr.bf16.mxu0 %v10338_v48  ;;  %6409 = vmatprep.subr.bf16.mxu1 %v10340_v49  ;;  %v1089_v47 = vld [vmem:[%s11938_s15 + $0x1358] sm:$0xff]  ;;  %v10433_v48 = vcombine.low %v1064_v34, %v1072_v0  ;;  %v10435_v49 = vcombine.low %v1065_v36, %v1073_v37  ;;  %v10530_v34 = vcombine.high %v1160_v27, %v1168_v28  ;;  %v1176_v36 = vld [vmem:[%s11938_s15 + $0x1610] sm:$0xff] }
 0x1e9   : > { %v10452_v51 = vcombine.high %v1081_v46, %v1089_v47  ;;  %v1184_v37 = vld [vmem:[%s11938_s15 + $0x1650] sm:$0xff] }
 0x1eb   : > { %6246 = vmatpush1.bf16.msra.mxu0 %v10337_v55  ;;  %6410 = vmatpush1.bf16.msra.mxu1 %v10339_v56  ;;  %v1097_v55 = vld [vmem:[%s11938_s15 + $0x1398] sm:$0xff] }
 0x1ec   : > { %6256 = vmatprep.subr.bf16.mxu0 %v10354_v57  ;;  %6420 = vmatprep.subr.bf16.mxu1 %v10356_v58  ;;  %v1105_v56 = vld [vmem:[%s11938_s15 + $0x13d8] sm:$0xff]  ;;  %v10449_v57 = vcombine.low %v1080_v43, %v1088_v44  ;;  %v10451_v58 = vcombine.low %v1081_v46, %v1089_v47  ;;  %v10546_v43 = vcombine.high %v1176_v36, %v1184_v37  ;;  %v1192_v46 = vld [vmem:[%s11938_s15 + $0x1690] sm:$0xff] }
 0x1ed   : > { %v10468_v61 = vcombine.high %v1097_v55, %v1105_v56  ;;  %v1200_v47 = vld [vmem:[%s11938_s15 + $0x16d0] sm:$0xff] }
 0x1ee   : > { %6248 = vmatmul.mubr.bf16.vlgmr.msra.gmra.mrb[4].mxu0 %v12139_v42  ;;  %6412 = vmatmul.mubr.bf16.vlgmr.msra.gmra.mrb[4].mxu1 %v12139_v42 }
 0x1ef   : > { %6257 = vmatpush1.bf16.msra.mxu0 %v10353_v2  ;;  %6421 = vmatpush1.bf16.msra.mxu1 %v10355_v3  ;;  %v1113_v2 = vld [vmem:[%s11938_s15 + $0x1418] sm:$0xff] }
 0x1f0   : > { %6258 = vmatprep.subr.bf16.mxu0 %v10370_v4  ;;  %6422 = vmatprep.subr.bf16.mxu1 %v10372_v5  ;;  %v1121_v3 = vld [vmem:[%s11938_s15 + $0x1458] sm:$0xff]  ;;  %v10465_v4 = vcombine.low %v1096_v17, %v1104_v53  ;;  %v10467_v5 = vcombine.low %v1097_v55, %v1105_v56  ;;  %v10562_v17 = vcombine.high %v1192_v46, %v1200_v47  ;;  %v1208_v55 = vld [vmem:[%s11938_s15 + $0x1710] sm:$0xff] }
 0x1f1   : > { %6288 = vmatprep.mubr.bf16.mxu0 %v12145_v52  ;;  %6452 = vmatprep.mubr.bf16.mxu1 %v12145_v52  ;;  %v10484_v7 = vcombine.high %v1113_v2, %v1121_v3  ;;  %v1216_v56 = vld [vmem:[%s11938_s15 + $0x1750] sm:$0xff] }
 0x1f3   : > { %6259 = vmatpush1.bf16.msra.mxu0 %v10369_v9  ;;  %6423 = vmatpush1.bf16.msra.mxu1 %v10371_v11  ;;  %v1129_v9 = vld [vmem:[%s11938_s15 + $0x1498] sm:$0xff] }
 0x1f4   : > { %6260 = vmatprep.subr.bf16.mxu0 %v10386_v32  ;;  %6424 = vmatprep.subr.bf16.mxu1 %v10388_v12  ;;  %v1137_v11 = vld [vmem:[%s11938_s15 + $0x14d8] sm:$0xff]  ;;  %v10481_v32 = vcombine.low %v1112_v62, %v1120_v63  ;;  %v10483_v12 = vcombine.low %v1113_v2, %v1121_v3  ;;  %v10578_v62 = vcombine.high %v1208_v55, %v1216_v56  ;;  %v1224_v2 = vld [vmem:[%s11938_s15 + $0x1790] sm:$0xff] }
 0x1f5   : > { %v10500_v15 = vcombine.high %v1129_v9, %v1137_v11  ;;  %v1232_v3 = vld [vmem:[%s11938_s15 + $0x17d0] sm:$0xff] }
 0x1f7   : > { %6261 = vmatpush1.bf16.msra.mxu0 %v10385_v19  ;;  %6425 = vmatpush1.bf16.msra.mxu1 %v10387_v20  ;;  %v1145_v19 = vld [vmem:[%s11938_s15 + $0x1518] sm:$0xff] }
 0x1f8   : > { %6262 = vmatprep.subr.bf16.mxu0 %v10402_v21  ;;  %6426 = vmatprep.subr.bf16.mxu1 %v10404_v22  ;;  %v1153_v20 = vld [vmem:[%s11938_s15 + $0x1558] sm:$0xff]  ;;  %v10497_v21 = vcombine.low %v1128_v24, %v1136_v8  ;;  %v10499_v22 = vcombine.low %v1129_v9, %v1137_v11  ;;  %v10594_v24 = vcombine.high %v1224_v2, %v1232_v3  ;;  %v1240_v9 = vld [vmem:[%s11938_s15 + $0x1810] sm:$0xff] }
 0x1f9   : > { %v10516_v25 = vcombine.high %v1145_v19, %v1153_v20  ;;  %v1248_v11 = vld [vmem:[%s11938_s15 + $0x1850] sm:$0xff] }
 0x1fb   : > { %6263 = vmatpush1.bf16.msra.mxu0 %v10401_v29  ;;  %6427 = vmatpush1.bf16.msra.mxu1 %v10403_v30  ;;  %v1161_v29 = vld [vmem:[%s11938_s15 + $0x1598] sm:$0xff] }
 0x1fc   : > { %6264 = vmatprep.subr.bf16.mxu0 %v10418_v31  ;;  %6428 = vmatprep.subr.bf16.mxu1 %v10420_v33  ;;  %v1169_v30 = vld [vmem:[%s11938_s15 + $0x15d8] sm:$0xff]  ;;  %v10513_v31 = vcombine.low %v1144_v16, %v1152_v60  ;;  %v10515_v33 = vcombine.low %v1145_v19, %v1153_v20  ;;  %v10610_v16 = vcombine.high %v1240_v9, %v1248_v11  ;;  %v1256_v19 = vld [vmem:[%s11938_s15 + $0x1890] sm:$0xff] }
 0x1fd   : > { %v10532_v0 = vcombine.high %v1161_v29, %v1169_v30  ;;  %v1264_v20 = vld [vmem:[%s11938_s15 + $0x18d0] sm:$0xff] }
 0x1ff   : > { %6265 = vmatpush1.bf16.msra.mxu0 %v10417_v38  ;;  %6429 = vmatpush1.bf16.msra.mxu1 %v10419_v39  ;;  %v1177_v38 = vld [vmem:[%s11938_s15 + $0x1618] sm:$0xff] }
 0x200   : > { %6266 = vmatprep.subr.bf16.mxu0 %v10434_v40  ;;  %6430 = vmatprep.subr.bf16.mxu1 %v10436_v41  ;;  %v1185_v39 = vld [vmem:[%s11938_s15 + $0x1658] sm:$0xff]  ;;  %v10529_v40 = vcombine.low %v1160_v27, %v1168_v28  ;;  %v10531_v41 = vcombine.low %v1161_v29, %v1169_v30  ;;  %v10626_v27 = vcombine.high %v1256_v19, %v1264_v20  ;;  %v1272_v29 = vld [vmem:[%s11938_s15 + $0x1910] sm:$0xff] }
 0x201   : > { %v10548_v44 = vcombine.high %v1177_v38, %v1185_v39  ;;  %v1280_v30 = vld [vmem:[%s11938_s15 + $0x1950] sm:$0xff] }
 0x203   : > { %6267 = vmatpush1.bf16.msra.mxu0 %v10433_v48  ;;  %6431 = vmatpush1.bf16.msra.mxu1 %v10435_v49  ;;  %v1193_v48 = vld [vmem:[%s11938_s15 + $0x1698] sm:$0xff] }
 0x204   : > { %6268 = vmatprep.subr.bf16.mxu0 %v10450_v50  ;;  %6432 = vmatprep.subr.bf16.mxu1 %v10452_v51  ;;  %v1201_v49 = vld [vmem:[%s11938_s15 + $0x16d8] sm:$0xff]  ;;  %v10545_v50 = vcombine.low %v1176_v36, %v1184_v37  ;;  %v10547_v51 = vcombine.low %v1177_v38, %v1185_v39  ;;  %v10642_v36 = vcombine.high %v1272_v29, %v1280_v30  ;;  %v1288_v38 = vld [vmem:[%s11938_s15 + $0x1990] sm:$0xff] }
 0x205   : > { %v10564_v53 = vcombine.high %v1193_v48, %v1201_v49  ;;  %v1296_v39 = vld [vmem:[%s11938_s15 + $0x19d0] sm:$0xff] }
 0x207   : > { %6269 = vmatpush1.bf16.msra.mxu0 %v10449_v57  ;;  %6433 = vmatpush1.bf16.msra.mxu1 %v10451_v58  ;;  %v1209_v57 = vld [vmem:[%s11938_s15 + $0x1718] sm:$0xff] }
 0x208   : > { %6270 = vmatprep.subr.bf16.mxu0 %v10466_v59  ;;  %6434 = vmatprep.subr.bf16.mxu1 %v10468_v61  ;;  %v1217_v58 = vld [vmem:[%s11938_s15 + $0x1758] sm:$0xff]  ;;  %v10561_v59 = vcombine.low %v1192_v46, %v1200_v47  ;;  %v10563_v61 = vcombine.low %v1193_v48, %v1201_v49  ;;  %v10658_v46 = vcombine.high %v1288_v38, %v1296_v39  ;;  %v1304_v48 = vld [vmem:[%s11938_s15 + $0x1a10] sm:$0xff] }
 0x209   : > { %v10580_v63 = vcombine.high %v1209_v57, %v1217_v58  ;;  %v1312_v49 = vld [vmem:[%s11938_s15 + $0x1a50] sm:$0xff] }
 0x20b   : > { %6271 = vmatpush1.bf16.msra.mxu0 %v10465_v4  ;;  %6435 = vmatpush1.bf16.msra.mxu1 %v10467_v5  ;;  %v1225_v4 = vld [vmem:[%s11938_s15 + $0x1798] sm:$0xff] }
 0x20c   : > { %6272 = vmatprep.subr.bf16.mxu0 %v10482_v6  ;;  %6436 = vmatprep.subr.bf16.mxu1 %v10484_v7  ;;  %v1233_v5 = vld [vmem:[%s11938_s15 + $0x17d8] sm:$0xff]  ;;  %v10577_v6 = vcombine.low %v1208_v55, %v1216_v56  ;;  %v10579_v7 = vcombine.low %v1209_v57, %v1217_v58  ;;  %v10674_v55 = vcombine.high %v1304_v48, %v1312_v49  ;;  %v1320_v57 = vld [vmem:[%s11938_s15 + $0x1a90] sm:$0xff] }
 0x20d   : > { %v10596_v8 = vcombine.high %v1225_v4, %v1233_v5  ;;  %v1328_v58 = vld [vmem:[%s11938_s15 + $0x1ad0] sm:$0xff] }
 0x20f   : > { %6273 = vmatpush1.bf16.msra.mxu0 %v10481_v32  ;;  %6437 = vmatpush1.bf16.msra.mxu1 %v10483_v12  ;;  %v1241_v32 = vld [vmem:[%s11938_s15 + $0x1818] sm:$0xff] }
 0x210   : > { %6274 = vmatprep.subr.bf16.mxu0 %v10498_v14  ;;  %6438 = vmatprep.subr.bf16.mxu1 %v10500_v15  ;;  %v1249_v12 = vld [vmem:[%s11938_s15 + $0x1858] sm:$0xff]  ;;  %v10593_v14 = vcombine.low %v1224_v2, %v1232_v3  ;;  %v10595_v15 = vcombine.low %v1225_v4, %v1233_v5  ;;  %v10690_v2 = vcombine.high %v1320_v57, %v1328_v58  ;;  %v1336_v4 = vld [vmem:[%s11938_s15 + $0x1b10] sm:$0xff] }
 0x211   : > { %v10612_v60 = vcombine.high %v1241_v32, %v1249_v12  ;;  %v1344_v5 = vld [vmem:[%s11938_s15 + $0x1b50] sm:$0xff] }
 0x213   : > { %6275 = vmatpush1.bf16.msra.mxu0 %v10497_v21  ;;  %6439 = vmatpush1.bf16.msra.mxu1 %v10499_v22  ;;  %v1257_v21 = vld [vmem:[%s11938_s15 + $0x1898] sm:$0xff] }
 0x214   : > { %6276 = vmatprep.subr.bf16.mxu0 %v10514_v23  ;;  %6440 = vmatprep.subr.bf16.mxu1 %v10516_v25  ;;  %v1265_v22 = vld [vmem:[%s11938_s15 + $0x18d8] sm:$0xff]  ;;  %v10609_v23 = vcombine.low %v1240_v9, %v1248_v11  ;;  %v10611_v25 = vcombine.low %v1241_v32, %v1249_v12  ;;  %v10706_v9 = vcombine.high %v1336_v4, %v1344_v5  ;;  %v1352_v12 = vld [vmem:[%s11938_s15 + $0x1b90] sm:$0xff] }
 0x215   : > { %v10628_v28 = vcombine.high %v1257_v21, %v1265_v22 }
 0x217   : > { %6277 = vmatpush1.bf16.msra.mxu0 %v10513_v31  ;;  %6441 = vmatpush1.bf16.msra.mxu1 %v10515_v33  ;;  %v1273_v31 = vld [vmem:[%s11938_s15 + $0x1918] sm:$0xff] }
 0x218   : > { %6278 = vmatprep.subr.bf16.mxu0 %v10530_v34  ;;  %6442 = vmatprep.subr.bf16.mxu1 %v10532_v0  ;;  %v1281_v33 = vld [vmem:[%s11938_s15 + $0x1958] sm:$0xff]  ;;  %v10625_v34 = vcombine.low %v1256_v19, %v1264_v20  ;;  %v10627_v0 = vcombine.low %v1257_v21, %v1265_v22 }
 0x219   : > { %v10644_v37 = vcombine.high %v1273_v31, %v1281_v33  ;;  %v1361_v19 = vld [vmem:[%s11938_s15 + $0x1bd8] sm:$0xff] }
 0x21b   : > { %6279 = vmatpush1.bf16.msra.mxu0 %v10529_v40  ;;  %6443 = vmatpush1.bf16.msra.mxu1 %v10531_v41  ;;  %v1289_v40 = vld [vmem:[%s11938_s15 + $0x1998] sm:$0xff] }
 0x21c   : > { %6280 = vmatprep.subr.bf16.mxu0 %v10546_v43  ;;  %6444 = vmatprep.subr.bf16.mxu1 %v10548_v44  ;;  %v1297_v41 = vld [vmem:[%s11938_s15 + $0x19d8] sm:$0xff]  ;;  %v10641_v43 = vcombine.low %v1272_v29, %v1280_v30  ;;  %v10643_v44 = vcombine.low %v1273_v31, %v1281_v33 }
 0x21d   : > { %v10660_v47 = vcombine.high %v1289_v40, %v1297_v41 }
 0x21f   : > { %6281 = vmatpush1.bf16.msra.mxu0 %v10545_v50  ;;  %6445 = vmatpush1.bf16.msra.mxu1 %v10547_v51  ;;  %v1305_v50 = vld [vmem:[%s11938_s15 + $0x1a18] sm:$0xff] }
 0x220   : > { %6282 = vmatprep.subr.bf16.mxu0 %v10562_v17  ;;  %6446 = vmatprep.subr.bf16.mxu1 %v10564_v53  ;;  %v1313_v51 = vld [vmem:[%s11938_s15 + $0x1a58] sm:$0xff]  ;;  %v10657_v17 = vcombine.low %v1288_v38, %v1296_v39  ;;  %v10659_v53 = vcombine.low %v1289_v40, %v1297_v41  ;;  %v475_v38 = vld [vmem:[%s11938_s15 + $0x28] sm:$0xff]  ;;  %v415_v40 = vld [vmem:[#allocation2] sm:$0xff] }
 0x221   : > { %v10676_v56 = vcombine.high %v1305_v50, %v1313_v51  ;;  %v483_v39 = vld [vmem:[%s11938_s15 + $0x68] sm:$0xff] }
 0x223   : > { %6283 = vmatpush1.bf16.msra.mxu0 %v10561_v59  ;;  %6447 = vmatpush1.bf16.msra.mxu1 %v10563_v61  ;;  %v1321_v59 = vld [vmem:[%s11938_s15 + $0x1a98] sm:$0xff] }
 0x224   : > { %6284 = vmatprep.subr.bf16.mxu0 %v10578_v62  ;;  %6448 = vmatprep.subr.bf16.mxu1 %v10580_v63  ;;  %v1329_v61 = vld [vmem:[%s11938_s15 + $0x1ad8] sm:$0xff]  ;;  %v10673_v62 = vcombine.low %v1304_v48, %v1312_v49  ;;  %v10675_v63 = vcombine.low %v1305_v50, %v1313_v51  ;;  %v490_v48 = vld [vmem:[%s11938_s15 + $0xa0] sm:$0xff]  ;;  %v491_v51 = vld [vmem:[%s11938_s15 + $0xa8] sm:$0xff] }
 0x225   : > { %v10692_v3 = vcombine.high %v1321_v59, %v1329_v61  ;;  %v498_v49 = vld [vmem:[%s11938_s15 + $0xe0] sm:$0xff] }
 0x227   : > { %6285 = vmatpush1.bf16.msra.mxu0 %v10577_v6  ;;  %6449 = vmatpush1.bf16.msra.mxu1 %v10579_v7  ;;  %v1337_v6 = vld [vmem:[%s11938_s15 + $0x1b18] sm:$0xff] }
 0x228   : > { %6286 = vmatprep.subr.bf16.mxu0 %v10594_v24  ;;  %6450 = vmatprep.subr.bf16.mxu1 %v10596_v8  ;;  %v1345_v7 = vld [vmem:[%s11938_s15 + $0x1b58] sm:$0xff]  ;;  %v10689_v24 = vcombine.low %v1320_v57, %v1328_v58  ;;  %v10691_v8 = vcombine.low %v1321_v59, %v1329_v61  ;;  %v506_v58 = vld [vmem:[%s11938_s15 + $0x120] sm:$0xff]  ;;  %v507_v61 = vld [vmem:[%s11938_s15 + $0x128] sm:$0xff] }
 0x229   : > { %v10708_v32 = vcombine.high %v1337_v6, %v1345_v7  ;;  %v10707_v29 = vcombine.low %v1337_v6, %v1345_v7  ;;  %v514_v59 = vld [vmem:[%s11938_s15 + $0x160] sm:$0xff]  ;;  %v523_v7 = vld [vmem:[%s11938_s15 + $0x1a8] sm:$0xff] }
 0x22a   : > { %v530_v6 = vld [vmem:[%s11938_s15 + $0x1e0] sm:$0xff] }
 0x22b   : > { %6287 = vmatpush1.bf16.msra.mxu0 %v10593_v14  ;;  %6451 = vmatpush1.bf16.msra.mxu1 %v10595_v15  ;;  %v1360_v14 = vld [vmem:[%s11938_s15 + $0x1bd0] sm:$0xff] }
 0x22c   : > { %6297 = vmatprep.subr.bf16.mxu0 %v10610_v16  ;;  %6461 = vmatprep.subr.bf16.mxu1 %v10612_v60  ;;  %v1353_v60 = vld [vmem:[%s11938_s15 + $0x1b98] sm:$0xff]  ;;  %v10722_v30 = vcombine.high %v1352_v12, %v1360_v14  ;;  %v10721_v41 = vcombine.low %v1352_v12, %v1360_v14  ;;  %v538_v12 = vld [vmem:[%s11938_s15 + $0x220] sm:$0xff] }
 0x22d   : > { %v546_v14 = vld [vmem:[%s11938_s15 + $0x260] sm:$0xff] }
 0x22e   : > { %6289 = vmatmul.mubr.bf16.vlgmr.msra.gmra.mrb[4].mxu0 %v12213_v1  ;;  %6453 = vmatmul.mubr.bf16.vlgmr.msra.gmra.mrb[4].mxu1 %v12213_v1 }
 0x22f   : > { %6298 = vmatpush1.bf16.msra.mxu0 %v10609_v23  ;;  %6462 = vmatpush1.bf16.msra.mxu1 %v10611_v25  ;;  %v10705_v23 = vcombine.low %v1336_v4, %v1344_v5  ;;  %v522_v5 = vld [vmem:[%s11938_s15 + $0x1a0] sm:$0xff] }
 0x230   : > { %6299 = vmatprep.subr.bf16.mxu0 %v10626_v27  ;;  %6463 = vmatprep.subr.bf16.mxu1 %v10628_v28 }
 0x231   : > { %6329 = vmatprep.mubr.bf16.mxu0 %v11717_v18  ;;  %6493 = vmatprep.mubr.bf16.mxu1 %v11717_v18 }
 0x233   : > { %6300 = vmatpush1.bf16.msra.mxu0 %v10625_v34  ;;  %6464 = vmatpush1.bf16.msra.mxu1 %v10627_v0  ;;  %v10724_v34 = vcombine.high %v1353_v60, %v1361_v19  ;;  %v474_v0 = vld [vmem:[%s11938_s15 + $0x20] sm:$0xff] }
 0x234   : > { %6301 = vmatprep.subr.bf16.mxu0 %v10642_v36  ;;  %6465 = vmatprep.subr.bf16.mxu1 %v10644_v37  ;;  %v482_v36 = vld [vmem:[%s11938_s15 + $0x60] sm:$0xff] }
 0x237   : > { %6302 = vmatpush1.bf16.msra.mxu0 %v10641_v43  ;;  %6466 = vmatpush1.bf16.msra.mxu1 %v10643_v44  ;;  %v10723_v44 = vcombine.low %v1353_v60, %v1361_v19  ;;  %v9893_v60 = vcombine.low %v522_v5, %v530_v6 }
 0x238   : > { %6303 = vmatprep.subr.bf16.mxu0 %v10658_v46  ;;  %6467 = vmatprep.subr.bf16.mxu1 %v10660_v47  ;;  %v9846_v46 = vcombine.high %v474_v0, %v482_v36  ;;  %v9848_v47 = vcombine.high %v475_v38, %v483_v39 }
 0x23b   : > { %6304 = vmatpush1.bf16.msra.mxu0 %v10657_v17  ;;  %6468 = vmatpush1.bf16.msra.mxu1 %v10659_v53  ;;  %v499_v17 = vld [vmem:[%s11938_s15 + $0xe8] sm:$0xff]  ;;  %v9845_v53 = vcombine.low %v474_v0, %v482_v36 }
 0x23c   : > { %6305 = vmatprep.subr.bf16.mxu0 %v10674_v55  ;;  %6469 = vmatprep.subr.bf16.mxu1 %v10676_v56  ;;  %v9847_v55 = vcombine.low %v475_v38, %v483_v39  ;;  %v9862_v56 = vcombine.high %v490_v48, %v498_v49  ;;  %v9864_v57 = vcombine.high %v491_v51, %v499_v17  ;;  %v571_v0 = vld [vmem:[%s11938_s15 + $0x328] sm:$0xff] }
 0x23d   : > { %v579_v36 = vld [vmem:[%s11938_s15 + $0x368] sm:$0xff] }
 0x23f   : > { %6306 = vmatpush1.bf16.msra.mxu0 %v10673_v62  ;;  %6470 = vmatpush1.bf16.msra.mxu1 %v10675_v63  ;;  %v515_v62 = vld [vmem:[%s11938_s15 + $0x168] sm:$0xff]  ;;  %v9861_v63 = vcombine.low %v490_v48, %v498_v49  ;;  %v9943_v48 = vcombine.low %v571_v0, %v579_v36 }
 0x240   : > { %6307 = vmatprep.subr.bf16.mxu0 %v10690_v2  ;;  %6471 = vmatprep.subr.bf16.mxu1 %v10692_v3  ;;  %v9863_v2 = vcombine.low %v491_v51, %v499_v17  ;;  %v9878_v3 = vcombine.high %v506_v58, %v514_v59  ;;  %v9880_v4 = vcombine.high %v507_v61, %v515_v62  ;;  %v602_v51 = vld [vmem:[%s11938_s15 + $0x420] sm:$0xff] }
 0x241   : > { %v6003_v11 = vpop.f32.mrb[0].mxu0  ;;  %v6167_v15 = vpop.f32.mrb[0].mxu1  ;;  %v610_v17 = vld [vmem:[%s11938_s15 + $0x460] sm:$0xff] }
 0x242   : > { %v6005_v16 = vpop.f32.mrb[1].mxu0  ;;  %v6169_v21 = vpop.f32.mrb[1].mxu1 }
 0x243   : > { %v7174_v20 = vcombine.low %v6003_v11, %v6005_v16  ;;  %v6007_v22 = vpop.f32.mrb[2].mxu0  ;;  %6308 = vmatpush1.bf16.msra.mxu0 %v10689_v24  ;;  %v7175_v25 = vcombine.low %v6167_v15, %v6169_v21  ;;  %v6171_v27 = vpop.f32.mrb[2].mxu1  ;;  %6472 = vmatpush1.bf16.msra.mxu1 %v10691_v8  ;;  %v531_v24 = vld [vmem:[%s11938_s15 + $0x1e8] sm:$0xff]  ;;  %v9877_v8 = vcombine.low %v506_v58, %v514_v59 }
 0x244   : > { %v6008_v28 = vpop.f32.mrb[3].mxu0  ;;  %6309 = vmatprep.subr.bf16.mxu0 %v10706_v9  ;;  %v6172_v33 = vpop.f32.mrb[3].mxu1  ;;  %6473 = vmatprep.subr.bf16.mxu1 %v10708_v32  ;;  %v9879_v9 = vcombine.low %v507_v61, %v515_v62  ;;  %v9894_v11 = vcombine.high %v522_v5, %v530_v6  ;;  %v9896_v32 = vcombine.high %v523_v7, %v531_v24  ;;  %v539_v15 = vld [vmem:[%s11938_s15 + $0x228] sm:$0xff]  ;;  %v554_v22 = vld [vmem:[%s11938_s15 + $0x2a0] sm:$0xff] }
 0x245   : > { %v7182_v31 = vrot.slane %v7174_v20, %v11988_v54  ;;  %v7189_v37 = vrot.slane %v7175_v25, %v11988_v54  ;;  %v547_v16 = vld [vmem:[%s11938_s15 + $0x268] sm:$0xff]  ;;  %v9895_v19 = vcombine.low %v523_v7, %v531_v24  ;;  %v9910_v20 = vcombine.high %v538_v12, %v546_v14  ;;  %v570_v33 = vld [vmem:[%s11938_s15 + $0x320] sm:$0xff] }
 0x246   : > { %v9912_v21 = vcombine.high %v539_v15, %v547_v16  ;;  %v555_v25 = vld [vmem:[%s11938_s15 + $0x2a8] sm:$0xff]  ;;  %v9909_v28 = vcombine.low %v538_v12, %v546_v14  ;;  %v9974_v58 = vcombine.high %v602_v51, %v610_v17  ;;  %v618_v61 = vld [vmem:[%s11938_s15 + $0x4a0] sm:$0xff] }
 0x247   : > { %6310 = vmatpush1.bf16.msra.mxu0 %v10705_v23  ;;  %v7190_v43 = vcombine.low %v7182_v31, %v7189_v37  ;;  %6474 = vmatpush1.bf16.msra.mxu1 %v10707_v29  ;;  %v562_v23 = vld [vmem:[%s11938_s15 + $0x2e0] sm:$0xff]  ;;  %v563_v27 = vld [vmem:[%s11938_s15 + $0x2e8] sm:$0xff]  ;;  %v9911_v29 = vcombine.low %v539_v15, %v547_v16 }
 0x248   : > { %6311 = vmatprep.subr.bf16.mxu0 %v10722_v30  ;;  %6475 = vmatprep.subr.bf16.mxu1 %v10724_v34  ;;  %v9926_v30 = vcombine.high %v554_v22, %v562_v23  ;;  %v9928_v31 = vcombine.high %v555_v25, %v563_v27  ;;  %v578_v34 = vld [vmem:[%s11938_s15 + $0x360] sm:$0xff]  ;;  %v9925_v37 = vcombine.low %v554_v22, %v562_v23 }
 0x249   : > { %v7246_v50 = vadd.f32 %v7190_v43, %v415_v40  ;;  %v9927_v38 = vcombine.low %v555_v25, %v563_v27  ;;  %v9942_v39 = vcombine.high %v570_v33, %v578_v34  ;;  %v9944_v40 = vcombine.high %v571_v0, %v579_v36  ;;  %v594_v43 = vld [vmem:[%s11938_s15 + $0x3e0] sm:$0xff] }
 0x24a   : > { %v626_v62 = vld [vmem:[%s11938_s15 + $0x4e0] sm:$0xff] }
 0x24b   : > { %6312 = vmatpush1.bf16.msra.mxu0 %v10721_v41  ;;  %7250 = vst [vmem:[#allocation2] sm:$0xff] %v7246_v50  ;;  %6476 = vmatpush1.bf16.msra.mxu1 %v10723_v44  ;;  %v586_v41 = vld [vmem:[%s11938_s15 + $0x3a0] sm:$0xff]  ;;  %v587_v44 = vld [vmem:[%s11938_s15 + $0x3a8] sm:$0xff]  ;;  %v9990_v5 = vcombine.high %v618_v61, %v626_v62 }
 0x24c   : > { %6502 = vmatprep.subr.bf16.mxu0 %v9846_v46  ;;  %6666 = vmatprep.subr.bf16.mxu1 %v9848_v47  ;;  %v595_v46 = vld [vmem:[%s11938_s15 + $0x3e8] sm:$0xff]  ;;  %v9941_v47 = vcombine.low %v570_v33, %v578_v34  ;;  %v9958_v49 = vcombine.high %v586_v41, %v594_v43  ;;  %v634_v7 = vld [vmem:[%s11938_s15 + $0x520] sm:$0xff] }
 0x24d   : > { %v9960_v50 = vcombine.high %v587_v44, %v595_v46  ;;  %v642_v24 = vld [vmem:[%s11938_s15 + $0x560] sm:$0xff] }
 0x24e   : > { %6330 = vmatmul.mubr.bf16.vlgmr.msra.gmra.mrb[4].mxu0 %v12254_v13  ;;  %6494 = vmatmul.mubr.bf16.vlgmr.msra.gmra.mrb[4].mxu1 %v12254_v13  ;;  %v10006_v12 = vcombine.high %v634_v7, %v642_v24  ;;  %v650_v15 = vld [vmem:[%s11938_s15 + $0x5a0] sm:$0xff] }
 0x24f   : > { %6503 = vmatpush1.bf16.msra.mxu0 %v9845_v53  ;;  %6667 = vmatpush1.bf16.msra.mxu1 %v9847_v55  ;;  %v603_v53 = vld [vmem:[%s11938_s15 + $0x428] sm:$0xff]  ;;  %v658_v16 = vld [vmem:[%s11938_s15 + $0x5e0] sm:$0xff] }
 0x250   : > { %6504 = vmatprep.subr.bf16.mxu0 %v9862_v56  ;;  %6668 = vmatprep.subr.bf16.mxu1 %v9864_v57  ;;  %v611_v55 = vld [vmem:[%s11938_s15 + $0x468] sm:$0xff]  ;;  %v9957_v56 = vcombine.low %v586_v41, %v594_v43  ;;  %v9959_v57 = vcombine.low %v587_v44, %v595_v46  ;;  %v10022_v22 = vcombine.high %v650_v15, %v658_v16  ;;  %v666_v25 = vld [vmem:[%s11938_s15 + $0x620] sm:$0xff] }
 0x251   : > { %6534 = vmatprep.mubr.bf16.mxu0 %v12007_v10  ;;  %6698 = vmatprep.mubr.bf16.mxu1 %v12007_v10  ;;  %v9976_v59 = vcombine.high %v603_v53, %v611_v55  ;;  %v674_v27 = vld [vmem:[%s11938_s15 + $0x660] sm:$0xff] }
 0x252   : > { %v10038_v33 = vcombine.high %v666_v25, %v674_v27  ;;  %v682_v0 = vld [vmem:[%s11938_s15 + $0x6a0] sm:$0xff] }
 0x253   : > { %6505 = vmatpush1.bf16.msra.mxu0 %v9861_v63  ;;  %6669 = vmatpush1.bf16.msra.mxu1 %v9863_v2  ;;  %v619_v63 = vld [vmem:[%s11938_s15 + $0x4a8] sm:$0xff]  ;;  %v690_v36 = vld [vmem:[%s11938_s15 + $0x6e0] sm:$0xff] }
 0x254   : > { %6506 = vmatprep.subr.bf16.mxu0 %v9878_v3  ;;  %6670 = vmatprep.subr.bf16.mxu1 %v9880_v4  ;;  %v627_v2 = vld [vmem:[%s11938_s15 + $0x4e8] sm:$0xff]  ;;  %v9973_v3 = vcombine.low %v602_v51, %v610_v17  ;;  %v9975_v4 = vcombine.low %v603_v53, %v611_v55  ;;  %v10054_v41 = vcombine.high %v682_v0, %v690_v36  ;;  %v698_v44 = vld [vmem:[%s11938_s15 + $0x720] sm:$0xff] }
 0x255   : > { %v9992_v6 = vcombine.high %v619_v63, %v627_v2  ;;  %v706_v46 = vld [vmem:[%s11938_s15 + $0x760] sm:$0xff] }
 0x256   : > { %v10070_v51 = vcombine.high %v698_v44, %v706_v46  ;;  %v714_v53 = vld [vmem:[%s11938_s15 + $0x7a0] sm:$0xff] }
 0x257   : > { %6507 = vmatpush1.bf16.msra.mxu0 %v9877_v8  ;;  %6671 = vmatpush1.bf16.msra.mxu1 %v9879_v9  ;;  %v635_v8 = vld [vmem:[%s11938_s15 + $0x528] sm:$0xff]  ;;  %v722_v55 = vld [vmem:[%s11938_s15 + $0x7e0] sm:$0xff] }
 0x258   : > { %6508 = vmatprep.subr.bf16.mxu0 %v9894_v11  ;;  %6672 = vmatprep.subr.bf16.mxu1 %v9896_v32  ;;  %v643_v9 = vld [vmem:[%s11938_s15 + $0x568] sm:$0xff]  ;;  %v9989_v11 = vcombine.low %v618_v61, %v626_v62  ;;  %v9991_v32 = vcombine.low %v619_v63, %v627_v2  ;;  %v10086_v61 = vcombine.high %v714_v53, %v722_v55  ;;  %v730_v63 = vld [vmem:[%s11938_s15 + $0x820] sm:$0xff] }
 0x259   : > { %v10008_v14 = vcombine.high %v635_v8, %v643_v9  ;;  %v738_v2 = vld [vmem:[%s11938_s15 + $0x860] sm:$0xff] }
 0x25b   : > { %6509 = vmatpush1.bf16.msra.mxu0 %v9893_v60  ;;  %6673 = vmatpush1.bf16.msra.mxu1 %v9895_v19  ;;  %v651_v60 = vld [vmem:[%s11938_s15 + $0x5a8] sm:$0xff] }
 0x25c   : > { %6510 = vmatprep.subr.bf16.mxu0 %v9910_v20  ;;  %6674 = vmatprep.subr.bf16.mxu1 %v9912_v21  ;;  %v659_v19 = vld [vmem:[%s11938_s15 + $0x5e8] sm:$0xff]  ;;  %v10005_v20 = vcombine.low %v634_v7, %v642_v24  ;;  %v10007_v21 = vcombine.low %v635_v8, %v643_v9  ;;  %v10102_v7 = vcombine.high %v730_v63, %v738_v2  ;;  %v746_v8 = vld [vmem:[%s11938_s15 + $0x8a0] sm:$0xff] }
 0x25d   : > { %v10024_v23 = vcombine.high %v651_v60, %v659_v19  ;;  %v754_v9 = vld [vmem:[%s11938_s15 + $0x8e0] sm:$0xff] }
 0x25f   : > { %6511 = vmatpush1.bf16.msra.mxu0 %v9909_v28  ;;  %6675 = vmatpush1.bf16.msra.mxu1 %v9911_v29  ;;  %v667_v28 = vld [vmem:[%s11938_s15 + $0x628] sm:$0xff] }
 0x260   : > { %6512 = vmatprep.subr.bf16.mxu0 %v9926_v30  ;;  %6676 = vmatprep.subr.bf16.mxu1 %v9928_v31  ;;  %v675_v29 = vld [vmem:[%s11938_s15 + $0x668] sm:$0xff]  ;;  %v10021_v30 = vcombine.low %v650_v15, %v658_v16  ;;  %v10023_v31 = vcombine.low %v651_v60, %v659_v19  ;;  %v10118_v15 = vcombine.high %v746_v8, %v754_v9  ;;  %v762_v60 = vld [vmem:[%s11938_s15 + $0x920] sm:$0xff] }
 0x261   : > { %v10040_v34 = vcombine.high %v667_v28, %v675_v29  ;;  %v770_v19 = vld [vmem:[%s11938_s15 + $0x960] sm:$0xff] }
 0x263   : > { %6513 = vmatpush1.bf16.msra.mxu0 %v9925_v37  ;;  %6677 = vmatpush1.bf16.msra.mxu1 %v9927_v38  ;;  %v683_v37 = vld [vmem:[%s11938_s15 + $0x6a8] sm:$0xff] }
 0x264   : > { %6514 = vmatprep.subr.bf16.mxu0 %v9942_v39  ;;  %6678 = vmatprep.subr.bf16.mxu1 %v9944_v40  ;;  %v691_v38 = vld [vmem:[%s11938_s15 + $0x6e8] sm:$0xff]  ;;  %v10037_v39 = vcombine.low %v666_v25, %v674_v27  ;;  %v10039_v40 = vcombine.low %v667_v28, %v675_v29  ;;  %v10134_v25 = vcombine.high %v762_v60, %v770_v19  ;;  %v778_v28 = vld [vmem:[%s11938_s15 + $0x9a0] sm:$0xff] }
 0x265   : > { %v10056_v43 = vcombine.high %v683_v37, %v691_v38  ;;  %v786_v29 = vld [vmem:[%s11938_s15 + $0x9e0] sm:$0xff] }
 0x267   : > { %6515 = vmatpush1.bf16.msra.mxu0 %v9941_v47  ;;  %6679 = vmatpush1.bf16.msra.mxu1 %v9943_v48  ;;  %v699_v47 = vld [vmem:[%s11938_s15 + $0x728] sm:$0xff] }
 0x268   : > { %6516 = vmatprep.subr.bf16.mxu0 %v9958_v49  ;;  %6680 = vmatprep.subr.bf16.mxu1 %v9960_v50  ;;  %v707_v48 = vld [vmem:[%s11938_s15 + $0x768] sm:$0xff]  ;;  %v10053_v49 = vcombine.low %v682_v0, %v690_v36  ;;  %v10055_v50 = vcombine.low %v683_v37, %v691_v38  ;;  %v10150_v0 = vcombine.high %v778_v28, %v786_v29  ;;  %v794_v37 = vld [vmem:[%s11938_s15 + $0xa20] sm:$0xff] }
 0x269   : > { %v10072_v17 = vcombine.high %v699_v47, %v707_v48  ;;  %v802_v38 = vld [vmem:[%s11938_s15 + $0xa60] sm:$0xff] }
 0x26b   : > { %6517 = vmatpush1.bf16.msra.mxu0 %v9957_v56  ;;  %6681 = vmatpush1.bf16.msra.mxu1 %v9959_v57  ;;  %v715_v56 = vld [vmem:[%s11938_s15 + $0x7a8] sm:$0xff] }
 0x26c   : > { %6518 = vmatprep.subr.bf16.mxu0 %v9974_v58  ;;  %6682 = vmatprep.subr.bf16.mxu1 %v9976_v59  ;;  %v723_v57 = vld [vmem:[%s11938_s15 + $0x7e8] sm:$0xff]  ;;  %v10069_v58 = vcombine.low %v698_v44, %v706_v46  ;;  %v10071_v59 = vcombine.low %v699_v47, %v707_v48  ;;  %v10166_v44 = vcombine.high %v794_v37, %v802_v38  ;;  %v810_v47 = vld [vmem:[%s11938_s15 + $0xaa0] sm:$0xff] }
 0x26d   : > { %v10088_v62 = vcombine.high %v715_v56, %v723_v57  ;;  %v818_v48 = vld [vmem:[%s11938_s15 + $0xae0] sm:$0xff] }
 0x26f   : > { %6519 = vmatpush1.bf16.msra.mxu0 %v9973_v3  ;;  %6683 = vmatpush1.bf16.msra.mxu1 %v9975_v4  ;;  %v731_v3 = vld [vmem:[%s11938_s15 + $0x828] sm:$0xff] }
 0x270   : > { %6520 = vmatprep.subr.bf16.mxu0 %v9990_v5  ;;  %6684 = vmatprep.subr.bf16.mxu1 %v9992_v6  ;;  %v739_v4 = vld [vmem:[%s11938_s15 + $0x868] sm:$0xff]  ;;  %v10085_v5 = vcombine.low %v714_v53, %v722_v55  ;;  %v10087_v6 = vcombine.low %v715_v56, %v723_v57  ;;  %v10182_v53 = vcombine.high %v810_v47, %v818_v48  ;;  %v826_v56 = vld [vmem:[%s11938_s15 + $0xb20] sm:$0xff] }
 0x271   : > { %v10104_v24 = vcombine.high %v731_v3, %v739_v4  ;;  %v834_v57 = vld [vmem:[%s11938_s15 + $0xb60] sm:$0xff] }
 0x273   : > { %6521 = vmatpush1.bf16.msra.mxu0 %v9989_v11  ;;  %6685 = vmatpush1.bf16.msra.mxu1 %v9991_v32  ;;  %v747_v11 = vld [vmem:[%s11938_s15 + $0x8a8] sm:$0xff] }
 0x274   : > { %6522 = vmatprep.subr.bf16.mxu0 %v10006_v12  ;;  %6686 = vmatprep.subr.bf16.mxu1 %v10008_v14  ;;  %v755_v32 = vld [vmem:[%s11938_s15 + $0x8e8] sm:$0xff]  ;;  %v10101_v12 = vcombine.low %v730_v63, %v738_v2  ;;  %v10103_v14 = vcombine.low %v731_v3, %v739_v4  ;;  %v10198_v63 = vcombine.high %v826_v56, %v834_v57  ;;  %v842_v3 = vld [vmem:[%s11938_s15 + $0xba0] sm:$0xff] }
 0x275   : > { %v10120_v16 = vcombine.high %v747_v11, %v755_v32  ;;  %v850_v4 = vld [vmem:[%s11938_s15 + $0xbe0] sm:$0xff] }
 0x277   : > { %6523 = vmatpush1.bf16.msra.mxu0 %v10005_v20  ;;  %6687 = vmatpush1.bf16.msra.mxu1 %v10007_v21  ;;  %v763_v20 = vld [vmem:[%s11938_s15 + $0x928] sm:$0xff] }
 0x278   : > { %6524 = vmatprep.subr.bf16.mxu0 %v10022_v22  ;;  %6688 = vmatprep.subr.bf16.mxu1 %v10024_v23  ;;  %v771_v21 = vld [vmem:[%s11938_s15 + $0x968] sm:$0xff]  ;;  %v10117_v22 = vcombine.low %v746_v8, %v754_v9  ;;  %v10119_v23 = vcombine.low %v747_v11, %v755_v32  ;;  %v10214_v8 = vcombine.high %v842_v3, %v850_v4  ;;  %v858_v11 = vld [vmem:[%s11938_s15 + $0xc20] sm:$0xff] }
 0x279   : > { %v10136_v27 = vcombine.high %v763_v20, %v771_v21  ;;  %v866_v32 = vld [vmem:[%s11938_s15 + $0xc60] sm:$0xff] }
 0x27b   : > { %6525 = vmatpush1.bf16.msra.mxu0 %v10021_v30  ;;  %6689 = vmatpush1.bf16.msra.mxu1 %v10023_v31  ;;  %v779_v30 = vld [vmem:[%s11938_s15 + $0x9a8] sm:$0xff] }
 0x27c   : > { %6526 = vmatprep.subr.bf16.mxu0 %v10038_v33  ;;  %6690 = vmatprep.subr.bf16.mxu1 %v10040_v34  ;;  %v787_v31 = vld [vmem:[%s11938_s15 + $0x9e8] sm:$0xff]  ;;  %v10133_v33 = vcombine.low %v762_v60, %v770_v19  ;;  %v10135_v34 = vcombine.low %v763_v20, %v771_v21  ;;  %v10230_v60 = vcombine.high %v858_v11, %v866_v32  ;;  %v874_v20 = vld [vmem:[%s11938_s15 + $0xca0] sm:$0xff] }
 0x27d   : > { %v10152_v36 = vcombine.high %v779_v30, %v787_v31  ;;  %v882_v21 = vld [vmem:[%s11938_s15 + $0xce0] sm:$0xff] }
 0x27f   : > { %6527 = vmatpush1.bf16.msra.mxu0 %v10037_v39  ;;  %6691 = vmatpush1.bf16.msra.mxu1 %v10039_v40  ;;  %v795_v39 = vld [vmem:[%s11938_s15 + $0xa28] sm:$0xff] }
 0x280   : > { %6528 = vmatprep.subr.bf16.mxu0 %v10054_v41  ;;  %6692 = vmatprep.subr.bf16.mxu1 %v10056_v43  ;;  %v803_v40 = vld [vmem:[%s11938_s15 + $0xa68] sm:$0xff]  ;;  %v10149_v41 = vcombine.low %v778_v28, %v786_v29  ;;  %v10151_v43 = vcombine.low %v779_v30, %v787_v31  ;;  %v10246_v28 = vcombine.high %v874_v20, %v882_v21  ;;  %v890_v30 = vld [vmem:[%s11938_s15 + $0xd20] sm:$0xff] }
 0x281   : > { %v10168_v46 = vcombine.high %v795_v39, %v803_v40  ;;  %v898_v31 = vld [vmem:[%s11938_s15 + $0xd60] sm:$0xff] }
 0x283   : > { %6529 = vmatpush1.bf16.msra.mxu0 %v10053_v49  ;;  %6693 = vmatpush1.bf16.msra.mxu1 %v10055_v50  ;;  %v811_v49 = vld [vmem:[%s11938_s15 + $0xaa8] sm:$0xff] }
 0x284   : > { %6530 = vmatprep.subr.bf16.mxu0 %v10070_v51  ;;  %6694 = vmatprep.subr.bf16.mxu1 %v10072_v17  ;;  %v819_v50 = vld [vmem:[%s11938_s15 + $0xae8] sm:$0xff]  ;;  %v10165_v51 = vcombine.low %v794_v37, %v802_v38  ;;  %v10167_v17 = vcombine.low %v795_v39, %v803_v40  ;;  %v10262_v37 = vcombine.high %v890_v30, %v898_v31  ;;  %v906_v39 = vld [vmem:[%s11938_s15 + $0xda0] sm:$0xff] }
 0x285   : > { %v10184_v55 = vcombine.high %v811_v49, %v819_v50  ;;  %v914_v40 = vld [vmem:[%s11938_s15 + $0xde0] sm:$0xff] }
 0x287   : > { %6531 = vmatpush1.bf16.msra.mxu0 %v10069_v58  ;;  %6695 = vmatpush1.bf16.msra.mxu1 %v10071_v59  ;;  %v827_v58 = vld [vmem:[%s11938_s15 + $0xb28] sm:$0xff] }
 0x288   : > { %6532 = vmatprep.subr.bf16.mxu0 %v10086_v61  ;;  %6696 = vmatprep.subr.bf16.mxu1 %v10088_v62  ;;  %v835_v59 = vld [vmem:[%s11938_s15 + $0xb68] sm:$0xff]  ;;  %v10181_v61 = vcombine.low %v810_v47, %v818_v48  ;;  %v10183_v62 = vcombine.low %v811_v49, %v819_v50  ;;  %v10278_v47 = vcombine.high %v906_v39, %v914_v40  ;;  %v922_v49 = vld [vmem:[%s11938_s15 + $0xe20] sm:$0xff] }
 0x289   : > { %v10200_v2 = vcombine.high %v827_v58, %v835_v59  ;;  %v930_v50 = vld [vmem:[%s11938_s15 + $0xe60] sm:$0xff] }
 0x28b   : > { %6533 = vmatpush1.bf16.msra.mxu0 %v10085_v5  ;;  %6697 = vmatpush1.bf16.msra.mxu1 %v10087_v6  ;;  %v843_v5 = vld [vmem:[%s11938_s15 + $0xba8] sm:$0xff] }
 0x28c   : > { %6543 = vmatprep.subr.bf16.mxu0 %v10102_v7  ;;  %6707 = vmatprep.subr.bf16.mxu1 %v10104_v24  ;;  %v851_v6 = vld [vmem:[%s11938_s15 + $0xbe8] sm:$0xff]  ;;  %v10197_v7 = vcombine.low %v826_v56, %v834_v57  ;;  %v10199_v24 = vcombine.low %v827_v58, %v835_v59  ;;  %v10294_v56 = vcombine.high %v922_v49, %v930_v50  ;;  %v938_v58 = vld [vmem:[%s11938_s15 + $0xea0] sm:$0xff] }
 0x28d   : > { %v10216_v9 = vcombine.high %v843_v5, %v851_v6  ;;  %v946_v59 = vld [vmem:[%s11938_s15 + $0xee0] sm:$0xff] }
 0x28e   : > { %6535 = vmatmul.mubr.bf16.vlgmr.msra.gmra.mrb[8].mxu0 %v12056_v26  ;;  %6699 = vmatmul.mubr.bf16.vlgmr.msra.gmra.mrb[8].mxu1 %v12056_v26 }
 0x28f   : > { %6544 = vmatpush1.bf16.msra.mxu0 %v10101_v12  ;;  %6708 = vmatpush1.bf16.msra.mxu1 %v10103_v14  ;;  %v859_v12 = vld [vmem:[%s11938_s15 + $0xc28] sm:$0xff] }
 0x290   : > { %6545 = vmatprep.subr.bf16.mxu0 %v10118_v15  ;;  %6709 = vmatprep.subr.bf16.mxu1 %v10120_v16  ;;  %v867_v14 = vld [vmem:[%s11938_s15 + $0xc68] sm:$0xff]  ;;  %v10213_v15 = vcombine.low %v842_v3, %v850_v4  ;;  %v10215_v16 = vcombine.low %v843_v5, %v851_v6  ;;  %v10310_v3 = vcombine.high %v938_v58, %v946_v59  ;;  %v954_v5 = vld [vmem:[%s11938_s15 + $0xf20] sm:$0xff] }
 0x291   : > { %6575 = vmatprep.mubr.bf16.mxu0 %v12062_v35  ;;  %6739 = vmatprep.mubr.bf16.mxu1 %v12062_v35  ;;  %v10232_v19 = vcombine.high %v859_v12, %v867_v14  ;;  %v962_v6 = vld [vmem:[%s11938_s15 + $0xf60] sm:$0xff] }
 0x293   : > { %6546 = vmatpush1.bf16.msra.mxu0 %v10117_v22  ;;  %6710 = vmatpush1.bf16.msra.mxu1 %v10119_v23  ;;  %v875_v22 = vld [vmem:[%s11938_s15 + $0xca8] sm:$0xff] }
 0x294   : > { %6547 = vmatprep.subr.bf16.mxu0 %v10134_v25  ;;  %6711 = vmatprep.subr.bf16.mxu1 %v10136_v27  ;;  %v883_v23 = vld [vmem:[%s11938_s15 + $0xce8] sm:$0xff]  ;;  %v10229_v25 = vcombine.low %v858_v11, %v866_v32  ;;  %v10231_v27 = vcombine.low %v859_v12, %v867_v14  ;;  %v10326_v11 = vcombine.high %v954_v5, %v962_v6  ;;  %v970_v12 = vld [vmem:[%s11938_s15 + $0xfa0] sm:$0xff] }
 0x295   : > { %v10248_v29 = vcombine.high %v875_v22, %v883_v23  ;;  %v978_v14 = vld [vmem:[%s11938_s15 + $0xfe0] sm:$0xff] }
 0x297   : > { %6548 = vmatpush1.bf16.msra.mxu0 %v10133_v33  ;;  %6712 = vmatpush1.bf16.msra.mxu1 %v10135_v34  ;;  %v891_v33 = vld [vmem:[%s11938_s15 + $0xd28] sm:$0xff] }
 0x298   : > { %6549 = vmatprep.subr.bf16.mxu0 %v10150_v0  ;;  %6713 = vmatprep.subr.bf16.mxu1 %v10152_v36  ;;  %v899_v34 = vld [vmem:[%s11938_s15 + $0xd68] sm:$0xff]  ;;  %v10245_v0 = vcombine.low %v874_v20, %v882_v21  ;;  %v10247_v36 = vcombine.low %v875_v22, %v883_v23  ;;  %v10342_v20 = vcombine.high %v970_v12, %v978_v14  ;;  %v986_v22 = vld [vmem:[%s11938_s15 + $0x1020] sm:$0xff] }
 0x299   : > { %v10264_v38 = vcombine.high %v891_v33, %v899_v34  ;;  %v994_v23 = vld [vmem:[%s11938_s15 + $0x1060] sm:$0xff] }
 0x29b   : > { %6550 = vmatpush1.bf16.msra.mxu0 %v10149_v41  ;;  %6714 = vmatpush1.bf16.msra.mxu1 %v10151_v43  ;;  %v907_v41 = vld [vmem:[%s11938_s15 + $0xda8] sm:$0xff] }
 0x29c   : > { %6551 = vmatprep.subr.bf16.mxu0 %v10166_v44  ;;  %6715 = vmatprep.subr.bf16.mxu1 %v10168_v46  ;;  %v915_v43 = vld [vmem:[%s11938_s15 + $0xde8] sm:$0xff]  ;;  %v10261_v44 = vcombine.low %v890_v30, %v898_v31  ;;  %v10263_v46 = vcombine.low %v891_v33, %v899_v34  ;;  %v10358_v30 = vcombine.high %v986_v22, %v994_v23  ;;  %v1002_v33 = vld [vmem:[%s11938_s15 + $0x10a0] sm:$0xff] }
 0x29d   : > { %v10280_v48 = vcombine.high %v907_v41, %v915_v43  ;;  %v1010_v34 = vld [vmem:[%s11938_s15 + $0x10e0] sm:$0xff] }
 0x29f   : > { %6552 = vmatpush1.bf16.msra.mxu0 %v10165_v51  ;;  %6716 = vmatpush1.bf16.msra.mxu1 %v10167_v17  ;;  %v923_v51 = vld [vmem:[%s11938_s15 + $0xe28] sm:$0xff] }
 0x2a0   : > { %6553 = vmatprep.subr.bf16.mxu0 %v10182_v53  ;;  %6717 = vmatprep.subr.bf16.mxu1 %v10184_v55  ;;  %v931_v17 = vld [vmem:[%s11938_s15 + $0xe68] sm:$0xff]  ;;  %v10277_v53 = vcombine.low %v906_v39, %v914_v40  ;;  %v10279_v55 = vcombine.low %v907_v41, %v915_v43  ;;  %v10374_v39 = vcombine.high %v1002_v33, %v1010_v34  ;;  %v1018_v41 = vld [vmem:[%s11938_s15 + $0x1120] sm:$0xff] }
 0x2a1   : > { %v10296_v57 = vcombine.high %v923_v51, %v931_v17  ;;  %v1026_v43 = vld [vmem:[%s11938_s15 + $0x1160] sm:$0xff] }
 0x2a3   : > { %6554 = vmatpush1.bf16.msra.mxu0 %v10181_v61  ;;  %6718 = vmatpush1.bf16.msra.mxu1 %v10183_v62  ;;  %v939_v61 = vld [vmem:[%s11938_s15 + $0xea8] sm:$0xff] }
 0x2a4   : > { %6555 = vmatprep.subr.bf16.mxu0 %v10198_v63  ;;  %6719 = vmatprep.subr.bf16.mxu1 %v10200_v2  ;;  %v947_v62 = vld [vmem:[%s11938_s15 + $0xee8] sm:$0xff]  ;;  %v10293_v63 = vcombine.low %v922_v49, %v930_v50  ;;  %v10295_v2 = vcombine.low %v923_v51, %v931_v17  ;;  %v10390_v49 = vcombine.high %v1018_v41, %v1026_v43  ;;  %v1034_v51 = vld [vmem:[%s11938_s15 + $0x11a0] sm:$0xff] }
 0x2a5   : > { %v10312_v4 = vcombine.high %v939_v61, %v947_v62  ;;  %v1042_v17 = vld [vmem:[%s11938_s15 + $0x11e0] sm:$0xff] }
 0x2a7   : > { %6556 = vmatpush1.bf16.msra.mxu0 %v10197_v7  ;;  %6720 = vmatpush1.bf16.msra.mxu1 %v10199_v24  ;;  %v955_v7 = vld [vmem:[%s11938_s15 + $0xf28] sm:$0xff] }
 0x2a8   : > { %6557 = vmatprep.subr.bf16.mxu0 %v10214_v8  ;;  %6721 = vmatprep.subr.bf16.mxu1 %v10216_v9  ;;  %v963_v24 = vld [vmem:[%s11938_s15 + $0xf68] sm:$0xff]  ;;  %v10309_v8 = vcombine.low %v938_v58, %v946_v59  ;;  %v10311_v9 = vcombine.low %v939_v61, %v947_v62  ;;  %v10406_v58 = vcombine.high %v1034_v51, %v1042_v17  ;;  %v1050_v61 = vld [vmem:[%s11938_s15 + $0x1220] sm:$0xff] }
 0x2a9   : > { %v10328_v32 = vcombine.high %v955_v7, %v963_v24  ;;  %v1058_v62 = vld [vmem:[%s11938_s15 + $0x1260] sm:$0xff] }
 0x2ab   : > { %6558 = vmatpush1.bf16.msra.mxu0 %v10213_v15  ;;  %6722 = vmatpush1.bf16.msra.mxu1 %v10215_v16  ;;  %v971_v15 = vld [vmem:[%s11938_s15 + $0xfa8] sm:$0xff] }
 0x2ac   : > { %6559 = vmatprep.subr.bf16.mxu0 %v10230_v60  ;;  %6723 = vmatprep.subr.bf16.mxu1 %v10232_v19  ;;  %v979_v16 = vld [vmem:[%s11938_s15 + $0xfe8] sm:$0xff]  ;;  %v10325_v60 = vcombine.low %v954_v5, %v962_v6  ;;  %v10327_v19 = vcombine.low %v955_v7, %v963_v24  ;;  %v10422_v5 = vcombine.high %v1050_v61, %v1058_v62  ;;  %v1066_v7 = vld [vmem:[%s11938_s15 + $0x12a0] sm:$0xff] }
 0x2ad   : > { %v10344_v21 = vcombine.high %v971_v15, %v979_v16  ;;  %v1074_v24 = vld [vmem:[%s11938_s15 + $0x12e0] sm:$0xff] }
 0x2af   : > { %6560 = vmatpush1.bf16.msra.mxu0 %v10229_v25  ;;  %6724 = vmatpush1.bf16.msra.mxu1 %v10231_v27  ;;  %v987_v25 = vld [vmem:[%s11938_s15 + $0x1028] sm:$0xff] }
 0x2b0   : > { %6561 = vmatprep.subr.bf16.mxu0 %v10246_v28  ;;  %6725 = vmatprep.subr.bf16.mxu1 %v10248_v29  ;;  %v995_v27 = vld [vmem:[%s11938_s15 + $0x1068] sm:$0xff]  ;;  %v10341_v28 = vcombine.low %v970_v12, %v978_v14  ;;  %v10343_v29 = vcombine.low %v971_v15, %v979_v16  ;;  %v10438_v12 = vcombine.high %v1066_v7, %v1074_v24  ;;  %v1082_v15 = vld [vmem:[%s11938_s15 + $0x1320] sm:$0xff] }
 0x2b1   : > { %v10360_v31 = vcombine.high %v987_v25, %v995_v27  ;;  %v1090_v16 = vld [vmem:[%s11938_s15 + $0x1360] sm:$0xff] }
 0x2b3   : > { %6562 = vmatpush1.bf16.msra.mxu0 %v10245_v0  ;;  %6726 = vmatpush1.bf16.msra.mxu1 %v10247_v36  ;;  %v1003_v0 = vld [vmem:[%s11938_s15 + $0x10a8] sm:$0xff] }
 0x2b4   : > { %6563 = vmatprep.subr.bf16.mxu0 %v10262_v37  ;;  %6727 = vmatprep.subr.bf16.mxu1 %v10264_v38  ;;  %v1011_v36 = vld [vmem:[%s11938_s15 + $0x10e8] sm:$0xff]  ;;  %v10357_v37 = vcombine.low %v986_v22, %v994_v23  ;;  %v10359_v38 = vcombine.low %v987_v25, %v995_v27  ;;  %v10454_v22 = vcombine.high %v1082_v15, %v1090_v16  ;;  %v1098_v25 = vld [vmem:[%s11938_s15 + $0x13a0] sm:$0xff] }
 0x2b5   : > { %v10376_v40 = vcombine.high %v1003_v0, %v1011_v36  ;;  %v1106_v27 = vld [vmem:[%s11938_s15 + $0x13e0] sm:$0xff] }
 0x2b7   : > { %6564 = vmatpush1.bf16.msra.mxu0 %v10261_v44  ;;  %6728 = vmatpush1.bf16.msra.mxu1 %v10263_v46  ;;  %v1019_v44 = vld [vmem:[%s11938_s15 + $0x1128] sm:$0xff] }
 0x2b8   : > { %6565 = vmatprep.subr.bf16.mxu0 %v10278_v47  ;;  %6729 = vmatprep.subr.bf16.mxu1 %v10280_v48  ;;  %v1027_v46 = vld [vmem:[%s11938_s15 + $0x1168] sm:$0xff]  ;;  %v10373_v47 = vcombine.low %v1002_v33, %v1010_v34  ;;  %v10375_v48 = vcombine.low %v1003_v0, %v1011_v36  ;;  %v10470_v33 = vcombine.high %v1098_v25, %v1106_v27  ;;  %v1114_v0 = vld [vmem:[%s11938_s15 + $0x1420] sm:$0xff] }
 0x2b9   : > { %v10392_v50 = vcombine.high %v1019_v44, %v1027_v46  ;;  %v1122_v36 = vld [vmem:[%s11938_s15 + $0x1460] sm:$0xff] }
 0x2bb   : > { %6566 = vmatpush1.bf16.msra.mxu0 %v10277_v53  ;;  %6730 = vmatpush1.bf16.msra.mxu1 %v10279_v55  ;;  %v1035_v53 = vld [vmem:[%s11938_s15 + $0x11a8] sm:$0xff] }
 0x2bc   : > { %6567 = vmatprep.subr.bf16.mxu0 %v10294_v56  ;;  %6731 = vmatprep.subr.bf16.mxu1 %v10296_v57  ;;  %v1043_v55 = vld [vmem:[%s11938_s15 + $0x11e8] sm:$0xff]  ;;  %v10389_v56 = vcombine.low %v1018_v41, %v1026_v43  ;;  %v10391_v57 = vcombine.low %v1019_v44, %v1027_v46  ;;  %v10486_v41 = vcombine.high %v1114_v0, %v1122_v36  ;;  %v1130_v44 = vld [vmem:[%s11938_s15 + $0x14a0] sm:$0xff] }
 0x2bd   : > { %v10408_v59 = vcombine.high %v1035_v53, %v1043_v55  ;;  %v1138_v46 = vld [vmem:[%s11938_s15 + $0x14e0] sm:$0xff] }
 0x2bf   : > { %6568 = vmatpush1.bf16.msra.mxu0 %v10293_v63  ;;  %6732 = vmatpush1.bf16.msra.mxu1 %v10295_v2  ;;  %v1051_v63 = vld [vmem:[%s11938_s15 + $0x1228] sm:$0xff] }
 0x2c0   : > { %6569 = vmatprep.subr.bf16.mxu0 %v10310_v3  ;;  %6733 = vmatprep.subr.bf16.mxu1 %v10312_v4  ;;  %v1059_v2 = vld [vmem:[%s11938_s15 + $0x1268] sm:$0xff]  ;;  %v10405_v3 = vcombine.low %v1034_v51, %v1042_v17  ;;  %v10407_v4 = vcombine.low %v1035_v53, %v1043_v55  ;;  %v10502_v51 = vcombine.high %v1130_v44, %v1138_v46  ;;  %v1146_v53 = vld [vmem:[%s11938_s15 + $0x1520] sm:$0xff] }
 0x2c1   : > { %v10424_v6 = vcombine.high %v1051_v63, %v1059_v2  ;;  %v1154_v55 = vld [vmem:[%s11938_s15 + $0x1560] sm:$0xff] }
 0x2c3   : > { %6570 = vmatpush1.bf16.msra.mxu0 %v10309_v8  ;;  %6734 = vmatpush1.bf16.msra.mxu1 %v10311_v9  ;;  %v1067_v8 = vld [vmem:[%s11938_s15 + $0x12a8] sm:$0xff] }
 0x2c4   : > { %6571 = vmatprep.subr.bf16.mxu0 %v10326_v11  ;;  %6735 = vmatprep.subr.bf16.mxu1 %v10328_v32  ;;  %v1075_v9 = vld [vmem:[%s11938_s15 + $0x12e8] sm:$0xff]  ;;  %v10421_v11 = vcombine.low %v1050_v61, %v1058_v62  ;;  %v10423_v32 = vcombine.low %v1051_v63, %v1059_v2  ;;  %v10518_v61 = vcombine.high %v1146_v53, %v1154_v55  ;;  %v1162_v63 = vld [vmem:[%s11938_s15 + $0x15a0] sm:$0xff] }
 0x2c5   : > { %v10440_v14 = vcombine.high %v1067_v8, %v1075_v9  ;;  %v1170_v2 = vld [vmem:[%s11938_s15 + $0x15e0] sm:$0xff] }
 0x2c7   : > { %6572 = vmatpush1.bf16.msra.mxu0 %v10325_v60  ;;  %6736 = vmatpush1.bf16.msra.mxu1 %v10327_v19  ;;  %v1083_v60 = vld [vmem:[%s11938_s15 + $0x1328] sm:$0xff] }
 0x2c8   : > { %6573 = vmatprep.subr.bf16.mxu0 %v10342_v20  ;;  %6737 = vmatprep.subr.bf16.mxu1 %v10344_v21  ;;  %v1091_v19 = vld [vmem:[%s11938_s15 + $0x1368] sm:$0xff]  ;;  %v10437_v20 = vcombine.low %v1066_v7, %v1074_v24  ;;  %v10439_v21 = vcombine.low %v1067_v8, %v1075_v9  ;;  %v10534_v7 = vcombine.high %v1162_v63, %v1170_v2  ;;  %v1178_v8 = vld [vmem:[%s11938_s15 + $0x1620] sm:$0xff] }
 0x2c9   : > { %v10456_v23 = vcombine.high %v1083_v60, %v1091_v19  ;;  %v1186_v9 = vld [vmem:[%s11938_s15 + $0x1660] sm:$0xff] }
 0x2cb   : > { %6574 = vmatpush1.bf16.msra.mxu0 %v10341_v28  ;;  %6738 = vmatpush1.bf16.msra.mxu1 %v10343_v29  ;;  %v1099_v28 = vld [vmem:[%s11938_s15 + $0x13a8] sm:$0xff] }
 0x2cc   : > { %6584 = vmatprep.subr.bf16.mxu0 %v10358_v30  ;;  %6748 = vmatprep.subr.bf16.mxu1 %v10360_v31  ;;  %v1107_v29 = vld [vmem:[%s11938_s15 + $0x13e8] sm:$0xff]  ;;  %v10453_v30 = vcombine.low %v1082_v15, %v1090_v16  ;;  %v10455_v31 = vcombine.low %v1083_v60, %v1091_v19  ;;  %v10550_v15 = vcombine.high %v1178_v8, %v1186_v9  ;;  %v1194_v60 = vld [vmem:[%s11938_s15 + $0x16a0] sm:$0xff] }
 0x2cd   : > { %v10472_v34 = vcombine.high %v1099_v28, %v1107_v29  ;;  %v1202_v19 = vld [vmem:[%s11938_s15 + $0x16e0] sm:$0xff] }
 0x2ce   : > { %6576 = vmatmul.mubr.bf16.vlgmr.msra.gmra.mrb[8].mxu0 %v12139_v42  ;;  %6740 = vmatmul.mubr.bf16.vlgmr.msra.gmra.mrb[8].mxu1 %v12139_v42 }
 0x2cf   : > { %6585 = vmatpush1.bf16.msra.mxu0 %v10357_v37  ;;  %6749 = vmatpush1.bf16.msra.mxu1 %v10359_v38  ;;  %v1115_v37 = vld [vmem:[%s11938_s15 + $0x1428] sm:$0xff] }
 0x2d0   : > { %6586 = vmatprep.subr.bf16.mxu0 %v10374_v39  ;;  %6750 = vmatprep.subr.bf16.mxu1 %v10376_v40  ;;  %v1123_v38 = vld [vmem:[%s11938_s15 + $0x1468] sm:$0xff]  ;;  %v10469_v39 = vcombine.low %v1098_v25, %v1106_v27  ;;  %v10471_v40 = vcombine.low %v1099_v28, %v1107_v29  ;;  %v10566_v25 = vcombine.high %v1194_v60, %v1202_v19  ;;  %v1210_v28 = vld [vmem:[%s11938_s15 + $0x1720] sm:$0xff] }
 0x2d1   : > { %6616 = vmatprep.mubr.bf16.mxu0 %v12145_v52  ;;  %6780 = vmatprep.mubr.bf16.mxu1 %v12145_v52  ;;  %v10488_v43 = vcombine.high %v1115_v37, %v1123_v38  ;;  %v1218_v29 = vld [vmem:[%s11938_s15 + $0x1760] sm:$0xff] }
 0x2d3   : > { %6587 = vmatpush1.bf16.msra.mxu0 %v10373_v47  ;;  %6751 = vmatpush1.bf16.msra.mxu1 %v10375_v48  ;;  %v1131_v47 = vld [vmem:[%s11938_s15 + $0x14a8] sm:$0xff] }
 0x2d4   : > { %6588 = vmatprep.subr.bf16.mxu0 %v10390_v49  ;;  %6752 = vmatprep.subr.bf16.mxu1 %v10392_v50  ;;  %v1139_v48 = vld [vmem:[%s11938_s15 + $0x14e8] sm:$0xff]  ;;  %v10485_v49 = vcombine.low %v1114_v0, %v1122_v36  ;;  %v10487_v50 = vcombine.low %v1115_v37, %v1123_v38  ;;  %v10582_v0 = vcombine.high %v1210_v28, %v1218_v29  ;;  %v1226_v37 = vld [vmem:[%s11938_s15 + $0x17a0] sm:$0xff] }
 0x2d5   : > { %v10504_v17 = vcombine.high %v1131_v47, %v1139_v48  ;;  %v1234_v38 = vld [vmem:[%s11938_s15 + $0x17e0] sm:$0xff] }
 0x2d7   : > { %6589 = vmatpush1.bf16.msra.mxu0 %v10389_v56  ;;  %6753 = vmatpush1.bf16.msra.mxu1 %v10391_v57  ;;  %v1147_v56 = vld [vmem:[%s11938_s15 + $0x1528] sm:$0xff] }
 0x2d8   : > { %6590 = vmatprep.subr.bf16.mxu0 %v10406_v58  ;;  %6754 = vmatprep.subr.bf16.mxu1 %v10408_v59  ;;  %v1155_v57 = vld [vmem:[%s11938_s15 + $0x1568] sm:$0xff]  ;;  %v10501_v58 = vcombine.low %v1130_v44, %v1138_v46  ;;  %v10503_v59 = vcombine.low %v1131_v47, %v1139_v48  ;;  %v10598_v44 = vcombine.high %v1226_v37, %v1234_v38  ;;  %v1242_v47 = vld [vmem:[%s11938_s15 + $0x1820] sm:$0xff] }
 0x2d9   : > { %v10520_v62 = vcombine.high %v1147_v56, %v1155_v57  ;;  %v1250_v48 = vld [vmem:[%s11938_s15 + $0x1860] sm:$0xff] }
 0x2db   : > { %6591 = vmatpush1.bf16.msra.mxu0 %v10405_v3  ;;  %6755 = vmatpush1.bf16.msra.mxu1 %v10407_v4  ;;  %v1163_v3 = vld [vmem:[%s11938_s15 + $0x15a8] sm:$0xff] }
 0x2dc   : > { %6592 = vmatprep.subr.bf16.mxu0 %v10422_v5  ;;  %6756 = vmatprep.subr.bf16.mxu1 %v10424_v6  ;;  %v1171_v4 = vld [vmem:[%s11938_s15 + $0x15e8] sm:$0xff]  ;;  %v10517_v5 = vcombine.low %v1146_v53, %v1154_v55  ;;  %v10519_v6 = vcombine.low %v1147_v56, %v1155_v57  ;;  %v10614_v53 = vcombine.high %v1242_v47, %v1250_v48  ;;  %v1258_v56 = vld [vmem:[%s11938_s15 + $0x18a0] sm:$0xff] }
 0x2dd   : > { %v10536_v24 = vcombine.high %v1163_v3, %v1171_v4  ;;  %v1266_v57 = vld [vmem:[%s11938_s15 + $0x18e0] sm:$0xff] }
 0x2df   : > { %6593 = vmatpush1.bf16.msra.mxu0 %v10421_v11  ;;  %6757 = vmatpush1.bf16.msra.mxu1 %v10423_v32  ;;  %v1179_v11 = vld [vmem:[%s11938_s15 + $0x1628] sm:$0xff] }
 0x2e0   : > { %6594 = vmatprep.subr.bf16.mxu0 %v10438_v12  ;;  %6758 = vmatprep.subr.bf16.mxu1 %v10440_v14  ;;  %v1187_v32 = vld [vmem:[%s11938_s15 + $0x1668] sm:$0xff]  ;;  %v10533_v12 = vcombine.low %v1162_v63, %v1170_v2  ;;  %v10535_v14 = vcombine.low %v1163_v3, %v1171_v4  ;;  %v10630_v63 = vcombine.high %v1258_v56, %v1266_v57  ;;  %v1274_v3 = vld [vmem:[%s11938_s15 + $0x1920] sm:$0xff] }
 0x2e1   : > { %v10552_v16 = vcombine.high %v1179_v11, %v1187_v32  ;;  %v1282_v4 = vld [vmem:[%s11938_s15 + $0x1960] sm:$0xff] }
 0x2e3   : > { %6595 = vmatpush1.bf16.msra.mxu0 %v10437_v20  ;;  %6759 = vmatpush1.bf16.msra.mxu1 %v10439_v21  ;;  %v1195_v20 = vld [vmem:[%s11938_s15 + $0x16a8] sm:$0xff] }
 0x2e4   : > { %6596 = vmatprep.subr.bf16.mxu0 %v10454_v22  ;;  %6760 = vmatprep.subr.bf16.mxu1 %v10456_v23  ;;  %v1203_v21 = vld [vmem:[%s11938_s15 + $0x16e8] sm:$0xff]  ;;  %v10549_v22 = vcombine.low %v1178_v8, %v1186_v9  ;;  %v10551_v23 = vcombine.low %v1179_v11, %v1187_v32  ;;  %v10646_v8 = vcombine.high %v1274_v3, %v1282_v4  ;;  %v1290_v11 = vld [vmem:[%s11938_s15 + $0x19a0] sm:$0xff] }
 0x2e5   : > { %v10568_v27 = vcombine.high %v1195_v20, %v1203_v21  ;;  %v1298_v32 = vld [vmem:[%s11938_s15 + $0x19e0] sm:$0xff] }
 0x2e7   : > { %6597 = vmatpush1.bf16.msra.mxu0 %v10453_v30  ;;  %6761 = vmatpush1.bf16.msra.mxu1 %v10455_v31  ;;  %v1211_v30 = vld [vmem:[%s11938_s15 + $0x1728] sm:$0xff] }
 0x2e8   : > { %6598 = vmatprep.subr.bf16.mxu0 %v10470_v33  ;;  %6762 = vmatprep.subr.bf16.mxu1 %v10472_v34  ;;  %v1219_v31 = vld [vmem:[%s11938_s15 + $0x1768] sm:$0xff]  ;;  %v10565_v33 = vcombine.low %v1194_v60, %v1202_v19  ;;  %v10567_v34 = vcombine.low %v1195_v20, %v1203_v21  ;;  %v10662_v60 = vcombine.high %v1290_v11, %v1298_v32  ;;  %v1306_v20 = vld [vmem:[%s11938_s15 + $0x1a20] sm:$0xff] }
 0x2e9   : > { %v10584_v36 = vcombine.high %v1211_v30, %v1219_v31  ;;  %v1314_v21 = vld [vmem:[%s11938_s15 + $0x1a60] sm:$0xff] }
 0x2eb   : > { %6599 = vmatpush1.bf16.msra.mxu0 %v10469_v39  ;;  %6763 = vmatpush1.bf16.msra.mxu1 %v10471_v40  ;;  %v1227_v39 = vld [vmem:[%s11938_s15 + $0x17a8] sm:$0xff] }
 0x2ec   : > { %6600 = vmatprep.subr.bf16.mxu0 %v10486_v41  ;;  %6764 = vmatprep.subr.bf16.mxu1 %v10488_v43  ;;  %v1235_v40 = vld [vmem:[%s11938_s15 + $0x17e8] sm:$0xff]  ;;  %v10581_v41 = vcombine.low %v1210_v28, %v1218_v29  ;;  %v10583_v43 = vcombine.low %v1211_v30, %v1219_v31  ;;  %v10678_v28 = vcombine.high %v1306_v20, %v1314_v21  ;;  %v1322_v30 = vld [vmem:[%s11938_s15 + $0x1aa0] sm:$0xff] }
 0x2ed   : > { %v10600_v46 = vcombine.high %v1227_v39, %v1235_v40  ;;  %v1330_v31 = vld [vmem:[%s11938_s15 + $0x1ae0] sm:$0xff] }
 0x2ef   : > { %6601 = vmatpush1.bf16.msra.mxu0 %v10485_v49  ;;  %6765 = vmatpush1.bf16.msra.mxu1 %v10487_v50  ;;  %v1243_v49 = vld [vmem:[%s11938_s15 + $0x1828] sm:$0xff] }
 0x2f0   : > { %6602 = vmatprep.subr.bf16.mxu0 %v10502_v51  ;;  %6766 = vmatprep.subr.bf16.mxu1 %v10504_v17  ;;  %v1251_v50 = vld [vmem:[%s11938_s15 + $0x1868] sm:$0xff]  ;;  %v10597_v51 = vcombine.low %v1226_v37, %v1234_v38  ;;  %v10599_v17 = vcombine.low %v1227_v39, %v1235_v40  ;;  %v10694_v37 = vcombine.high %v1322_v30, %v1330_v31  ;;  %v1338_v39 = vld [vmem:[%s11938_s15 + $0x1b20] sm:$0xff] }
 0x2f1   : > { %v10616_v55 = vcombine.high %v1243_v49, %v1251_v50  ;;  %v1346_v40 = vld [vmem:[%s11938_s15 + $0x1b60] sm:$0xff] }
 0x2f3   : > { %6603 = vmatpush1.bf16.msra.mxu0 %v10501_v58  ;;  %6767 = vmatpush1.bf16.msra.mxu1 %v10503_v59  ;;  %v1259_v58 = vld [vmem:[%s11938_s15 + $0x18a8] sm:$0xff] }
 0x2f4   : > { %6604 = vmatprep.subr.bf16.mxu0 %v10518_v61  ;;  %6768 = vmatprep.subr.bf16.mxu1 %v10520_v62  ;;  %v1267_v59 = vld [vmem:[%s11938_s15 + $0x18e8] sm:$0xff]  ;;  %v10613_v61 = vcombine.low %v1242_v47, %v1250_v48  ;;  %v10615_v62 = vcombine.low %v1243_v49, %v1251_v50  ;;  %v10710_v47 = vcombine.high %v1338_v39, %v1346_v40  ;;  %v1354_v50 = vld [vmem:[%s11938_s15 + $0x1ba0] sm:$0xff] }
 0x2f5   : > { %v10632_v2 = vcombine.high %v1259_v58, %v1267_v59 }
 0x2f7   : > { %6605 = vmatpush1.bf16.msra.mxu0 %v10517_v5  ;;  %6769 = vmatpush1.bf16.msra.mxu1 %v10519_v6  ;;  %v1275_v5 = vld [vmem:[%s11938_s15 + $0x1928] sm:$0xff] }
 0x2f8   : > { %6606 = vmatprep.subr.bf16.mxu0 %v10534_v7  ;;  %6770 = vmatprep.subr.bf16.mxu1 %v10536_v24  ;;  %v1283_v6 = vld [vmem:[%s11938_s15 + $0x1968] sm:$0xff]  ;;  %v10629_v7 = vcombine.low %v1258_v56, %v1266_v57  ;;  %v10631_v24 = vcombine.low %v1259_v58, %v1267_v59 }
 0x2f9   : > { %v10648_v9 = vcombine.high %v1275_v5, %v1283_v6  ;;  %v1363_v56 = vld [vmem:[%s11938_s15 + $0x1be8] sm:$0xff] }
 0x2fb   : > { %6607 = vmatpush1.bf16.msra.mxu0 %v10533_v12  ;;  %6771 = vmatpush1.bf16.msra.mxu1 %v10535_v14  ;;  %v1291_v12 = vld [vmem:[%s11938_s15 + $0x19a8] sm:$0xff] }
 0x2fc   : > { %6608 = vmatprep.subr.bf16.mxu0 %v10550_v15  ;;  %6772 = vmatprep.subr.bf16.mxu1 %v10552_v16  ;;  %v1299_v14 = vld [vmem:[%s11938_s15 + $0x19e8] sm:$0xff]  ;;  %v10645_v15 = vcombine.low %v1274_v3, %v1282_v4  ;;  %v10647_v16 = vcombine.low %v1275_v5, %v1283_v6 }
 0x2fd   : > { %v10664_v19 = vcombine.high %v1291_v12, %v1299_v14 }
 0x2ff   : > { %6609 = vmatpush1.bf16.msra.mxu0 %v10549_v22  ;;  %6773 = vmatpush1.bf16.msra.mxu1 %v10551_v23  ;;  %v1307_v22 = vld [vmem:[%s11938_s15 + $0x1a28] sm:$0xff] }
 0x300   : > { %6610 = vmatprep.subr.bf16.mxu0 %v10566_v25  ;;  %6774 = vmatprep.subr.bf16.mxu1 %v10568_v27  ;;  %v1315_v23 = vld [vmem:[%s11938_s15 + $0x1a68] sm:$0xff]  ;;  %v10661_v25 = vcombine.low %v1290_v11, %v1298_v32  ;;  %v10663_v27 = vcombine.low %v1291_v12, %v1299_v14  ;;  %v477_v11 = vld [vmem:[%s11938_s15 + $0x38] sm:$0xff] }
 0x301   : > { %v10680_v29 = vcombine.high %v1307_v22, %v1315_v23  ;;  %v485_v32 = vld [vmem:[%s11938_s15 + $0x78] sm:$0xff]  ;;  %v416_v12 = vld [vmem:[#allocation2 + $0x8] sm:$0xff] }
 0x303   : > { %6611 = vmatpush1.bf16.msra.mxu0 %v10565_v33  ;;  %6775 = vmatpush1.bf16.msra.mxu1 %v10567_v34  ;;  %v1323_v33 = vld [vmem:[%s11938_s15 + $0x1aa8] sm:$0xff] }
 0x304   : > { %6612 = vmatprep.subr.bf16.mxu0 %v10582_v0  ;;  %6776 = vmatprep.subr.bf16.mxu1 %v10584_v36  ;;  %v1331_v34 = vld [vmem:[%s11938_s15 + $0x1ae8] sm:$0xff]  ;;  %v10677_v0 = vcombine.low %v1306_v20, %v1314_v21  ;;  %v10679_v36 = vcombine.low %v1307_v22, %v1315_v23  ;;  %v492_v20 = vld [vmem:[%s11938_s15 + $0xb0] sm:$0xff]  ;;  %v493_v23 = vld [vmem:[%s11938_s15 + $0xb8] sm:$0xff] }
 0x305   : > { %v10696_v38 = vcombine.high %v1323_v33, %v1331_v34  ;;  %v500_v21 = vld [vmem:[%s11938_s15 + $0xf0] sm:$0xff] }
 0x307   : > { %6613 = vmatpush1.bf16.msra.mxu0 %v10581_v41  ;;  %6777 = vmatpush1.bf16.msra.mxu1 %v10583_v43  ;;  %v1339_v41 = vld [vmem:[%s11938_s15 + $0x1b28] sm:$0xff] }
 0x308   : > { %6614 = vmatprep.subr.bf16.mxu0 %v10598_v44  ;;  %6778 = vmatprep.subr.bf16.mxu1 %v10600_v46  ;;  %v1347_v43 = vld [vmem:[%s11938_s15 + $0x1b68] sm:$0xff]  ;;  %v10693_v44 = vcombine.low %v1322_v30, %v1330_v31  ;;  %v10695_v46 = vcombine.low %v1323_v33, %v1331_v34  ;;  %v508_v31 = vld [vmem:[%s11938_s15 + $0x130] sm:$0xff]  ;;  %v509_v34 = vld [vmem:[%s11938_s15 + $0x138] sm:$0xff] }
 0x309   : > { %v10712_v49 = vcombine.high %v1339_v41, %v1347_v43  ;;  %v10711_v3 = vcombine.low %v1339_v41, %v1347_v43  ;;  %v516_v33 = vld [vmem:[%s11938_s15 + $0x170] sm:$0xff]  ;;  %v525_v43 = vld [vmem:[%s11938_s15 + $0x1b8] sm:$0xff] }
 0x30a   : > { %v532_v41 = vld [vmem:[%s11938_s15 + $0x1f0] sm:$0xff] }
 0x30b   : > { %6615 = vmatpush1.bf16.msra.mxu0 %v10597_v51  ;;  %6779 = vmatpush1.bf16.msra.mxu1 %v10599_v17  ;;  %v1362_v51 = vld [vmem:[%s11938_s15 + $0x1be0] sm:$0xff] }
 0x30c   : > { %6625 = vmatprep.subr.bf16.mxu0 %v10614_v53  ;;  %6789 = vmatprep.subr.bf16.mxu1 %v10616_v55  ;;  %v1355_v55 = vld [vmem:[%s11938_s15 + $0x1ba8] sm:$0xff]  ;;  %v10726_v4 = vcombine.high %v1354_v50, %v1362_v51  ;;  %v10725_v14 = vcombine.low %v1354_v50, %v1362_v51  ;;  %v540_v50 = vld [vmem:[%s11938_s15 + $0x230] sm:$0xff] }
 0x30d   : > { %v548_v51 = vld [vmem:[%s11938_s15 + $0x270] sm:$0xff] }
 0x30e   : > { %6617 = vmatmul.mubr.bf16.vlgmr.msra.gmra.mrb[8].mxu0 %v12213_v1  ;;  %6781 = vmatmul.mubr.bf16.vlgmr.msra.gmra.mrb[8].mxu1 %v12213_v1 }
 0x30f   : > { %6626 = vmatpush1.bf16.msra.mxu0 %v10613_v61  ;;  %6790 = vmatpush1.bf16.msra.mxu1 %v10615_v62  ;;  %v10709_v61 = vcombine.low %v1338_v39, %v1346_v40  ;;  %v524_v40 = vld [vmem:[%s11938_s15 + $0x1b0] sm:$0xff] }
 0x310   : > { %6627 = vmatprep.subr.bf16.mxu0 %v10630_v63  ;;  %6791 = vmatprep.subr.bf16.mxu1 %v10632_v2 }
 0x311   : > { %6657 = vmatprep.mubr.bf16.mxu0 %v11717_v18  ;;  %6821 = vmatprep.mubr.bf16.mxu1 %v11717_v18 }
 0x313   : > { %6628 = vmatpush1.bf16.msra.mxu0 %v10629_v7  ;;  %6792 = vmatpush1.bf16.msra.mxu1 %v10631_v24  ;;  %v10728_v7 = vcombine.high %v1355_v55, %v1363_v56  ;;  %v476_v24 = vld [vmem:[%s11938_s15 + $0x30] sm:$0xff] }
 0x314   : > { %6629 = vmatprep.subr.bf16.mxu0 %v10646_v8  ;;  %6793 = vmatprep.subr.bf16.mxu1 %v10648_v9  ;;  %v484_v8 = vld [vmem:[%s11938_s15 + $0x70] sm:$0xff] }
 0x317   : > { %6630 = vmatpush1.bf16.msra.mxu0 %v10645_v15  ;;  %6794 = vmatpush1.bf16.msra.mxu1 %v10647_v16  ;;  %v10727_v16 = vcombine.low %v1355_v55, %v1363_v56  ;;  %v9897_v55 = vcombine.low %v524_v40, %v532_v41  ;;  %v9914_v56 = vcombine.high %v540_v50, %v548_v51 }
 0x318   : > { %6631 = vmatprep.subr.bf16.mxu0 %v10662_v60  ;;  %6795 = vmatprep.subr.bf16.mxu1 %v10664_v19  ;;  %v9850_v60 = vcombine.high %v476_v24, %v484_v8  ;;  %v9852_v19 = vcombine.high %v477_v11, %v485_v32 }
 0x31b   : > { %6632 = vmatpush1.bf16.msra.mxu0 %v10661_v25  ;;  %6796 = vmatpush1.bf16.msra.mxu1 %v10663_v27  ;;  %v501_v25 = vld [vmem:[%s11938_s15 + $0xf8] sm:$0xff]  ;;  %v9849_v27 = vcombine.low %v476_v24, %v484_v8 }
 0x31c   : > { %6633 = vmatprep.subr.bf16.mxu0 %v10678_v28  ;;  %6797 = vmatprep.subr.bf16.mxu1 %v10680_v29  ;;  %v9851_v28 = vcombine.low %v477_v11, %v485_v32  ;;  %v9866_v29 = vcombine.high %v492_v20, %v500_v21  ;;  %v9868_v30 = vcombine.high %v493_v23, %v501_v25  ;;  %v581_v24 = vld [vmem:[%s11938_s15 + $0x378] sm:$0xff] }
 0x31f   : > { %6634 = vmatpush1.bf16.msra.mxu0 %v10677_v0  ;;  %6798 = vmatpush1.bf16.msra.mxu1 %v10679_v36  ;;  %v517_v0 = vld [vmem:[%s11938_s15 + $0x178] sm:$0xff]  ;;  %v9865_v36 = vcombine.low %v492_v20, %v500_v21 }
 0x320   : > { %6635 = vmatprep.subr.bf16.mxu0 %v10694_v37  ;;  %6799 = vmatprep.subr.bf16.mxu1 %v10696_v38  ;;  %v9867_v37 = vcombine.low %v493_v23, %v501_v25  ;;  %v9882_v38 = vcombine.high %v508_v31, %v516_v33  ;;  %v9884_v39 = vcombine.high %v509_v34, %v517_v0  ;;  %v612_v23 = vld [vmem:[%s11938_s15 + $0x470] sm:$0xff]  ;;  %v605_v25 = vld [vmem:[%s11938_s15 + $0x438] sm:$0xff] }
 0x321   : > { %v6331_v48 = vpop.f32.mrb[4].mxu0  ;;  %v6495_v17 = vpop.f32.mrb[4].mxu1 }
 0x322   : > { %v6333_v53 = vpop.f32.mrb[5].mxu0  ;;  %v6497_v58 = vpop.f32.mrb[5].mxu1 }
 0x323   : > { %v7191_v57 = vcombine.low %v6331_v48, %v6333_v53  ;;  %v6335_v59 = vpop.f32.mrb[6].mxu0  ;;  %6636 = vmatpush1.bf16.msra.mxu0 %v10693_v44  ;;  %v7192_v62 = vcombine.low %v6495_v17, %v6497_v58  ;;  %v6499_v63 = vpop.f32.mrb[6].mxu1  ;;  %6800 = vmatpush1.bf16.msra.mxu1 %v10695_v46  ;;  %v533_v44 = vld [vmem:[%s11938_s15 + $0x1f8] sm:$0xff]  ;;  %v9881_v46 = vcombine.low %v508_v31, %v516_v33  ;;  %v556_v58 = vld [vmem:[%s11938_s15 + $0x2b0] sm:$0xff] }
 0x324   : > { %v6336_v2 = vpop.f32.mrb[7].mxu0  ;;  %6637 = vmatprep.subr.bf16.mxu0 %v10710_v47  ;;  %v6500_v6 = vpop.f32.mrb[7].mxu1  ;;  %6801 = vmatprep.subr.bf16.mxu1 %v10712_v49  ;;  %v9883_v47 = vcombine.low %v509_v34, %v517_v0  ;;  %v9898_v48 = vcombine.high %v524_v40, %v532_v41  ;;  %v9900_v49 = vcombine.high %v525_v43, %v533_v44  ;;  %v541_v17 = vld [vmem:[%s11938_s15 + $0x238] sm:$0xff]  ;;  %v564_v59 = vld [vmem:[%s11938_s15 + $0x2f0] sm:$0xff] }
 0x325   : > { %v7199_v5 = vrot.slane %v7191_v57, %v11988_v54  ;;  %v7206_v9 = vrot.slane %v7192_v62, %v11988_v54  ;;  %v549_v53 = vld [vmem:[%s11938_s15 + $0x278] sm:$0xff]  ;;  %v9913_v63 = vcombine.low %v540_v50, %v548_v51  ;;  %v580_v6 = vld [vmem:[%s11938_s15 + $0x370] sm:$0xff]  ;;  %v9929_v8 = vcombine.low %v556_v58, %v564_v59 }
 0x326   : > { %v9916_v57 = vcombine.high %v541_v17, %v549_v53  ;;  %v565_v62 = vld [vmem:[%s11938_s15 + $0x2f8] sm:$0xff]  ;;  %v9915_v2 = vcombine.low %v541_v17, %v549_v53  ;;  %v620_v33 = vld [vmem:[%s11938_s15 + $0x4b0] sm:$0xff] }
 0x327   : > { %6638 = vmatpush1.bf16.msra.mxu0 %v10709_v61  ;;  %v7207_v15 = vcombine.low %v7199_v5, %v7206_v9  ;;  %6802 = vmatpush1.bf16.msra.mxu1 %v10711_v3  ;;  %v557_v61 = vld [vmem:[%s11938_s15 + $0x2b8] sm:$0xff]  ;;  %v9930_v3 = vcombine.high %v556_v58, %v564_v59  ;;  %v572_v5 = vld [vmem:[%s11938_s15 + $0x330] sm:$0xff] }
 0x328   : > { %6639 = vmatprep.subr.bf16.mxu0 %v10726_v4  ;;  %6803 = vmatprep.subr.bf16.mxu1 %v10728_v7  ;;  %v9932_v4 = vcombine.high %v557_v61, %v565_v62  ;;  %v573_v7 = vld [vmem:[%s11938_s15 + $0x338] sm:$0xff]  ;;  %v9931_v9 = vcombine.low %v557_v61, %v565_v62  ;;  %v9946_v11 = vcombine.high %v572_v5, %v580_v6  ;;  %v628_v34 = vld [vmem:[%s11938_s15 + $0x4f0] sm:$0xff] }
 0x329   : > { %v7247_v22 = vadd.f32 %v7207_v15, %v416_v12  ;;  %v9948_v32 = vcombine.high %v573_v7, %v581_v24  ;;  %v588_v12 = vld [vmem:[%s11938_s15 + $0x3b0] sm:$0xff]  ;;  %v589_v15 = vld [vmem:[%s11938_s15 + $0x3b8] sm:$0xff] }
 0x32a   : > { %v621_v0 = vld [vmem:[%s11938_s15 + $0x4b8] sm:$0xff]  ;;  %v636_v41 = vld [vmem:[%s11938_s15 + $0x530] sm:$0xff] }
 0x32b   : > { %6640 = vmatpush1.bf16.msra.mxu0 %v10725_v14  ;;  %7251 = vst [vmem:[#allocation2 + $0x8] sm:$0xff] %v7247_v22  ;;  %6804 = vmatpush1.bf16.msra.mxu1 %v10727_v16  ;;  %v596_v14 = vld [vmem:[%s11938_s15 + $0x3f0] sm:$0xff]  ;;  %v597_v16 = vld [vmem:[%s11938_s15 + $0x3f8] sm:$0xff] }
 0x32c   : > { %6830 = vmatprep.subr.bf16.mxu0 %v9850_v60  ;;  %6994 = vmatprep.subr.bf16.mxu1 %v9852_v19  ;;  %v9945_v60 = vcombine.low %v572_v5, %v580_v6  ;;  %v9947_v19 = vcombine.low %v573_v7, %v581_v24  ;;  %v9962_v20 = vcombine.high %v588_v12, %v596_v14  ;;  %v604_v22 = vld [vmem:[%s11938_s15 + $0x430] sm:$0xff]  ;;  %v653_v53 = vld [vmem:[%s11938_s15 + $0x5b8] sm:$0xff] }
 0x32d   : > { %v9964_v21 = vcombine.high %v589_v15, %v597_v16  ;;  %v652_v51 = vld [vmem:[%s11938_s15 + $0x5b0] sm:$0xff]  ;;  %v669_v62 = vld [vmem:[%s11938_s15 + $0x638] sm:$0xff] }
 0x32e   : > { %6658 = vmatmul.mubr.bf16.vlgmr.msra.gmra.mrb[8].mxu0 %v12254_v13  ;;  %6822 = vmatmul.mubr.bf16.vlgmr.msra.gmra.mrb[8].mxu1 %v12254_v13  ;;  %v660_v17 = vld [vmem:[%s11938_s15 + $0x5f0] sm:$0xff]  ;;  %v685_v24 = vld [vmem:[%s11938_s15 + $0x6b8] sm:$0xff] }
 0x32f   : > { %6831 = vmatpush1.bf16.msra.mxu0 %v9849_v27  ;;  %6995 = vmatpush1.bf16.msra.mxu1 %v9851_v28  ;;  %v613_v27 = vld [vmem:[%s11938_s15 + $0x478] sm:$0xff]  ;;  %v9961_v28 = vcombine.low %v588_v12, %v596_v14  ;;  %v668_v59 = vld [vmem:[%s11938_s15 + $0x630] sm:$0xff] }
 0x330   : > { %6832 = vmatprep.subr.bf16.mxu0 %v9866_v29  ;;  %6996 = vmatprep.subr.bf16.mxu1 %v9868_v30  ;;  %v9963_v29 = vcombine.low %v589_v15, %v597_v16  ;;  %v9978_v30 = vcombine.high %v604_v22, %v612_v23  ;;  %v9980_v31 = vcombine.high %v605_v25, %v613_v27  ;;  %v676_v61 = vld [vmem:[%s11938_s15 + $0x670] sm:$0xff]  ;;  %v701_v16 = vld [vmem:[%s11938_s15 + $0x738] sm:$0xff] }
 0x331   : > { %6862 = vmatprep.mubr.bf16.mxu0 %v12007_v10  ;;  %7026 = vmatprep.mubr.bf16.mxu1 %v12007_v10  ;;  %v9899_v10 = vcombine.low %v525_v43, %v533_v44  ;;  %v644_v43 = vld [vmem:[%s11938_s15 + $0x570] sm:$0xff]  ;;  %v637_v44 = vld [vmem:[%s11938_s15 + $0x538] sm:$0xff] }
 0x332   : > { %v684_v6 = vld [vmem:[%s11938_s15 + $0x6b0] sm:$0xff] }
 0x333   : > { %6833 = vmatpush1.bf16.msra.mxu0 %v9865_v36  ;;  %6997 = vmatpush1.bf16.msra.mxu1 %v9867_v37  ;;  %v629_v36 = vld [vmem:[%s11938_s15 + $0x4f8] sm:$0xff]  ;;  %v9977_v37 = vcombine.low %v604_v22, %v612_v23  ;;  %v692_v7 = vld [vmem:[%s11938_s15 + $0x6f0] sm:$0xff] }
 0x334   : > { %6834 = vmatprep.subr.bf16.mxu0 %v9882_v38  ;;  %6998 = vmatprep.subr.bf16.mxu1 %v9884_v39  ;;  %v9979_v38 = vcombine.low %v605_v25, %v613_v27  ;;  %v9994_v39 = vcombine.high %v620_v33, %v628_v34  ;;  %v9996_v40 = vcombine.high %v621_v0, %v629_v36  ;;  %v700_v14 = vld [vmem:[%s11938_s15 + $0x730] sm:$0xff]  ;;  %v717_v27 = vld [vmem:[%s11938_s15 + $0x7b8] sm:$0xff] }
 0x335   : > { %v708_v15 = vld [vmem:[%s11938_s15 + $0x770] sm:$0xff] }
 0x336   : > { %v716_v23 = vld [vmem:[%s11938_s15 + $0x7b0] sm:$0xff] }
 0x337   : > { %6835 = vmatpush1.bf16.msra.mxu0 %v9881_v46  ;;  %6999 = vmatpush1.bf16.msra.mxu1 %v9883_v47  ;;  %v645_v46 = vld [vmem:[%s11938_s15 + $0x578] sm:$0xff]  ;;  %v9993_v47 = vcombine.low %v620_v33, %v628_v34  ;;  %v724_v25 = vld [vmem:[%s11938_s15 + $0x7f0] sm:$0xff] }
 0x338   : > { %6836 = vmatprep.subr.bf16.mxu0 %v9898_v48  ;;  %7000 = vmatprep.subr.bf16.mxu1 %v9900_v49  ;;  %v9995_v48 = vcombine.low %v621_v0, %v629_v36  ;;  %v10010_v49 = vcombine.high %v636_v41, %v644_v43  ;;  %v10012_v50 = vcombine.high %v637_v44, %v645_v46  ;;  %v732_v34 = vld [vmem:[%s11938_s15 + $0x830] sm:$0xff]  ;;  %v733_v36 = vld [vmem:[%s11938_s15 + $0x838] sm:$0xff] }
 0x339   : > { %v740_v0 = vld [vmem:[%s11938_s15 + $0x870] sm:$0xff] }
 0x33b   : > { %6837 = vmatpush1.bf16.msra.mxu0 %v9897_v55  ;;  %7001 = vmatpush1.bf16.msra.mxu1 %v9899_v10  ;;  %v661_v55 = vld [vmem:[%s11938_s15 + $0x5f8] sm:$0xff]  ;;  %v10009_v10 = vcombine.low %v636_v41, %v644_v43  ;;  %v748_v43 = vld [vmem:[%s11938_s15 + $0x8b0] sm:$0xff] }
 0x33c   : > { %6838 = vmatprep.subr.bf16.mxu0 %v9914_v56  ;;  %7002 = vmatprep.subr.bf16.mxu1 %v9916_v57  ;;  %v10011_v56 = vcombine.low %v637_v44, %v645_v46  ;;  %v10026_v57 = vcombine.high %v652_v51, %v660_v17  ;;  %v10028_v58 = vcombine.high %v653_v53, %v661_v55  ;;  %v756_v44 = vld [vmem:[%s11938_s15 + $0x8f0] sm:$0xff]  ;;  %v749_v46 = vld [vmem:[%s11938_s15 + $0x8b8] sm:$0xff] }
 0x33f   : > { %6839 = vmatpush1.bf16.msra.mxu0 %v9913_v63  ;;  %7003 = vmatpush1.bf16.msra.mxu1 %v9915_v2  ;;  %v677_v63 = vld [vmem:[%s11938_s15 + $0x678] sm:$0xff]  ;;  %v10025_v2 = vcombine.low %v652_v51, %v660_v17  ;;  %v764_v17 = vld [vmem:[%s11938_s15 + $0x930] sm:$0xff] }
 0x340   : > { %6840 = vmatprep.subr.bf16.mxu0 %v9930_v3  ;;  %7004 = vmatprep.subr.bf16.mxu1 %v9932_v4  ;;  %v10027_v3 = vcombine.low %v653_v53, %v661_v55  ;;  %v10042_v4 = vcombine.high %v668_v59, %v676_v61  ;;  %v10044_v5 = vcombine.high %v669_v62, %v677_v63  ;;  %v772_v53 = vld [vmem:[%s11938_s15 + $0x970] sm:$0xff]  ;;  %v765_v55 = vld [vmem:[%s11938_s15 + $0x938] sm:$0xff] }
 0x343   : > { %6841 = vmatpush1.bf16.msra.mxu0 %v9929_v8  ;;  %7005 = vmatpush1.bf16.msra.mxu1 %v9931_v9  ;;  %v693_v8 = vld [vmem:[%s11938_s15 + $0x6f8] sm:$0xff]  ;;  %v10041_v9 = vcombine.low %v668_v59, %v676_v61  ;;  %v780_v61 = vld [vmem:[%s11938_s15 + $0x9b0] sm:$0xff] }
 0x344   : > { %6842 = vmatprep.subr.bf16.mxu0 %v9946_v11  ;;  %7006 = vmatprep.subr.bf16.mxu1 %v9948_v32  ;;  %v10043_v11 = vcombine.low %v669_v62, %v677_v63  ;;  %v10058_v32 = vcombine.high %v684_v6, %v692_v7  ;;  %v10060_v12 = vcombine.high %v685_v24, %v693_v8  ;;  %v788_v62 = vld [vmem:[%s11938_s15 + $0x9f0] sm:$0xff]  ;;  %v781_v63 = vld [vmem:[%s11938_s15 + $0x9b8] sm:$0xff] }
 0x347   : > { %6843 = vmatpush1.bf16.msra.mxu0 %v9945_v60  ;;  %7007 = vmatpush1.bf16.msra.mxu1 %v9947_v19  ;;  %v709_v60 = vld [vmem:[%s11938_s15 + $0x778] sm:$0xff]  ;;  %v10057_v19 = vcombine.low %v684_v6, %v692_v7  ;;  %v796_v6 = vld [vmem:[%s11938_s15 + $0xa30] sm:$0xff] }
 0x348   : > { %6844 = vmatprep.subr.bf16.mxu0 %v9962_v20  ;;  %7008 = vmatprep.subr.bf16.mxu1 %v9964_v21  ;;  %v10059_v20 = vcombine.low %v685_v24, %v693_v8  ;;  %v10074_v21 = vcombine.high %v700_v14, %v708_v15  ;;  %v10076_v22 = vcombine.high %v701_v16, %v709_v60  ;;  %v804_v7 = vld [vmem:[%s11938_s15 + $0xa70] sm:$0xff]  ;;  %v797_v24 = vld [vmem:[%s11938_s15 + $0xa38] sm:$0xff] }
 0x349   : > { %v805_v8 = vld [vmem:[%s11938_s15 + $0xa78] sm:$0xff] }
 0x34b   : > { %6845 = vmatpush1.bf16.msra.mxu0 %v9961_v28  ;;  %7009 = vmatpush1.bf16.msra.mxu1 %v9963_v29  ;;  %v725_v28 = vld [vmem:[%s11938_s15 + $0x7f8] sm:$0xff]  ;;  %v10073_v29 = vcombine.low %v700_v14, %v708_v15  ;;  %v820_v14 = vld [vmem:[%s11938_s15 + $0xaf0] sm:$0xff] }
 0x34c   : > { %6846 = vmatprep.subr.bf16.mxu0 %v9978_v30  ;;  %7010 = vmatprep.subr.bf16.mxu1 %v9980_v31  ;;  %v10075_v30 = vcombine.low %v701_v16, %v709_v60  ;;  %v10090_v31 = vcombine.high %v716_v23, %v724_v25  ;;  %v10092_v33 = vcombine.high %v717_v27, %v725_v28  ;;  %v813_v15 = vld [vmem:[%s11938_s15 + $0xab8] sm:$0xff] }
 0x34d   : > { %v821_v16 = vld [vmem:[%s11938_s15 + $0xaf8] sm:$0xff]  ;;  %v10169_v60 = vcombine.low %v796_v6, %v804_v7 }
 0x34f   : > { %6847 = vmatpush1.bf16.msra.mxu0 %v9977_v37  ;;  %7011 = vmatpush1.bf16.msra.mxu1 %v9979_v38  ;;  %v741_v37 = vld [vmem:[%s11938_s15 + $0x878] sm:$0xff]  ;;  %v10089_v38 = vcombine.low %v716_v23, %v724_v25  ;;  %v836_v23 = vld [vmem:[%s11938_s15 + $0xb70] sm:$0xff] }
 0x350   : > { %6848 = vmatprep.subr.bf16.mxu0 %v9994_v39  ;;  %7012 = vmatprep.subr.bf16.mxu1 %v9996_v40  ;;  %v10091_v39 = vcombine.low %v717_v27, %v725_v28  ;;  %v10106_v40 = vcombine.high %v732_v34, %v740_v0  ;;  %v10108_v41 = vcombine.high %v733_v36, %v741_v37  ;;  %v829_v25 = vld [vmem:[%s11938_s15 + $0xb38] sm:$0xff] }
 0x351   : > { %v837_v27 = vld [vmem:[%s11938_s15 + $0xb78] sm:$0xff] }
 0x353   : > { %6849 = vmatpush1.bf16.msra.mxu0 %v9993_v47  ;;  %7013 = vmatpush1.bf16.msra.mxu1 %v9995_v48  ;;  %v757_v47 = vld [vmem:[%s11938_s15 + $0x8f8] sm:$0xff]  ;;  %v10105_v48 = vcombine.low %v732_v34, %v740_v0  ;;  %v852_v34 = vld [vmem:[%s11938_s15 + $0xbf0] sm:$0xff] }
 0x354   : > { %6850 = vmatprep.subr.bf16.mxu0 %v10010_v49  ;;  %7014 = vmatprep.subr.bf16.mxu1 %v10012_v50  ;;  %v10107_v49 = vcombine.low %v733_v36, %v741_v37  ;;  %v10122_v50 = vcombine.high %v748_v43, %v756_v44  ;;  %v10124_v51 = vcombine.high %v749_v46, %v757_v47  ;;  %v845_v0 = vld [vmem:[%s11938_s15 + $0xbb8] sm:$0xff] }
 0x355   : > { %v853_v36 = vld [vmem:[%s11938_s15 + $0xbf8] sm:$0xff] }
 0x357   : > { %6851 = vmatpush1.bf16.msra.mxu0 %v10009_v10  ;;  %7015 = vmatpush1.bf16.msra.mxu1 %v10011_v56  ;;  %v773_v10 = vld [vmem:[%s11938_s15 + $0x978] sm:$0xff]  ;;  %v10121_v56 = vcombine.low %v748_v43, %v756_v44  ;;  %v868_v43 = vld [vmem:[%s11938_s15 + $0xc70] sm:$0xff] }
 0x358   : > { %6852 = vmatprep.subr.bf16.mxu0 %v10026_v57  ;;  %7016 = vmatprep.subr.bf16.mxu1 %v10028_v58  ;;  %v10123_v57 = vcombine.low %v749_v46, %v757_v47  ;;  %v10138_v58 = vcombine.high %v764_v17, %v772_v53  ;;  %v10140_v59 = vcombine.high %v765_v55, %v773_v10  ;;  %v861_v44 = vld [vmem:[%s11938_s15 + $0xc38] sm:$0xff] }
 0x359   : > { %v869_v46 = vld [vmem:[%s11938_s15 + $0xc78] sm:$0xff] }
 0x35b   : > { %6853 = vmatpush1.bf16.msra.mxu0 %v10025_v2  ;;  %7017 = vmatpush1.bf16.msra.mxu1 %v10027_v3  ;;  %v789_v2 = vld [vmem:[%s11938_s15 + $0x9f8] sm:$0xff]  ;;  %v10139_v3 = vcombine.low %v765_v55, %v773_v10 }
 0x35c   : > { %6854 = vmatprep.subr.bf16.mxu0 %v10042_v4  ;;  %7018 = vmatprep.subr.bf16.mxu1 %v10044_v5  ;;  %v10154_v4 = vcombine.high %v780_v61, %v788_v62  ;;  %v10156_v5 = vcombine.high %v781_v63, %v789_v2  ;;  %v885_v55 = vld [vmem:[%s11938_s15 + $0xcf8] sm:$0xff] }
 0x35f   : > { %6855 = vmatpush1.bf16.msra.mxu0 %v10041_v9  ;;  %7019 = vmatpush1.bf16.msra.mxu1 %v10043_v11  ;;  %v10153_v9 = vcombine.low %v780_v61, %v788_v62  ;;  %v10170_v11 = vcombine.high %v796_v6, %v804_v7  ;;  %v900_v61 = vld [vmem:[%s11938_s15 + $0xd70] sm:$0xff]  ;;  %v893_v62 = vld [vmem:[%s11938_s15 + $0xd38] sm:$0xff] }
 0x360   : > { %6856 = vmatprep.subr.bf16.mxu0 %v10058_v32  ;;  %7020 = vmatprep.subr.bf16.mxu1 %v10060_v12  ;;  %v10172_v32 = vcombine.high %v797_v24, %v805_v8  ;;  %v812_v12 = vld [vmem:[%s11938_s15 + $0xab0] sm:$0xff]  ;;  %v909_v7 = vld [vmem:[%s11938_s15 + $0xdb8] sm:$0xff] }
 0x361   : > { %v10185_v28 = vcombine.low %v812_v12, %v820_v14  ;;  %v916_v6 = vld [vmem:[%s11938_s15 + $0xdf0] sm:$0xff] }
 0x363   : > { %6857 = vmatpush1.bf16.msra.mxu0 %v10057_v19  ;;  %7021 = vmatpush1.bf16.msra.mxu1 %v10059_v20  ;;  %v10171_v19 = vcombine.low %v797_v24, %v805_v8  ;;  %v10186_v20 = vcombine.high %v812_v12, %v820_v14  ;;  %v917_v24 = vld [vmem:[%s11938_s15 + $0xdf8] sm:$0xff]  ;;  %v932_v12 = vld [vmem:[%s11938_s15 + $0xe70] sm:$0xff] }
 0x364   : > { %6858 = vmatprep.subr.bf16.mxu0 %v10074_v21  ;;  %7022 = vmatprep.subr.bf16.mxu1 %v10076_v22  ;;  %v10188_v21 = vcombine.high %v813_v15, %v821_v16  ;;  %v828_v22 = vld [vmem:[%s11938_s15 + $0xb30] sm:$0xff]  ;;  %v925_v14 = vld [vmem:[%s11938_s15 + $0xe38] sm:$0xff] }
 0x365   : > { %v10201_v37 = vcombine.low %v828_v22, %v836_v23 }
 0x367   : > { %6859 = vmatpush1.bf16.msra.mxu0 %v10073_v29  ;;  %7023 = vmatpush1.bf16.msra.mxu1 %v10075_v30  ;;  %v10187_v29 = vcombine.low %v813_v15, %v821_v16  ;;  %v10202_v30 = vcombine.high %v828_v22, %v836_v23  ;;  %v933_v15 = vld [vmem:[%s11938_s15 + $0xe78] sm:$0xff]  ;;  %v948_v22 = vld [vmem:[%s11938_s15 + $0xef0] sm:$0xff] }
 0x368   : > { %6860 = vmatprep.subr.bf16.mxu0 %v10090_v31  ;;  %7024 = vmatprep.subr.bf16.mxu1 %v10092_v33  ;;  %v10204_v31 = vcombine.high %v829_v25, %v837_v27  ;;  %v844_v33 = vld [vmem:[%s11938_s15 + $0xbb0] sm:$0xff]  ;;  %v941_v23 = vld [vmem:[%s11938_s15 + $0xeb8] sm:$0xff] }
 0x369   : > { %v10217_v47 = vcombine.low %v844_v33, %v852_v34 }
 0x36b   : > { %6861 = vmatpush1.bf16.msra.mxu0 %v10089_v38  ;;  %7025 = vmatpush1.bf16.msra.mxu1 %v10091_v39  ;;  %v10203_v38 = vcombine.low %v829_v25, %v837_v27  ;;  %v10218_v39 = vcombine.high %v844_v33, %v852_v34  ;;  %v949_v25 = vld [vmem:[%s11938_s15 + $0xef8] sm:$0xff]  ;;  %v964_v33 = vld [vmem:[%s11938_s15 + $0xf70] sm:$0xff] }
 0x36c   : > { %6871 = vmatprep.subr.bf16.mxu0 %v10106_v40  ;;  %7035 = vmatprep.subr.bf16.mxu1 %v10108_v41  ;;  %v10220_v40 = vcombine.high %v845_v0, %v853_v36  ;;  %v860_v41 = vld [vmem:[%s11938_s15 + $0xc30] sm:$0xff]  ;;  %v957_v34 = vld [vmem:[%s11938_s15 + $0xf38] sm:$0xff] }
 0x36d   : > { %v10233_v10 = vcombine.low %v860_v41, %v868_v43 }
 0x36e   : > { %6863 = vmatmul.mubr.bf16.vlgmr.msra.gmra.mrb[12].mxu0 %v12056_v26  ;;  %7027 = vmatmul.mubr.bf16.vlgmr.msra.gmra.mrb[12].mxu1 %v12056_v26  ;;  %v10137_v26 = vcombine.low %v764_v17, %v772_v53  ;;  %v884_v17 = vld [vmem:[%s11938_s15 + $0xcf0] sm:$0xff]  ;;  %v877_v53 = vld [vmem:[%s11938_s15 + $0xcb8] sm:$0xff] }
 0x36f   : > { %6872 = vmatpush1.bf16.msra.mxu0 %v10105_v48  ;;  %7036 = vmatpush1.bf16.msra.mxu1 %v10107_v49  ;;  %v10219_v48 = vcombine.low %v845_v0, %v853_v36  ;;  %v10234_v49 = vcombine.high %v860_v41, %v868_v43  ;;  %v965_v0 = vld [vmem:[%s11938_s15 + $0xf78] sm:$0xff]  ;;  %v980_v41 = vld [vmem:[%s11938_s15 + $0xff0] sm:$0xff] }
 0x370   : > { %6873 = vmatprep.subr.bf16.mxu0 %v10122_v50  ;;  %7037 = vmatprep.subr.bf16.mxu1 %v10124_v51  ;;  %v10236_v50 = vcombine.high %v861_v44, %v869_v46  ;;  %v876_v51 = vld [vmem:[%s11938_s15 + $0xcb0] sm:$0xff]  ;;  %v973_v43 = vld [vmem:[%s11938_s15 + $0xfb8] sm:$0xff] }
 0x371   : > { %6903 = vmatprep.mubr.bf16.mxu0 %v12062_v35  ;;  %7067 = vmatprep.mubr.bf16.mxu1 %v12062_v35  ;;  %v10155_v35 = vcombine.low %v781_v63, %v789_v2  ;;  %v901_v63 = vld [vmem:[%s11938_s15 + $0xd78] sm:$0xff]  ;;  %v10249_v2 = vcombine.low %v876_v51, %v884_v17 }
 0x373   : > { %6874 = vmatpush1.bf16.msra.mxu0 %v10121_v56  ;;  %7038 = vmatpush1.bf16.msra.mxu1 %v10123_v57  ;;  %v10235_v56 = vcombine.low %v861_v44, %v869_v46  ;;  %v10250_v57 = vcombine.high %v876_v51, %v884_v17  ;;  %v981_v44 = vld [vmem:[%s11938_s15 + $0xff8] sm:$0xff]  ;;  %v996_v51 = vld [vmem:[%s11938_s15 + $0x1070] sm:$0xff] }
 0x374   : > { %6875 = vmatprep.subr.bf16.mxu0 %v10138_v58  ;;  %7039 = vmatprep.subr.bf16.mxu1 %v10140_v59  ;;  %v10252_v58 = vcombine.high %v877_v53, %v885_v55  ;;  %v892_v59 = vld [vmem:[%s11938_s15 + $0xd30] sm:$0xff]  ;;  %v989_v17 = vld [vmem:[%s11938_s15 + $0x1038] sm:$0xff] }
 0x375   : > { %v10265_v8 = vcombine.low %v892_v59, %v900_v61 }
 0x377   : > { %6876 = vmatpush1.bf16.msra.mxu0 %v10137_v26  ;;  %7040 = vmatpush1.bf16.msra.mxu1 %v10139_v3  ;;  %v10251_v26 = vcombine.low %v877_v53, %v885_v55  ;;  %v10266_v3 = vcombine.high %v892_v59, %v900_v61  ;;  %v997_v53 = vld [vmem:[%s11938_s15 + $0x1078] sm:$0xff]  ;;  %v1012_v59 = vld [vmem:[%s11938_s15 + $0x10f0] sm:$0xff] }
 0x378   : > { %6877 = vmatprep.subr.bf16.mxu0 %v10154_v4  ;;  %7041 = vmatprep.subr.bf16.mxu1 %v10156_v5  ;;  %v10268_v4 = vcombine.high %v893_v62, %v901_v63  ;;  %v908_v5 = vld [vmem:[%s11938_s15 + $0xdb0] sm:$0xff]  ;;  %v1005_v61 = vld [vmem:[%s11938_s15 + $0x10b8] sm:$0xff] }
 0x379   : > { %v10281_v16 = vcombine.low %v908_v5, %v916_v6 }
 0x37b   : > { %6878 = vmatpush1.bf16.msra.mxu0 %v10153_v9  ;;  %7042 = vmatpush1.bf16.msra.mxu1 %v10155_v35  ;;  %v10267_v9 = vcombine.low %v893_v62, %v901_v63  ;;  %v10282_v35 = vcombine.high %v908_v5, %v916_v6  ;;  %v1013_v62 = vld [vmem:[%s11938_s15 + $0x10f8] sm:$0xff]  ;;  %v1028_v5 = vld [vmem:[%s11938_s15 + $0x1170] sm:$0xff] }
 0x37c   : > { %6879 = vmatprep.subr.bf16.mxu0 %v10170_v11  ;;  %7043 = vmatprep.subr.bf16.mxu1 %v10172_v32  ;;  %v10284_v11 = vcombine.high %v909_v7, %v917_v24  ;;  %v924_v32 = vld [vmem:[%s11938_s15 + $0xe30] sm:$0xff]  ;;  %v1021_v6 = vld [vmem:[%s11938_s15 + $0x1138] sm:$0xff] }
 0x37d   : > { %v10297_v27 = vcombine.low %v924_v32, %v932_v12 }
 0x37f   : > { %6880 = vmatpush1.bf16.msra.mxu0 %v10169_v60  ;;  %7044 = vmatpush1.bf16.msra.mxu1 %v10171_v19  ;;  %v10283_v60 = vcombine.low %v909_v7, %v917_v24  ;;  %v10298_v19 = vcombine.high %v924_v32, %v932_v12  ;;  %v1029_v7 = vld [vmem:[%s11938_s15 + $0x1178] sm:$0xff]  ;;  %v1044_v32 = vld [vmem:[%s11938_s15 + $0x11f0] sm:$0xff] }
 0x380   : > { %6881 = vmatprep.subr.bf16.mxu0 %v10186_v20  ;;  %7045 = vmatprep.subr.bf16.mxu1 %v10188_v21  ;;  %v10300_v20 = vcombine.high %v925_v14, %v933_v15  ;;  %v940_v21 = vld [vmem:[%s11938_s15 + $0xeb0] sm:$0xff]  ;;  %v1037_v12 = vld [vmem:[%s11938_s15 + $0x11b8] sm:$0xff] }
 0x381   : > { %v10313_v36 = vcombine.low %v940_v21, %v948_v22 }
 0x383   : > { %6882 = vmatpush1.bf16.msra.mxu0 %v10185_v28  ;;  %7046 = vmatpush1.bf16.msra.mxu1 %v10187_v29  ;;  %v10299_v28 = vcombine.low %v925_v14, %v933_v15  ;;  %v10314_v29 = vcombine.high %v940_v21, %v948_v22  ;;  %v1045_v14 = vld [vmem:[%s11938_s15 + $0x11f8] sm:$0xff]  ;;  %v10395_v15 = vcombine.low %v1021_v6, %v1029_v7 }
 0x384   : > { %6883 = vmatprep.subr.bf16.mxu0 %v10202_v30  ;;  %7047 = vmatprep.subr.bf16.mxu1 %v10204_v31  ;;  %v10316_v30 = vcombine.high %v941_v23, %v949_v25  ;;  %v956_v31 = vld [vmem:[%s11938_s15 + $0xf30] sm:$0xff]  ;;  %v1053_v21 = vld [vmem:[%s11938_s15 + $0x1238] sm:$0xff] }
 0x385   : > { %v10329_v46 = vcombine.low %v956_v31, %v964_v33  ;;  %v1061_v22 = vld [vmem:[%s11938_s15 + $0x1278] sm:$0xff] }
 0x387   : > { %6884 = vmatpush1.bf16.msra.mxu0 %v10201_v37  ;;  %7048 = vmatpush1.bf16.msra.mxu1 %v10203_v38  ;;  %v10315_v37 = vcombine.low %v941_v23, %v949_v25  ;;  %v10330_v38 = vcombine.high %v956_v31, %v964_v33  ;;  %v1077_v31 = vld [vmem:[%s11938_s15 + $0x12f8] sm:$0xff] }
 0x388   : > { %6885 = vmatprep.subr.bf16.mxu0 %v10218_v39  ;;  %7049 = vmatprep.subr.bf16.mxu1 %v10220_v40  ;;  %v10332_v39 = vcombine.high %v957_v34, %v965_v0  ;;  %v972_v40 = vld [vmem:[%s11938_s15 + $0xfb0] sm:$0xff] }
 0x389   : > { %v10345_v55 = vcombine.low %v972_v40, %v980_v41 }
 0x38b   : > { %6886 = vmatpush1.bf16.msra.mxu0 %v10217_v47  ;;  %7050 = vmatpush1.bf16.msra.mxu1 %v10219_v48  ;;  %v10331_v47 = vcombine.low %v957_v34, %v965_v0  ;;  %v10346_v48 = vcombine.high %v972_v40, %v980_v41  ;;  %v10427_v34 = vcombine.low %v1053_v21, %v1061_v22  ;;  %v1093_v40 = vld [vmem:[%s11938_s15 + $0x1378] sm:$0xff] }
 0x38c   : > { %6887 = vmatprep.subr.bf16.mxu0 %v10234_v49  ;;  %7051 = vmatprep.subr.bf16.mxu1 %v10236_v50  ;;  %v10348_v49 = vcombine.high %v973_v43, %v981_v44  ;;  %v988_v50 = vld [vmem:[%s11938_s15 + $0x1030] sm:$0xff] }
 0x38d   : > { %v10361_v63 = vcombine.low %v988_v50, %v996_v51 }
 0x38f   : > { %6888 = vmatpush1.bf16.msra.mxu0 %v10233_v10  ;;  %7052 = vmatpush1.bf16.msra.mxu1 %v10235_v56  ;;  %v10347_v10 = vcombine.low %v973_v43, %v981_v44  ;;  %v10362_v56 = vcombine.high %v988_v50, %v996_v51  ;;  %v1109_v50 = vld [vmem:[%s11938_s15 + $0x13f8] sm:$0xff] }
 0x390   : > { %6889 = vmatprep.subr.bf16.mxu0 %v10250_v57  ;;  %7053 = vmatprep.subr.bf16.mxu1 %v10252_v58  ;;  %v10364_v57 = vcombine.high %v989_v17, %v997_v53  ;;  %v1004_v58 = vld [vmem:[%s11938_s15 + $0x10b0] sm:$0xff] }
 0x391   : > { %v10377_v24 = vcombine.low %v1004_v58, %v1012_v59 }
 0x393   : > { %6890 = vmatpush1.bf16.msra.mxu0 %v10249_v2  ;;  %7054 = vmatpush1.bf16.msra.mxu1 %v10251_v26  ;;  %v10363_v2 = vcombine.low %v989_v17, %v997_v53  ;;  %v10378_v26 = vcombine.high %v1004_v58, %v1012_v59  ;;  %v1125_v58 = vld [vmem:[%s11938_s15 + $0x1478] sm:$0xff] }
 0x394   : > { %6891 = vmatprep.subr.bf16.mxu0 %v10266_v3  ;;  %7055 = vmatprep.subr.bf16.mxu1 %v10268_v4  ;;  %v10380_v3 = vcombine.high %v1005_v61, %v1013_v62  ;;  %v1020_v4 = vld [vmem:[%s11938_s15 + $0x1130] sm:$0xff] }
 0x397   : > { %6892 = vmatpush1.bf16.msra.mxu0 %v10265_v8  ;;  %7056 = vmatpush1.bf16.msra.mxu1 %v10267_v9  ;;  %v10379_v8 = vcombine.low %v1005_v61, %v1013_v62  ;;  %v10394_v9 = vcombine.high %v1020_v4, %v1028_v5 }
 0x398   : > { %6893 = vmatprep.subr.bf16.mxu0 %v10282_v35  ;;  %7057 = vmatprep.subr.bf16.mxu1 %v10284_v11  ;;  %v10396_v35 = vcombine.high %v1021_v6, %v1029_v7  ;;  %v1036_v11 = vld [vmem:[%s11938_s15 + $0x11b0] sm:$0xff] }
 0x399   : > { %v10409_v23 = vcombine.low %v1036_v11, %v1044_v32 }
 0x39b   : > { %6894 = vmatpush1.bf16.msra.mxu0 %v10281_v16  ;;  %7058 = vmatpush1.bf16.msra.mxu1 %v10283_v60  ;;  %v10410_v16 = vcombine.high %v1036_v11, %v1044_v32  ;;  %v10412_v60 = vcombine.high %v1037_v12, %v1045_v14  ;;  %v1157_v11 = vld [vmem:[%s11938_s15 + $0x1578] sm:$0xff] }
 0x39c   : > { %6895 = vmatprep.subr.bf16.mxu0 %v10298_v19  ;;  %7059 = vmatprep.subr.bf16.mxu1 %v10300_v20  ;;  %v1052_v19 = vld [vmem:[%s11938_s15 + $0x1230] sm:$0xff] }
 0x39d   : > { %v1060_v20 = vld [vmem:[%s11938_s15 + $0x1270] sm:$0xff] }
 0x39e   : > { %v10426_v25 = vcombine.high %v1052_v19, %v1060_v20  ;;  %v10425_v33 = vcombine.low %v1052_v19, %v1060_v20  ;;  %v1173_v19 = vld [vmem:[%s11938_s15 + $0x15f8] sm:$0xff] }
 0x39f   : > { %6896 = vmatpush1.bf16.msra.mxu0 %v10297_v27  ;;  %7060 = vmatpush1.bf16.msra.mxu1 %v10299_v28  ;;  %v10428_v27 = vcombine.high %v1053_v21, %v1061_v22  ;;  %v1068_v28 = vld [vmem:[%s11938_s15 + $0x12b0] sm:$0xff] }
 0x3a0   : > { %6897 = vmatprep.subr.bf16.mxu0 %v10314_v29  ;;  %7061 = vmatprep.subr.bf16.mxu1 %v10316_v30  ;;  %v1076_v29 = vld [vmem:[%s11938_s15 + $0x12f0] sm:$0xff]  ;;  %v1069_v30 = vld [vmem:[%s11938_s15 + $0x12b8] sm:$0xff] }
 0x3a1   : > { %v10442_v0 = vcombine.high %v1068_v28, %v1076_v29  ;;  %v10441_v41 = vcombine.low %v1068_v28, %v1076_v29  ;;  %v10443_v43 = vcombine.low %v1069_v30, %v1077_v31  ;;  %v1189_v28 = vld [vmem:[%s11938_s15 + $0x1678] sm:$0xff] }
 0x3a3   : > { %6898 = vmatpush1.bf16.msra.mxu0 %v10313_v36  ;;  %7062 = vmatpush1.bf16.msra.mxu1 %v10315_v37  ;;  %v10444_v36 = vcombine.high %v1069_v30, %v1077_v31  ;;  %v1084_v37 = vld [vmem:[%s11938_s15 + $0x1330] sm:$0xff] }
 0x3a4   : > { %6899 = vmatprep.subr.bf16.mxu0 %v10330_v38  ;;  %7063 = vmatprep.subr.bf16.mxu1 %v10332_v39  ;;  %v1092_v38 = vld [vmem:[%s11938_s15 + $0x1370] sm:$0xff]  ;;  %v1085_v39 = vld [vmem:[%s11938_s15 + $0x1338] sm:$0xff] }
 0x3a5   : > { %v10458_v44 = vcombine.high %v1084_v37, %v1092_v38  ;;  %v10457_v51 = vcombine.low %v1084_v37, %v1092_v38  ;;  %v10459_v17 = vcombine.low %v1085_v39, %v1093_v40  ;;  %v1205_v37 = vld [vmem:[%s11938_s15 + $0x16f8] sm:$0xff] }
 0x3a7   : > { %6900 = vmatpush1.bf16.msra.mxu0 %v10329_v46  ;;  %7064 = vmatpush1.bf16.msra.mxu1 %v10331_v47  ;;  %v10460_v46 = vcombine.high %v1085_v39, %v1093_v40  ;;  %v1100_v47 = vld [vmem:[%s11938_s15 + $0x13b0] sm:$0xff] }
 0x3a8   : > { %6901 = vmatprep.subr.bf16.mxu0 %v10346_v48  ;;  %7065 = vmatprep.subr.bf16.mxu1 %v10348_v49  ;;  %v1108_v48 = vld [vmem:[%s11938_s15 + $0x13f0] sm:$0xff]  ;;  %v1101_v49 = vld [vmem:[%s11938_s15 + $0x13b8] sm:$0xff] }
 0x3a9   : > { %v10474_v53 = vcombine.high %v1100_v47, %v1108_v48  ;;  %v10473_v59 = vcombine.low %v1100_v47, %v1108_v48  ;;  %v10475_v61 = vcombine.low %v1101_v49, %v1109_v50  ;;  %v1221_v47 = vld [vmem:[%s11938_s15 + $0x1778] sm:$0xff] }
 0x3ab   : > { %6902 = vmatpush1.bf16.msra.mxu0 %v10345_v55  ;;  %7066 = vmatpush1.bf16.msra.mxu1 %v10347_v10  ;;  %v10476_v55 = vcombine.high %v1101_v49, %v1109_v50  ;;  %v1116_v10 = vld [vmem:[%s11938_s15 + $0x1430] sm:$0xff] }
 0x3ac   : > { %6912 = vmatprep.subr.bf16.mxu0 %v10362_v56  ;;  %7076 = vmatprep.subr.bf16.mxu1 %v10364_v57  ;;  %v1124_v56 = vld [vmem:[%s11938_s15 + $0x1470] sm:$0xff]  ;;  %v1117_v57 = vld [vmem:[%s11938_s15 + $0x1438] sm:$0xff] }
 0x3ad   : > { %v10490_v62 = vcombine.high %v1116_v10, %v1124_v56  ;;  %v10491_v6 = vcombine.low %v1117_v57, %v1125_v58 }
 0x3ae   : > { %6904 = vmatmul.mubr.bf16.vlgmr.msra.gmra.mrb[12].mxu0 %v12139_v42  ;;  %7068 = vmatmul.mubr.bf16.vlgmr.msra.gmra.mrb[12].mxu1 %v12139_v42  ;;  %v10393_v42 = vcombine.low %v1020_v4, %v1028_v5  ;;  %v1141_v4 = vld [vmem:[%s11938_s15 + $0x14f8] sm:$0xff]  ;;  %v10489_v5 = vcombine.low %v1116_v10, %v1124_v56 }
 0x3af   : > { %6913 = vmatpush1.bf16.msra.mxu0 %v10361_v63  ;;  %7077 = vmatpush1.bf16.msra.mxu1 %v10363_v2  ;;  %v10492_v63 = vcombine.high %v1117_v57, %v1125_v58  ;;  %v1132_v2 = vld [vmem:[%s11938_s15 + $0x14b0] sm:$0xff]  ;;  %v1237_v10 = vld [vmem:[%s11938_s15 + $0x17f8] sm:$0xff] }
 0x3b0   : > { %6914 = vmatprep.subr.bf16.mxu0 %v10378_v26  ;;  %7078 = vmatprep.subr.bf16.mxu1 %v10380_v3  ;;  %v1140_v26 = vld [vmem:[%s11938_s15 + $0x14f0] sm:$0xff]  ;;  %v1133_v3 = vld [vmem:[%s11938_s15 + $0x14b8] sm:$0xff] }
 0x3b1   : > { %6944 = vmatprep.mubr.bf16.mxu0 %v12145_v52  ;;  %7108 = vmatprep.mubr.bf16.mxu1 %v12145_v52  ;;  %v10411_v52 = vcombine.low %v1037_v12, %v1045_v14  ;;  %v10506_v7 = vcombine.high %v1132_v2, %v1140_v26  ;;  %v10505_v32 = vcombine.low %v1132_v2, %v1140_v26  ;;  %v1253_v2 = vld [vmem:[%s11938_s15 + $0x1878] sm:$0xff] }
 0x3b2   : > { %v10507_v12 = vcombine.low %v1133_v3, %v1141_v4 }
 0x3b3   : > { %6915 = vmatpush1.bf16.msra.mxu0 %v10377_v24  ;;  %7079 = vmatpush1.bf16.msra.mxu1 %v10379_v8  ;;  %v10508_v24 = vcombine.high %v1133_v3, %v1141_v4  ;;  %v1148_v8 = vld [vmem:[%s11938_s15 + $0x1530] sm:$0xff] }
 0x3b4   : > { %6916 = vmatprep.subr.bf16.mxu0 %v10394_v9  ;;  %7080 = vmatprep.subr.bf16.mxu1 %v10396_v35  ;;  %v1156_v9 = vld [vmem:[%s11938_s15 + $0x1570] sm:$0xff]  ;;  %v1149_v35 = vld [vmem:[%s11938_s15 + $0x1538] sm:$0xff] }
 0x3b5   : > { %v10522_v14 = vcombine.high %v1148_v8, %v1156_v9  ;;  %v10521_v20 = vcombine.low %v1148_v8, %v1156_v9  ;;  %v10523_v21 = vcombine.low %v1149_v35, %v1157_v11  ;;  %v1269_v8 = vld [vmem:[%s11938_s15 + $0x18f8] sm:$0xff] }
 0x3b7   : > { %6917 = vmatpush1.bf16.msra.mxu0 %v10393_v42  ;;  %7081 = vmatpush1.bf16.msra.mxu1 %v10395_v15  ;;  %v10524_v42 = vcombine.high %v1149_v35, %v1157_v11  ;;  %v1164_v15 = vld [vmem:[%s11938_s15 + $0x15b0] sm:$0xff] }
 0x3b8   : > { %6918 = vmatprep.subr.bf16.mxu0 %v10410_v16  ;;  %7082 = vmatprep.subr.bf16.mxu1 %v10412_v60  ;;  %v1172_v16 = vld [vmem:[%s11938_s15 + $0x15f0] sm:$0xff]  ;;  %v1165_v60 = vld [vmem:[%s11938_s15 + $0x15b8] sm:$0xff] }
 0x3b9   : > { %v10538_v22 = vcombine.high %v1164_v15, %v1172_v16  ;;  %v10537_v29 = vcombine.low %v1164_v15, %v1172_v16  ;;  %v10539_v30 = vcombine.low %v1165_v60, %v1173_v19  ;;  %v1285_v15 = vld [vmem:[%s11938_s15 + $0x1978] sm:$0xff] }
 0x3bb   : > { %6919 = vmatpush1.bf16.msra.mxu0 %v10409_v23  ;;  %7083 = vmatpush1.bf16.msra.mxu1 %v10411_v52  ;;  %v10540_v23 = vcombine.high %v1165_v60, %v1173_v19  ;;  %v1180_v52 = vld [vmem:[%s11938_s15 + $0x1630] sm:$0xff] }
 0x3bc   : > { %6920 = vmatprep.subr.bf16.mxu0 %v10426_v25  ;;  %7084 = vmatprep.subr.bf16.mxu1 %v10428_v27  ;;  %v1188_v25 = vld [vmem:[%s11938_s15 + $0x1670] sm:$0xff]  ;;  %v1181_v27 = vld [vmem:[%s11938_s15 + $0x1638] sm:$0xff] }
 0x3bd   : > { %v10554_v31 = vcombine.high %v1180_v52, %v1188_v25  ;;  %v10553_v38 = vcombine.low %v1180_v52, %v1188_v25  ;;  %v10555_v39 = vcombine.low %v1181_v27, %v1189_v28  ;;  %v1301_v52 = vld [vmem:[%s11938_s15 + $0x19f8] sm:$0xff] }
 0x3bf   : > { %6921 = vmatpush1.bf16.msra.mxu0 %v10425_v33  ;;  %7085 = vmatpush1.bf16.msra.mxu1 %v10427_v34  ;;  %v10556_v33 = vcombine.high %v1181_v27, %v1189_v28  ;;  %v1196_v34 = vld [vmem:[%s11938_s15 + $0x16b0] sm:$0xff] }
 0x3c0   : > { %6922 = vmatprep.subr.bf16.mxu0 %v10442_v0  ;;  %7086 = vmatprep.subr.bf16.mxu1 %v10444_v36  ;;  %v1204_v0 = vld [vmem:[%s11938_s15 + $0x16f0] sm:$0xff]  ;;  %v1197_v36 = vld [vmem:[%s11938_s15 + $0x16b8] sm:$0xff] }
 0x3c1   : > { %v10570_v40 = vcombine.high %v1196_v34, %v1204_v0  ;;  %v10569_v48 = vcombine.low %v1196_v34, %v1204_v0  ;;  %v10571_v49 = vcombine.low %v1197_v36, %v1205_v37 }
 0x3c3   : > { %6923 = vmatpush1.bf16.msra.mxu0 %v10441_v41  ;;  %7087 = vmatpush1.bf16.msra.mxu1 %v10443_v43  ;;  %v10572_v41 = vcombine.high %v1197_v36, %v1205_v37  ;;  %v1212_v43 = vld [vmem:[%s11938_s15 + $0x1730] sm:$0xff] }
 0x3c4   : > { %6924 = vmatprep.subr.bf16.mxu0 %v10458_v44  ;;  %7088 = vmatprep.subr.bf16.mxu1 %v10460_v46  ;;  %v1220_v44 = vld [vmem:[%s11938_s15 + $0x1770] sm:$0xff]  ;;  %v1213_v46 = vld [vmem:[%s11938_s15 + $0x1738] sm:$0xff] }
 0x3c5   : > { %v10586_v50 = vcombine.high %v1212_v43, %v1220_v44  ;;  %v10585_v56 = vcombine.low %v1212_v43, %v1220_v44  ;;  %v10587_v57 = vcombine.low %v1213_v46, %v1221_v47  ;;  %v1324_v37 = vld [vmem:[%s11938_s15 + $0x1ab0] sm:$0xff] }
 0x3c7   : > { %6925 = vmatpush1.bf16.msra.mxu0 %v10457_v51  ;;  %7089 = vmatpush1.bf16.msra.mxu1 %v10459_v17  ;;  %v10588_v51 = vcombine.high %v1213_v46, %v1221_v47  ;;  %v1228_v17 = vld [vmem:[%s11938_s15 + $0x17b0] sm:$0xff] }
 0x3c8   : > { %6926 = vmatprep.subr.bf16.mxu0 %v10474_v53  ;;  %7090 = vmatprep.subr.bf16.mxu1 %v10476_v55  ;;  %v1236_v53 = vld [vmem:[%s11938_s15 + $0x17f0] sm:$0xff]  ;;  %v1229_v55 = vld [vmem:[%s11938_s15 + $0x17b8] sm:$0xff] }
 0x3c9   : > { %v10602_v58 = vcombine.high %v1228_v17, %v1236_v53  ;;  %v10601_v26 = vcombine.low %v1228_v17, %v1236_v53  ;;  %v10603_v3 = vcombine.low %v1229_v55, %v1237_v10  ;;  %v1340_v47 = vld [vmem:[%s11938_s15 + $0x1b30] sm:$0xff] }
 0x3cb   : > { %6927 = vmatpush1.bf16.msra.mxu0 %v10473_v59  ;;  %7091 = vmatpush1.bf16.msra.mxu1 %v10475_v61  ;;  %v10604_v59 = vcombine.high %v1229_v55, %v1237_v10  ;;  %v1244_v61 = vld [vmem:[%s11938_s15 + $0x1830] sm:$0xff] }
 0x3cc   : > { %6928 = vmatprep.subr.bf16.mxu0 %v10490_v62  ;;  %7092 = vmatprep.subr.bf16.mxu1 %v10492_v63  ;;  %v1252_v62 = vld [vmem:[%s11938_s15 + $0x1870] sm:$0xff]  ;;  %v1245_v63 = vld [vmem:[%s11938_s15 + $0x1838] sm:$0xff] }
 0x3cd   : > { %v10618_v4 = vcombine.high %v1244_v61, %v1252_v62  ;;  %v10617_v9 = vcombine.low %v1244_v61, %v1252_v62  ;;  %v10619_v35 = vcombine.low %v1245_v63, %v1253_v2  ;;  %v1357_v61 = vld [vmem:[%s11938_s15 + $0x1bb8] sm:$0xff] }
 0x3ce   : > { %v1365_v62 = vld [vmem:[%s11938_s15 + $0x1bf8] sm:$0xff] }
 0x3cf   : > { %6929 = vmatpush1.bf16.msra.mxu0 %v10489_v5  ;;  %7093 = vmatpush1.bf16.msra.mxu1 %v10491_v6  ;;  %v10620_v5 = vcombine.high %v1245_v63, %v1253_v2  ;;  %v1260_v6 = vld [vmem:[%s11938_s15 + $0x18b0] sm:$0xff] }
 0x3d0   : > { %6930 = vmatprep.subr.bf16.mxu0 %v10506_v7  ;;  %7094 = vmatprep.subr.bf16.mxu1 %v10508_v24  ;;  %v1268_v7 = vld [vmem:[%s11938_s15 + $0x18f0] sm:$0xff]  ;;  %v1261_v24 = vld [vmem:[%s11938_s15 + $0x18b8] sm:$0xff] }
 0x3d1   : > { %v10634_v11 = vcombine.high %v1260_v6, %v1268_v7  ;;  %v10633_v16 = vcombine.low %v1260_v6, %v1268_v7  ;;  %v10635_v60 = vcombine.low %v1261_v24, %v1269_v8 }
 0x3d3   : > { %6931 = vmatpush1.bf16.msra.mxu0 %v10505_v32  ;;  %7095 = vmatpush1.bf16.msra.mxu1 %v10507_v12  ;;  %v10636_v32 = vcombine.high %v1261_v24, %v1269_v8  ;;  %v1276_v12 = vld [vmem:[%s11938_s15 + $0x1930] sm:$0xff] }
 0x3d4   : > { %6932 = vmatprep.subr.bf16.mxu0 %v10522_v14  ;;  %7096 = vmatprep.subr.bf16.mxu1 %v10524_v42  ;;  %v1284_v14 = vld [vmem:[%s11938_s15 + $0x1970] sm:$0xff]  ;;  %v1277_v42 = vld [vmem:[%s11938_s15 + $0x1938] sm:$0xff] }
 0x3d5   : > { %v10650_v19 = vcombine.high %v1276_v12, %v1284_v14  ;;  %v10651_v25 = vcombine.low %v1277_v42, %v1285_v15 }
 0x3d7   : > { %6933 = vmatpush1.bf16.msra.mxu0 %v10521_v20  ;;  %7097 = vmatpush1.bf16.msra.mxu1 %v10523_v21  ;;  %v10652_v20 = vcombine.high %v1277_v42, %v1285_v15  ;;  %v1292_v21 = vld [vmem:[%s11938_s15 + $0x19b0] sm:$0xff]  ;;  %v10731_v42 = vcombine.low %v1357_v61, %v1365_v62 }
 0x3d8   : > { %6934 = vmatprep.subr.bf16.mxu0 %v10538_v22  ;;  %7098 = vmatprep.subr.bf16.mxu1 %v10540_v23  ;;  %v1300_v22 = vld [vmem:[%s11938_s15 + $0x19f0] sm:$0xff]  ;;  %v1293_v23 = vld [vmem:[%s11938_s15 + $0x19b8] sm:$0xff] }
 0x3d9   : > { %v10666_v27 = vcombine.high %v1292_v21, %v1300_v22  ;;  %v10668_v28 = vcombine.high %v1293_v23, %v1301_v52  ;;  %v10665_v34 = vcombine.low %v1292_v21, %v1300_v22 }
 0x3db   : > { %6935 = vmatpush1.bf16.msra.mxu0 %v10537_v29  ;;  %7099 = vmatpush1.bf16.msra.mxu1 %v10539_v30  ;;  %v1308_v29 = vld [vmem:[%s11938_s15 + $0x1a30] sm:$0xff] }
 0x3dc   : > { %6936 = vmatprep.subr.bf16.mxu0 %v10554_v31  ;;  %7100 = vmatprep.subr.bf16.mxu1 %v10556_v33  ;;  %v1316_v30 = vld [vmem:[%s11938_s15 + $0x1a70] sm:$0xff]  ;;  %v1309_v31 = vld [vmem:[%s11938_s15 + $0x1a38] sm:$0xff] }
 0x3dd   : > { %v1317_v33 = vld [vmem:[%s11938_s15 + $0x1a78] sm:$0xff]  ;;  %v10682_v0 = vcombine.high %v1308_v29, %v1316_v30 }
 0x3de   : > { %v10684_v36 = vcombine.high %v1309_v31, %v1317_v33  ;;  %v10683_v43 = vcombine.low %v1309_v31, %v1317_v33  ;;  %v11370_v33 = vld [vmem:[%s13621_s4] sm:$0xff] (!%p10733_p8)  }
 0x3df   : > { %6937 = vmatpush1.bf16.msra.mxu0 %v10553_v38  ;;  %7101 = vmatpush1.bf16.msra.mxu1 %v10555_v39  ;;  %v1332_v38 = vld [vmem:[%s11938_s15 + $0x1af0] sm:$0xff]  ;;  %v1325_v39 = vld [vmem:[%s11938_s15 + $0x1ab8] sm:$0xff] }
 0x3e0   : > { %6938 = vmatprep.subr.bf16.mxu0 %v10570_v40  ;;  %7102 = vmatprep.subr.bf16.mxu1 %v10572_v41  ;;  %v1333_v40 = vld [vmem:[%s11938_s15 + $0x1af8] sm:$0xff]  ;;  %v10681_v41 = vcombine.low %v1308_v29, %v1316_v30  ;;  %v10698_v44 = vcombine.high %v1324_v37, %v1332_v38 }
 0x3e1   : > { %v10700_v46 = vcombine.high %v1325_v39, %v1333_v40  ;;  %v10699_v17 = vcombine.low %v1325_v39, %v1333_v40  ;;  %v418_v29 = vld [vmem:[#allocation2 + $0x18] sm:$0xff]  ;;  %v11377_v39 = vld [vmem:[%s13621_s4 + $0x50] sm:$0xff] (!%p10733_p8)  }
 0x3e2   : > { %v11378_v40 = vld [vmem:[%s13621_s4 + $0x10] sm:$0xff] (!%p10733_p8)  }
 0x3e3   : > { %6939 = vmatpush1.bf16.msra.mxu0 %v10569_v48  ;;  %7103 = vmatpush1.bf16.msra.mxu1 %v10571_v49  ;;  %v1348_v48 = vld [vmem:[%s11938_s15 + $0x1b70] sm:$0xff]  ;;  %v1341_v49 = vld [vmem:[%s11938_s15 + $0x1b38] sm:$0xff] }
 0x3e4   : > { %6940 = vmatprep.subr.bf16.mxu0 %v10586_v50  ;;  %7104 = vmatprep.subr.bf16.mxu1 %v10588_v51  ;;  %v1349_v50 = vld [vmem:[%s11938_s15 + $0x1b78] sm:$0xff]  ;;  %v10697_v51 = vcombine.low %v1324_v37, %v1332_v38  ;;  %v10714_v53 = vcombine.high %v1340_v47, %v1348_v48  ;;  %v11375_v37 = vld [vmem:[%s13621_s4 + $0xc8] sm:$0xff] (!%p10733_p8)  }
 0x3e5   : > { %v10716_v10 = vcombine.high %v1341_v49, %v1349_v50  ;;  %v10715_v7 = vcombine.low %v1341_v49, %v1349_v50  ;;  %v11376_v38 = vld [vmem:[%s13621_s4 + $0x88] sm:$0xff] (!%p10733_p8)   ;;  %v11385_v49 = vld [vmem:[%s13621_s4 + $0x60] sm:$0xff] (!%p10733_p8)  }
 0x3e6   : > { %v11386_v50 = vld [vmem:[%s13621_s4 + $0x20] sm:$0xff] (!%p10733_p8)  }
 0x3e7   : > { %6941 = vmatpush1.bf16.msra.mxu0 %v10585_v56  ;;  %7105 = vmatpush1.bf16.msra.mxu1 %v10587_v57  ;;  %v1356_v56 = vld [vmem:[%s11938_s15 + $0x1bb0] sm:$0xff] }
 0x3e8   : > { %6942 = vmatprep.subr.bf16.mxu0 %v10602_v58  ;;  %7106 = vmatprep.subr.bf16.mxu1 %v10604_v59  ;;  %v1364_v57 = vld [vmem:[%s11938_s15 + $0x1bf0] sm:$0xff] }
 0x3e9   : > { %v10730_v24 = vcombine.high %v1356_v56, %v1364_v57 }
 0x3eb   : > { %6943 = vmatpush1.bf16.msra.mxu0 %v10601_v26  ;;  %7107 = vmatpush1.bf16.msra.mxu1 %v10603_v3  ;;  %v10713_v3 = vcombine.low %v1340_v47, %v1348_v48  ;;  %v11383_v47 = vld [vmem:[%s13621_s4 + $0xd8] sm:$0xff] (!%p10733_p8)  }
 0x3ec   : > { %6953 = vmatprep.subr.bf16.mxu0 %v10618_v4  ;;  %7117 = vmatprep.subr.bf16.mxu1 %v10620_v5  ;;  %v11384_v48 = vld [vmem:[%s13621_s4 + $0x98] sm:$0xff] (!%p10733_p8)  }
 0x3ee   : > { %6945 = vmatmul.mubr.bf16.vlgmr.msra.gmra.mrb[12].mxu0 %v12213_v1  ;;  %7109 = vmatmul.mubr.bf16.vlgmr.msra.gmra.mrb[12].mxu1 %v12213_v1  ;;  %v10649_v1 = vcombine.low %v1276_v12, %v1284_v14  ;;  %v10729_v12 = vcombine.low %v1356_v56, %v1364_v57  ;;  %v11392_v56 = vld [vmem:[%s13621_s4 + $0xa8] sm:$0xff] (!%p10733_p8)   ;;  %v11393_v57 = vld [vmem:[%s13621_s4 + $0x70] sm:$0xff] (!%p10733_p8)  }
 0x3ef   : > { %6954 = vmatpush1.bf16.msra.mxu0 %v10617_v9  ;;  %7118 = vmatpush1.bf16.msra.mxu1 %v10619_v35  ;;  %v10732_v35 = vcombine.high %v1357_v61, %v1365_v62  ;;  %v11396_v61 = vld [vmem:[%s13621_s4 + $0xb0] sm:$0xff] (!%p10733_p8)   ;;  %v11397_v62 = vld [vmem:[%s13621_s4 + $0x78] sm:$0xff] (!%p10733_p8)  }
 0x3f0   : > { %6955 = vmatprep.subr.bf16.mxu0 %v10634_v11  ;;  %7119 = vmatprep.subr.bf16.mxu1 %v10636_v32  ;;  %v417_v32 = vld [vmem:[#allocation2 + $0x10] sm:$0xff] }
 0x3f1   : > { %6985 = vmatprep.mubr.bf16.mxu0 %v11717_v18  ;;  %7149 = vmatprep.mubr.bf16.mxu1 %v11717_v18  ;;  %v10667_v18 = vcombine.low %v1293_v23, %v1301_v52 }
 0x3f3   : > { %6956 = vmatpush1.bf16.msra.mxu0 %v10633_v16  ;;  %7120 = vmatpush1.bf16.msra.mxu1 %v10635_v60 }
 0x3f4   : > { %6957 = vmatprep.subr.bf16.mxu0 %v10650_v19  ;;  %7121 = vmatprep.subr.bf16.mxu1 %v10652_v20 }
 0x3f7   : > { %6958 = vmatpush1.bf16.msra.mxu0 %v10649_v1  ;;  %7122 = vmatpush1.bf16.msra.mxu1 %v10651_v25 }
 0x3f8   : > { %6959 = vmatprep.subr.bf16.mxu0 %v10666_v27  ;;  %7123 = vmatprep.subr.bf16.mxu1 %v10668_v28 }
 0x3fb   : > { %6960 = vmatpush1.bf16.msra.mxu0 %v10665_v34  ;;  %7124 = vmatpush1.bf16.msra.mxu1 %v10667_v18  ;;  %v11371_v34 = vld [vmem:[%s13621_s4 + $0xc0] sm:$0xff] (!%p10733_p8)  }
 0x3fc   : > { %6961 = vmatprep.subr.bf16.mxu0 %v10682_v0  ;;  %7125 = vmatprep.subr.bf16.mxu1 %v10684_v36  ;;  %v11372_v18 = vld [vmem:[%s13621_s4 + $0x80] sm:$0xff] (!%p10733_p8)   ;;  %v11373_v0 = vld [vmem:[%s13621_s4 + $0x48] sm:$0xff] (!%p10733_p8)  }
 0x3fd   : > { %v11374_v36 = vld [vmem:[%s13621_s4 + $0x8] sm:$0xff] (!%p10733_p8)  }
 0x3ff   : > { %6962 = vmatpush1.bf16.msra.mxu0 %v10681_v41  ;;  %7126 = vmatpush1.bf16.msra.mxu1 %v10683_v43  ;;  %v11379_v41 = vld [vmem:[%s13621_s4 + $0xd0] sm:$0xff] (!%p10733_p8)  }
 0x400   : > { %6963 = vmatprep.subr.bf16.mxu0 %v10698_v44  ;;  %7127 = vmatprep.subr.bf16.mxu1 %v10700_v46  ;;  %v11380_v43 = vld [vmem:[%s13621_s4 + $0x90] sm:$0xff] (!%p10733_p8)   ;;  %v11381_v44 = vld [vmem:[%s13621_s4 + $0x58] sm:$0xff] (!%p10733_p8)  }
 0x401   : > { %v6659_v55 = vpop.f32.mrb[8].mxu0  ;;  %v6823_v58 = vpop.f32.mrb[8].mxu1  ;;  %v11382_v46 = vld [vmem:[%s13621_s4 + $0x18] sm:$0xff] (!%p10733_p8)  }
 0x402   : > { %v6661_v59 = vpop.f32.mrb[9].mxu0  ;;  %v6825_v2 = vpop.f32.mrb[9].mxu1 }
 0x403   : > { %v7208_v63 = vcombine.low %v6659_v55, %v6661_v59  ;;  %v6663_v26 = vpop.f32.mrb[10].mxu0  ;;  %6964 = vmatpush1.bf16.msra.mxu0 %v10697_v51  ;;  %v7209_v4 = vcombine.low %v6823_v58, %v6825_v2  ;;  %v6827_v5 = vpop.f32.mrb[10].mxu1  ;;  %7128 = vmatpush1.bf16.msra.mxu1 %v10699_v17  ;;  %v11387_v51 = vld [vmem:[%s13621_s4 + $0xe0] sm:$0xff] (!%p10733_p8)   ;;  %v11390_v55 = vld [vmem:[%s13621_s4 + $0x28] sm:$0xff] (!%p10733_p8)   ;;  %v11394_v58 = vld [vmem:[%s13621_s4 + $0x30] sm:$0xff] (!%p10733_p8)  }
 0x404   : > { %v6664_v6 = vpop.f32.mrb[11].mxu0  ;;  %6965 = vmatprep.subr.bf16.mxu0 %v10714_v53  ;;  %v6828_v9 = vpop.f32.mrb[11].mxu1  ;;  %7129 = vmatprep.subr.bf16.mxu1 %v10716_v10  ;;  %v11388_v17 = vld [vmem:[%s13621_s4 + $0xa0] sm:$0xff] (!%p10733_p8)   ;;  %v11389_v53 = vld [vmem:[%s13621_s4 + $0x68] sm:$0xff] (!%p10733_p8)   ;;  %v11395_v59 = vld [vmem:[%s13621_s4 + $0xf0] sm:$0xff] (!%p10733_p8)  }
 0x405   : > { %v7216_v8 = vrot.slane %v7208_v63, %v11988_v54  ;;  %v7223_v11 = vrot.slane %v7209_v4, %v11988_v54  ;;  %v11391_v10 = vld [vmem:[%s13621_s4 + $0xe8] sm:$0xff] (!%p10733_p8)   ;;  %v11398_v63 = vld [vmem:[%s13621_s4 + $0x38] sm:$0xff] (!%p10733_p8)   ;;  %v11402_v6 = vld [vmem:[%s13621_s4 + $0x140] sm:$0xff] (!%p10733_p8)  }
 0x406   : > { %v11399_v2 = vld [vmem:[%s13621_s4 + $0xf8] sm:$0xff] (!%p10733_p8)   ;;  %v11404_v9 = vld [vmem:[%s13621_s4 + $0x1c0] sm:$0xff] (!%p10733_p8)  }
 0x407   : > { %6966 = vmatpush1.bf16.msra.mxu0 %v10713_v3  ;;  %v7224_v14 = vcombine.low %v7216_v8, %v7223_v11  ;;  %7130 = vmatpush1.bf16.msra.mxu1 %v10715_v7  ;;  %v11400_v26 = vld [vmem:[%s13621_s4 + $0xb8] sm:$0xff] (!%p10733_p8)   ;;  %v7258_v3 = vld [vmem:[#allocation2] sm:$0xff] (!%p10733_p8) }
 0x408   : > { %6967 = vmatprep.subr.bf16.mxu0 %v10730_v24  ;;  %7131 = vmatprep.subr.bf16.mxu1 %v10732_v35  ;;  %v7266_v4 = vcombine.high (!%p10733_p8), %v7258_v3, %v7258_v3  ;;  %v7273_v5 = vrot.slane (!%p10733_p8), %v7258_v3, %v11988_v54 }
 0x409   : > { %v7248_v15 = vadd.f32 %v7224_v14, %v417_v32 }
 0x40a   : > { %v7280_v7 = vrot.slane (!%p10733_p8), %v7266_v4, %v11988_v54  ;;  %v7281_v24 = vcombine.high (!%p10733_p8), %v7273_v5, %v7273_v5  ;;  %v7351_v8 = vsel (!%p10733_p8), %vm7350_vm0, %v7273_v5, 0.0 }
 0x40b   : > { %6968 = vmatpush1.bf16.msra.mxu0 %v10729_v12  ;;  %7252 = vst [vmem:[#allocation2 + $0x10] sm:$0xff] %v7248_v15  ;;  %7132 = vmatpush1.bf16.msra.mxu1 %v10731_v42  ;;  %v7352_v35 = vrot.slane (!%p10733_p8), %v7351_v8, 4 }
 0x40c   : > { %11022 = vmatprep.subr.bf16.mxu1 (!%p10733_p8), %v11371_v34  ;;  %v7282_v11 = vcombine.high (!%p10733_p8), %v7280_v7, %v7280_v7  ;;  %v7358_v32 = vsel (!%p10733_p8), %vm7350_vm0, %v7281_v24, 0.0  ;;  %v7365_v12 = vsel (!%p10733_p8), %vm7350_vm0, %v7280_v7, 0.0 }
 0x40d   : > { %v7353_v14 = vadd.f32 (!%p10733_p8), %v7352_v35, %v7351_v8  ;;  %v7359_v42 = vrot.slane (!%p10733_p8), %v7358_v32, 4  ;;  %v7366_v15 = vrot.slane (!%p10733_p8), %v7365_v12, 4 }
 0x40e   : > { %6986 = vmatmul.mubr.bf16.vlgmr.msra.gmra.mrb[12].mxu0 %v12254_v13  ;;  %7150 = vmatmul.mubr.bf16.vlgmr.msra.gmra.mrb[12].mxu1 %v12254_v13  ;;  %v11369_v13 = vld [vmem:[%s13621_s4 + $0x40] sm:$0xff] (!%p10733_p8)  }
 0x40f   : > { %11000 = vmatprep.subr.bf16.mxu0 (!%p10733_p8), %v11369_v13  ;;  %11023 = vmatpush3.bf16.msra.mxu1 (!%p10733_p8), %v11372_v18 }
 0x410   : > { %11001 = vmatpush3.bf16.msra.mxu0 (!%p10733_p8), %v11370_v33  ;;  %11024 = vmatprep.subr.bf16.mxu1 (!%p10733_p8), %v11375_v37 }
 0x411   : > { %11002 = vmatprep.subr.bf16.mxu0 (!%p10733_p8), %v11373_v0 }
 0x413   : > { %11025 = vmatpush3.bf16.msra.mxu1 (!%p10733_p8), %v11376_v38 }
 0x414   : > { %11003 = vmatpush3.bf16.msra.mxu0 (!%p10733_p8), %v11374_v36  ;;  %11026 = vmatprep.subr.bf16.mxu1 (!%p10733_p8), %v11379_v41 }
 0x415   : > { %11004 = vmatprep.subr.bf16.mxu0 (!%p10733_p8), %v11377_v39 }
 0x417   : > { %11027 = vmatpush3.bf16.msra.mxu1 (!%p10733_p8), %v11380_v43 }
 0x418   : > { %11005 = vmatpush3.bf16.msra.mxu0 (!%p10733_p8), %v11378_v40  ;;  %11028 = vmatprep.subr.bf16.mxu1 (!%p10733_p8), %v11383_v47 }
 0x419   : > { %11006 = vmatprep.subr.bf16.mxu0 (!%p10733_p8), %v11381_v44 }
 0x41b   : > { %11029 = vmatpush3.bf16.msra.mxu1 (!%p10733_p8), %v11384_v48 }
 0x41c   : > { %11007 = vmatpush3.bf16.msra.mxu0 (!%p10733_p8), %v11382_v46  ;;  %11030 = vmatprep.subr.bf16.mxu1 (!%p10733_p8), %v11387_v51 }
 0x41d   : > { %11008 = vmatprep.subr.bf16.mxu0 (!%p10733_p8), %v11385_v49 }
 0x41f   : > { %11031 = vmatpush3.bf16.msra.mxu1 (!%p10733_p8), %v11388_v17  ;;  %v13096_v17 = vld [vmem:[#allocation2 + $0x8] sm:$0xff] (!%p10733_p8) }
 0x420   : > { %11009 = vmatpush3.bf16.msra.mxu0 (!%p10733_p8), %v11386_v50  ;;  %11032 = vmatprep.subr.bf16.mxu1 (!%p10733_p8), %v11391_v10 }
 0x421   : > { %11010 = vmatprep.subr.bf16.mxu0 (!%p10733_p8), %v11389_v53  ;;  %v7283_v53 = vcombine.high (!%p10733_p8), %v13096_v17, %v13096_v17 }
 0x423   : > { %11033 = vmatpush3.bf16.msra.mxu1 (!%p10733_p8), %v11392_v56 }
 0x424   : > { %11011 = vmatpush3.bf16.msra.mxu0 (!%p10733_p8), %v11390_v55  ;;  %11034 = vmatprep.subr.bf16.mxu1 (!%p10733_p8), %v11395_v59  ;;  %v7290_v55 = vrot.slane (!%p10733_p8), %v13096_v17, %v11988_v54 }
 0x425   : > { %11012 = vmatprep.subr.bf16.mxu0 (!%p10733_p8), %v11393_v57 }
 0x427   : > { %11035 = vmatpush3.bf16.msra.mxu1 (!%p10733_p8), %v11396_v61  ;;  %v7297_v61 = vrot.slane (!%p10733_p8), %v7283_v53, %v11988_v54 }
 0x428   : > { %11013 = vmatpush3.bf16.msra.mxu0 (!%p10733_p8), %v11394_v58  ;;  %11036 = vmatprep.subr.bf16.mxu1 (!%p10733_p8), %v11399_v2  ;;  %v13105_v58 = vsub.s32 (!%p10733_p8), 0, %v11981_v45 }
 0x429   : > { %11014 = vmatprep.subr.bf16.mxu0 (!%p10733_p8), %v11397_v62  ;;  %v7298_v62 = vcombine.high (!%p10733_p8), %v7290_v55, %v7290_v55  ;;  %v7299_v24 = vcombine.high (!%p10733_p8), %v7297_v61, %v7297_v61 }
 0x42b   : > { %11037 = vmatpush3.bf16.msra.mxu1 (!%p10733_p8), %v11400_v26  ;;  %v7386_v35 = vsel (!%p10733_p8), %vm7350_vm0, %v7298_v62, 0.0 }
 0x42c   : > { %11015 = vmatpush3.bf16.msra.mxu0 (!%p10733_p8), %v11398_v63  ;;  %11066 = vmatprep.subr.bf16.mxu1 (!%p10733_p8), %v11404_v9  ;;  %v7379_v63 = vsel (!%p10733_p8), %vm7350_vm0, %v7290_v55, 0.0 }
 0x42d   : > { %11044 = vmatprep.subr.bf16.mxu0 (!%p10733_p8), %v11402_v6  ;;  %v7380_v4 = vrot.slane (!%p10733_p8), %v7379_v63, 4 }
 0x42f   : > { %v7381_v9 = vadd.f32 (!%p10733_p8), %v7380_v4, %v7379_v63 }
 0x4e1   : > { %v6987_v16 = vpop.f32.mrb[12].mxu0  ;;  %v7151_v60 = vpop.f32.mrb[12].mxu1 }
 0x4e2   : > { %v6989_v19 = vpop.f32.mrb[13].mxu0  ;;  %v7153_v21 = vpop.f32.mrb[13].mxu1 }
 0x4e3   : > { %v7225_v20 = vcombine.low %v6987_v16, %v6989_v19  ;;  %v6991_v22 = vpop.f32.mrb[14].mxu0  ;;  %v7226_v23 = vcombine.low %v7151_v60, %v7153_v21  ;;  %v7155_v52 = vpop.f32.mrb[14].mxu1  ;;  %v7372_v16 = vsel (!%p10733_p8), %vm7350_vm0, %v7282_v11, 0.0  ;;  %v7354_v60 = vrot.slane (!%p10733_p8), %v7353_v14, 2 }
 0x4e4   : > { %v6992_v1 = vpop.f32.mrb[15].mxu0  ;;  %v7156_v27 = vpop.f32.mrb[15].mxu1  ;;  %v7360_v19 = vadd.f32 (!%p10733_p8), %v7359_v42, %v7358_v32  ;;  %v7373_v21 = vrot.slane (!%p10733_p8), %v7372_v16, 4  ;;  %v7393_v11 = vsel (!%p10733_p8), %vm7350_vm0, %v7297_v61, 0.0 }
 0x4e5   : > { %v7233_v25 = vrot.slane %v7225_v20, %v11988_v54  ;;  %v7240_v28 = vrot.slane %v7226_v23, %v11988_v54  ;;  %7257 = sbr.rel (%p10733_p8) target bundleno = 1661 (0x67d), region = 68  ;;  %v7367_v20 = vadd.f32 (!%p10733_p8), %v7366_v15, %v7365_v12  ;;  %v7355_v22 = vadd.f32 (!%p10733_p8), %v7354_v60, %v7353_v14 }
 0x4e6   : > { %v7361_v23 = vrot.slane (!%p10733_p8), %v7360_v19, 2  ;;  %v7374_v1 = vadd.f32 (!%p10733_p8), %v7373_v21, %v7372_v16  ;;  %v7382_v15 = vrot.slane (!%p10733_p8), %v7381_v9, 2  ;;  %v7387_v16 = vrot.slane (!%p10733_p8), %v7386_v35, 4 }
 0x4e7   : > { %v7241_v30 = vcombine.low %v7233_v25, %v7240_v28  ;;  %v7368_v52 = vrot.slane (!%p10733_p8), %v7367_v20, 2  ;;  %v7356_v25 = vrot.slane (!%p10733_p8), %v7355_v22, 1  ;;  %v7394_v60 = vrot.slane (!%p10733_p8), %v7393_v11, 4 }
 0x4e8   : > { %v7362_v27 = vadd.f32 (!%p10733_p8), %v7361_v23, %v7360_v19  ;;  %v7400_v19 = vsel (!%p10733_p8), %vm7350_vm0, %v7299_v24, 0.0 }
 0x4e9   : > { %v7249_v31 = vadd.f32 %v7241_v30, %v418_v29  ;;  %v7369_v28 = vadd.f32 (!%p10733_p8), %v7368_v52, %v7367_v20  ;;  %v7375_v29 = vrot.slane (!%p10733_p8), %v7374_v1, 2  ;;  %v7357_v30 = vadd.f32 (!%p10733_p8), %v7356_v25, %v7355_v22 }
 0x4ea   : > { %v7383_v52 = vadd.f32 (!%p10733_p8), %v7382_v15, %v7381_v9  ;;  %v7395_v25 = vadd.f32 (!%p10733_p8), %v7394_v60, %v7393_v11  ;;  %v13122_v9 = vsub.s32 (!%p10733_p8), 3, %v11981_v45 }
 0x4eb   : > { %7253 = vst [vmem:[#allocation2 + $0x18] sm:$0xff] %v7249_v31  ;;  %v7363_v31 = vrot.slane (!%p10733_p8), %v7362_v27, 1  ;;  %v7370_v13 = vrot.slane (!%p10733_p8), %v7369_v28, 1  ;;  %v7376_v33 = vadd.f32 (!%p10733_p8), %v7375_v29, %v7374_v1  ;;  %v7464_v36 = vmul.f32 (!%p10733_p8), 0.5, %v7357_v30 }
 0x4ec   : > { %v7388_v1 = vadd.f32 %v7387_v16, %v7386_v35  ;;  %v13124_v35 = vld [vmem:[#allocation5] sm:$0xff] }
 0x4ed   : > { %v7364_v34 = vadd.f32 %v7363_v31, %v7362_v27  ;;  %v7371_v18 = vadd.f32 %v7370_v13, %v7369_v28  ;;  %v7377_v0 = vrot.slane %v7376_v33, 1  ;;  %v7401_v27 = vrot.slane %v7400_v19, 4 }
 0x4ee   : > { %v7384_v13 = vrot.slane %v7383_v52, 1  ;;  %v7923_v15 = vrot.slane %v13124_v35, %v13105_v58 }
 0x4ef   : > { %v7378_v37 = vadd.f32 %v7377_v0, %v7376_v33  ;;  %v7465_v38 = vmul.f32 0.5, %v7364_v34  ;;  %v7466_v39 = vmul.f32 0.5, %v7371_v18  ;;  %v7389_v33 = vrot.slane %v7388_v1, 2 }
 0x4f0   : > { %v7396_v34 = vrot.slane %v7395_v25, 2  ;;  %v7402_v18 = vadd.f32 %v7401_v27, %v7400_v19  ;;  %v7935_v19 = vrot.slane %v13124_v35, %v13122_v9 }
 0x4f1   : > { %v7467_v40 = vmul.f32 0.5, %v7378_v37  ;;  %v7496_v41 = vcombine.low %v7464_v36, %v7465_v38 }
 0x4f3   : > { %v7497_v43 = vcombine.low %v7466_v39, %v7467_v40  ;;  %v7504_v44 = vrot.slane %v7496_v41, %v11988_v54  ;;  %v7385_v39 = vadd.f32 %v7384_v13, %v7383_v52  ;;  %v7390_v40 = vadd.f32 %v7389_v33, %v7388_v1 }
 0x4f4   : > { %v7397_v41 = vadd.f32 %v7396_v34, %v7395_v25 }
 0x4f5   : > { %v7511_v46 = vrot.slane %v7497_v43, %v11988_v54  ;;  %v7403_v43 = vrot.slane %v7402_v18, 2 }
 0x4f6   : > { %v7398_v53 = vrot.slane %v7397_v41, 1 }
 0x4f7   : > { %v7512_v47 = vcombine.low %v7504_v44, %v7511_v46  ;;  %v7404_v55 = vadd.f32 %v7403_v43, %v7402_v18 }
 0x4f8   : > { %v7399_v62 = vadd.f32 %v7398_v53, %v7397_v41 }
 0x4f9   : > { %v13091_v48 = vsub.f32 %v7258_v3, %v7512_v47  ;;  %v7405_v63 = vrot.slane %v7404_v55, 1 }
 0x4fb   : > { %v7572_v49 = vmul.f32 %v13091_v48, %v13091_v48 }
 0x4fd   : > { %v7580_v50 = vcombine.high %v7572_v49, %v7572_v49  ;;  %v7587_v51 = vrot.slane %v7572_v49, %v11988_v54 }
 0x4ff   : > { %v7594_v10 = vrot.slane %v7580_v50, %v11988_v54  ;;  %v7595_v56 = vcombine.high %v7587_v51, %v7587_v51  ;;  %v7664_v57 = vsel %vm7350_vm0, %v7587_v51, 0.0  ;;  %v13116_v50 = vsub.s32 1, %v11981_v45 }
 0x500   : > { %v7665_v59 = vrot.slane %v7664_v57, 4  ;;  %v7391_v51 = vrot.slane %v7390_v40, 1 }
 0x501   : > { %v7596_v2 = vcombine.high %v7594_v10, %v7594_v10  ;;  %v7671_v26 = vsel %vm7350_vm0, %v7595_v56, 0.0  ;;  %v7678_v3 = vsel %vm7350_vm0, %v7594_v10, 0.0  ;;  %v7927_v16 = vrot.slane %v13124_v35, %v13116_v50 }
 0x502   : > { %v7666_v5 = vadd.f32 %v7665_v59, %v7664_v57  ;;  %v7672_v6 = vrot.slane %v7671_v26, 4  ;;  %v7679_v7 = vrot.slane %v7678_v3, 4  ;;  %v7392_v61 = vadd.f32 %v7391_v51, %v7390_v40 }
 0x503   : > { %v7685_v8 = vsel %vm7350_vm0, %v7596_v2, 0.0  ;;  %v7468_v2 = vmul.f32 0.5, %v7385_v39  ;;  %v7984_v27 = vcombine.low %v7923_v15, %v7927_v16  ;;  %v13180_v16 = vsub.s32 7, %v11981_v45 }
 0x504   : > { %v7667_v32 = vrot.slane %v7666_v5, 2  ;;  %v7673_v12 = vadd.f32 %v7672_v6, %v7671_v26  ;;  %v7680_v14 = vadd.f32 %v7679_v7, %v7678_v3  ;;  %v7686_v42 = vrot.slane %v7685_v8, 4 }
 0x505   : > { %v7469_v6 = vmul.f32 0.5, %v7392_v61  ;;  %v7470_v7 = vmul.f32 0.5, %v7399_v62 }
 0x506   : > { %v7668_v20 = vadd.f32 %v7667_v32, %v7666_v5  ;;  %v7674_v21 = vrot.slane %v7673_v12, 2  ;;  %v7681_v22 = vrot.slane %v7680_v14, 2  ;;  %v7687_v23 = vadd.f32 %v7686_v42, %v7685_v8 }
 0x507   : > { %v7406_v5 = vadd.f32 %v7405_v63, %v7404_v55  ;;  %v13119_v8 = vsub.s32 2, %v11981_v45  ;;  %v7513_v32 = vcombine.low %v7468_v2, %v7469_v6  ;;  %v13171_v63 = vld [vmem:[#allocation2 + $0x10] sm:$0xff] }
 0x508   : > { %v7669_v28 = vrot.slane %v7668_v20, 1  ;;  %v7675_v29 = vadd.f32 %v7674_v21, %v7673_v12  ;;  %v7682_v30 = vadd.f32 %v7681_v22, %v7680_v14  ;;  %v7688_v31 = vrot.slane %v7687_v23, 2  ;;  %v13126_v12 = vld [vmem:[#allocation7] sm:$0xff] }
 0x509   : > { %v7471_v11 = vmul.f32 0.5, %v7406_v5  ;;  %v7521_v42 = vrot.slane %v7513_v32, %v11988_v54  ;;  %v7931_v60 = vrot.slane %v13124_v35, %v13119_v8  ;;  %v8067_v21 = vrot.slane %v13126_v12, %v13105_v58 }
 0x50a   : > { %v7670_v0 = vadd.f32 %v7669_v28, %v7668_v20  ;;  %v7676_v36 = vrot.slane %v7675_v29, 1  ;;  %v7683_v37 = vrot.slane %v7682_v30, 1  ;;  %v7689_v38 = vadd.f32 %v7688_v31, %v7687_v23 }
 0x50b   : > { %v7514_v14 = vcombine.low %v7470_v7, %v7471_v11  ;;  %v8071_v22 = vrot.slane %v13126_v12, %v13116_v50  ;;  %v8075_v23 = vrot.slane %v13126_v12, %v13119_v8  ;;  %v8079_v52 = vrot.slane %v13126_v12, %v13122_v9 }
 0x50c   : > { %v7677_v44 = vadd.f32 %v7676_v36, %v7675_v29  ;;  %v7684_v46 = vadd.f32 %v7683_v37, %v7682_v30  ;;  %v7690_v47 = vrot.slane %v7689_v38, 1  ;;  %v7776_v49 = vmul.f32 0.5, %v7670_v0 }
 0x50d   : > { %v7528_v20 = vrot.slane %v7514_v14, %v11988_v54  ;;  %v7985_v28 = vcombine.low %v7931_v60, %v7935_v19  ;;  %v8128_v31 = vcombine.low %v8067_v21, %v8071_v22  ;;  %v8129_v13 = vcombine.low %v8075_v23, %v8079_v52 }
 0x50e   : > { %v7691_v10 = vadd.f32 %v7690_v47, %v7689_v38  ;;  %v7777_v56 = vmul.f32 0.5, %v7677_v44  ;;  %v7778_v57 = vmul.f32 0.5, %v7684_v46  ;;  %v7792_v59 = vadd.f32 1e-05, %v7776_v49 }
 0x50f   : > { %v7529_v1 = vcombine.low %v7521_v42, %v7528_v20  ;;  %v7992_v36 = vrot.slane %v7984_v27, %v11988_v54  ;;  %v7999_v37 = vrot.slane %v7985_v28, %v11988_v54  ;;  %v8136_v41 = vrot.slane %v8128_v31, %v11988_v54 }
 0x510   : > { %v7779_v26 = vmul.f32 0.5, %v7691_v10  ;;  %v7793_v3 = vadd.f32 1e-05, %v7777_v56  ;;  %v7794_v4 = vadd.f32 1e-05, %v7778_v57  ;;  %11501 = vrsqrt.f32 %v7792_v59 }
 0x511   : > { %v13147_v29 = vsub.f32 %v13096_v17, %v7529_v1  ;;  %v8143_v43 = vrot.slane %v8129_v13, %v11988_v54  ;;  %v13158_v44 = vsub.s32 4, %v11981_v45  ;;  %v13161_v46 = vsub.s32 5, %v11981_v45 }
 0x512   : > { %v7795_v24 = vadd.f32 1e-05, %v7779_v26  ;;  %11503 = vrsqrt.f32 %v7793_v3  ;;  %v8000_v55 = vcombine.low %v7992_v36, %v7999_v37  ;;  %v13167_v56 = vsub.s32 6, %v11981_v45 }
 0x513   : > { %11505 = vrsqrt.f32 %v7794_v4  ;;  %v7573_v18 = vmul.f32 %v13147_v29, %v13147_v29  ;;  %v8144_v2 = vcombine.low %v8136_v41, %v8143_v43  ;;  %v7300_v7 = vcombine.high %v13171_v63, %v13171_v63 }
 0x514   : > { %11507 = vrsqrt.f32 %v7795_v24  ;;  %v7307_v24 = vrot.slane %v13171_v63, %v11988_v54 }
 0x515   : > { %v7597_v40 = vcombine.high %v7573_v18, %v7573_v18  ;;  %v7604_v17 = vrot.slane %v7573_v18, %v11988_v54  ;;  %v7314_v52 = vrot.slane %v7300_v7, %v11988_v54  ;;  %v11405_v7 = vld [vmem:[%s13621_s4 + $0x180] sm:$0xff]  }
 0x516   : > { %v7315_v60 = vcombine.high %v7307_v24, %v7307_v24  ;;  %v7407_v19 = vsel %vm7350_vm0, %v7307_v24, 0.0 }
 0x517   : > { %v7611_v49 = vrot.slane %v7597_v40, %v11988_v54  ;;  %v7612_v51 = vcombine.high %v7604_v17, %v7604_v17  ;;  %v7692_v53 = vsel %vm7350_vm0, %v7604_v17, 0.0  ;;  %v7408_v1 = vrot.slane %v7407_v19, 4 }
 0x518   : > { %v7693_v10 = vrot.slane %v7692_v53, 4 }
 0x519   : > { %v7613_v59 = vcombine.high %v7611_v49, %v7611_v49  ;;  %v7699_v61 = vsel %vm7350_vm0, %v7612_v51, 0.0  ;;  %v7706_v62 = vsel %vm7350_vm0, %v7611_v49, 0.0  ;;  %v7409_v13 = vadd.f32 %v7408_v1, %v7407_v19  ;;  %v11407_v19 = vld [vmem:[%s13621_s4 + $0x108] sm:$0xff]  }
 0x51a   : > { %v11502_v25 = vpop.eup %11501  ;;  %v7694_v26 = vadd.f32 %v7693_v10, %v7692_v53  ;;  %v7700_v3 = vrot.slane %v7699_v61, 4  ;;  %v7707_v4 = vrot.slane %v7706_v62, 4 }
 0x51b   : > { %v7713_v6 = vsel %vm7350_vm0, %v7613_v59, 0.0 }
 0x51c   : > { %v11504_v30 = vpop.eup %11503  ;;  %v7695_v11 = vrot.slane %v7694_v26, 2  ;;  %v7701_v32 = vadd.f32 %v7700_v3, %v7699_v61  ;;  %v7708_v14 = vadd.f32 %v7707_v4, %v7706_v62  ;;  %v7714_v42 = vrot.slane %v7713_v6, 4 }
 0x51d   : > { %v11506_v33 = vpop.eup %11505  ;;  %v7840_v34 = vcombine.low %v11502_v25, %v11504_v30  ;;  %v7414_v25 = vsel %vm7350_vm0, %v7315_v60, 0.0 }
 0x51e   : > { %v11508_v0 = vpop.eup %11507  ;;  %v7702_v20 = vrot.slane %v7701_v32, 2  ;;  %v7709_v21 = vrot.slane %v7708_v14, 2  ;;  %v7715_v22 = vadd.f32 %v7714_v42, %v7713_v6 }
 0x51f   : > { %v7841_v38 = vcombine.low %v11506_v33, %v11508_v0  ;;  %v7848_v39 = vrot.slane %v7840_v34, %v11988_v54  ;;  %v7415_v33 = vrot.slane %v7414_v25, 4 }
 0x520   : > { %v7703_v28 = vadd.f32 %v7702_v20, %v7701_v32  ;;  %v7710_v30 = vadd.f32 %v7709_v21, %v7708_v14  ;;  %v7716_v31 = vrot.slane %v7715_v22, 2  ;;  %v11406_v14 = vld [vmem:[%s13621_s4 + $0x148] sm:$0xff]  }
 0x521   : > { %v7855_v47 = vrot.slane %v7841_v38, %v11988_v54  ;;  %v7316_v38 = vcombine.high %v7314_v52, %v7314_v52  ;;  %v7416_v40 = vadd.f32 %v7415_v33, %v7414_v25  ;;  %v11408_v21 = vld [vmem:[%s13621_s4 + $0x1c8] sm:$0xff]  }
 0x522   : > { %v7704_v18 = vrot.slane %v7703_v28, 1  ;;  %v7711_v0 = vrot.slane %v7710_v30, 1  ;;  %v7717_v36 = vadd.f32 %v7716_v31, %v7715_v22  ;;  %v11411_v31 = vld [vmem:[%s13621_s4 + $0x110] sm:$0xff]  }
 0x523   : > { %v7856_v57 = vcombine.low %v7848_v39, %v7855_v47  ;;  %v7410_v39 = vrot.slane %v7409_v13, 2  ;;  %v7417_v61 = vrot.slane %v7416_v40, 2 }
 0x524   : > { %v7705_v43 = vadd.f32 %v7704_v18, %v7703_v28  ;;  %v7712_v47 = vadd.f32 %v7711_v0, %v7710_v30  ;;  %v7718_v49 = vrot.slane %v7717_v36, 1  ;;  %v11410_v30 = vld [vmem:[%s13621_s4 + $0x150] sm:$0xff]   ;;  %v7939_v18 = vrot.slane %v13124_v35, %v13158_v44 }
 0x525   : > { %v7912_v5 = vmul.f32 %v7856_v57, %v13091_v48  ;;  %v7696_v48 = vadd.f32 %v7695_v11, %v7694_v26  ;;  %v7411_v53 = vadd.f32 %v7410_v39, %v7409_v13  ;;  %v7943_v0 = vrot.slane %v13124_v35, %v13161_v46 }
 0x526   : > { %v7781_v59 = vmul.f32 0.5, %v7705_v43  ;;  %v7719_v26 = vadd.f32 %v7718_v49, %v7717_v36  ;;  %v7782_v3 = vmul.f32 0.5, %v7712_v47  ;;  %v7947_v36 = vrot.slane %v13124_v35, %v13167_v56 }
 0x527   : > { %v8056_v15 = vmul.f32 %v8000_v55, %v7912_v5  ;;  %v7697_v27 = vrot.slane %v7696_v48, 1  ;;  %v7421_v55 = vsel %vm7350_vm0, %v7314_v52, 0.0  ;;  %v7412_v11 = vrot.slane %v7411_v53, 1  ;;  %v11409_v52 = vld [vmem:[%s13621_s4 + $0x188] sm:$0xff]  }
 0x528   : > { %v7797_v24 = vadd.f32 1e-05, %v7781_v59  ;;  %v7783_v42 = vmul.f32 0.5, %v7719_v26  ;;  %v7422_v20 = vrot.slane %v7421_v55, 4  ;;  %v7951_v39 = vrot.slane %v13124_v35, %v13180_v16 }
 0x529   : > { %v8200_v23 = vadd.f32 %v8144_v2, %v8056_v15  ;;  %v7698_v34 = vadd.f32 %v7697_v27, %v7696_v48  ;;  %v11403_v2 = vld [vmem:[%s13621_s4 + $0x100] sm:$0xff]   ;;  %v7798_v15 = vadd.f32 1e-05, %v7782_v3  ;;  %v7418_v48 = vadd.f32 %v7417_v61, %v7416_v40 }
 0x52a   : > { %v7799_v22 = vadd.f32 1e-05, %v7783_v42  ;;  %v7413_v1 = vadd.f32 %v7412_v11, %v7411_v53  ;;  %v7423_v27 = vadd.f32 %v7422_v20, %v7421_v55  ;;  %v8083_v43 = vrot.slane %v13126_v12, %v13158_v44 }
 0x52b   : > { %vm8204_vm1 = vcmp.ge.f32.partialorder %v8200_v23, 0.0  ;;  %v8208_v45 = vmul.f32 0.2, %v8200_v23  ;;  %v7780_v51 = vmul.f32 0.5, %v7698_v34  ;;  %v7419_v25 = vrot.slane %v7418_v48, 1  ;;  %v11412_v34 = vld [vmem:[%s13621_s4 + $0x1d0] sm:$0xff]  }
 0x52c   : > { %v7424_v13 = vrot.slane %v7423_v27, 2  ;;  %v8087_v47 = vrot.slane %v13126_v12, %v13161_v46  ;;  %v8091_v49 = vrot.slane %v13126_v12, %v13167_v56  ;;  %v8001_v59 = vcombine.low %v7939_v18, %v7943_v0  ;;  %v11426_v18 = vld [vmem:[%s13621_s4 + $0x170] sm:$0xff]   ;;  %v11425_v0 = vld [vmem:[%s13621_s4 + $0x1a8] sm:$0xff]  }
 0x52d   : > { %v8212_v37 = vsel %vm8204_vm1, %v8200_v23, %v8208_v45  ;;  %v7796_v4 = vadd.f32 1e-05, %v7780_v51  ;;  %v7428_v23 = vsel %vm7350_vm0, %v7316_v38, 0.0  ;;  %v7420_v45 = vadd.f32 %v7419_v25, %v7418_v48  ;;  %v11414_v38 = vld [vmem:[%s13621_s4 + $0x158] sm:$0xff]  }
 0x52e   : > { %v8227_v17 = vrot.slane %v8212_v37, %v11988_v54  ;;  %v8220_v41 = vcombine.high %v8212_v37, %v8212_v37  ;;  %v7429_v28 = vrot.slane %v7428_v23, 4  ;;  %v11413_v37 = vld [vmem:[%s13621_s4 + $0x190] sm:$0xff]   ;;  %v7425_v40 = vadd.f32 %v7424_v13, %v7423_v27 }
 0x52f   : > { %11509 = vrsqrt.f32 %v7796_v4  ;;  %v8095_v51 = vrot.slane %v13126_v12, %v13180_v16  ;;  %v7473_v35 = vmul.f32 0.5, %v7420_v45  ;;  %v11418_v4 = vld [vmem:[%s13621_s4 + $0x160] sm:$0xff]   ;;  %v11423_v45 = vld [vmem:[%s13621_s4 + $0x128] sm:$0xff]  }
 0x530   : > { %v8235_v10 = vcombine.high %v8227_v17, %v8227_v17  ;;  %v8234_v57 = vrot.slane %v8220_v41, %v11988_v54  ;;  %v8304_v62 = vpack.c.bf16 %v8227_v17, %v8227_v17  ;;  %11511 = vrsqrt.f32 %v7797_v24 }
 0x531   : > { %11513 = vrsqrt.f32 %v7798_v15  ;;  %v7430_v33 = vadd.f32 %v7429_v28, %v7428_v23  ;;  %v7472_v41 = vmul.f32 0.5, %v7413_v1  ;;  %v7426_v53 = vrot.slane %v7425_v40, 1  ;;  %v11420_v15 = vld [vmem:[%s13621_s4 + $0x1e0] sm:$0xff]   ;;  %v11422_v23 = vld [vmem:[%s13621_s4 + $0x168] sm:$0xff]  }
 0x532   : > { %v8305_v5 = vpack.c.bf16 %v8235_v10, %v8235_v10  ;;  %v8236_v6 = vcombine.high %v8234_v57, %v8234_v57  ;;  %v8306_v32 = vpack.c.bf16 %v8234_v57, %v8234_v57  ;;  %11515 = vrsqrt.f32 %v7799_v22  ;;  %v11416_v57 = vld [vmem:[%s13621_s4 + $0x1d8] sm:$0xff]   ;;  %v11421_v1 = vld [vmem:[%s13621_s4 + $0x1a0] sm:$0xff]  }
 0x533   : > { %v7431_v17 = vrot.slane %v7430_v33, 2  ;;  %v7427_v26 = vadd.f32 %v7426_v53, %v7425_v40  ;;  %v8146_v24 = vcombine.low %v8091_v49, %v8095_v51  ;;  %v11428_v40 = vld [vmem:[%s13621_s4 + $0x1f0] sm:$0xff]   ;;  %v11430_v49 = vld [vmem:[%s13621_s4 + $0x178] sm:$0xff]  }
 0x534   : > { %8871 = vmatprep.mubr.bf16.mxu0 %v8305_v5  ;;  %v8307_v60 = vpack.c.bf16 %v8236_v6, %v8236_v6  ;;  %v8145_v6 = vcombine.low %v8083_v43, %v8087_v47 }
 0x535   : > { %8872 = vmatmul.mubr.bf16.vlgmr.msra.gmra.mrb[0].mxu0 %v8304_v62  ;;  %v7432_v55 = vadd.f32 %v7431_v17, %v7430_v33  ;;  %v11415_v62 = vld [vmem:[%s13621_s4 + $0x118] sm:$0xff]   ;;  %v8160_v27 = vrot.slane %v8146_v24, %v11988_v54 }
 0x536   : > { %11045 = vmatpush3.bf16.msra.mxu0 %v11403_v2  ;;  %8911 = vmatprep.mubr.bf16.mxu1 %v8307_v60  ;;  %v8002_v2 = vcombine.low %v7947_v36, %v7951_v39  ;;  %v8009_v60 = vrot.slane %v8001_v59, %v11988_v54  ;;  %v13283_v39 = vld [vmem:[#allocation2 + $0x18] sm:$0xff] }
 0x537   : > { %8912 = vmatmul.mubr.bf16.vlgmr.msra.gmra.mrb[0].mxu1 %v8306_v32  ;;  %11046 = vmatprep.subr.bf16.mxu0 %v11406_v14  ;;  %v7433_v3 = vrot.slane %v7432_v55, 1  ;;  %v7474_v32 = vmul.f32 0.5, %v7427_v26  ;;  %v7530_v14 = vcombine.low %v7472_v41, %v7473_v35  ;;  %v7317_v17 = vcombine.high %v13283_v39, %v13283_v39  ;;  %v11429_v35 = vld [vmem:[%s13621_s4 + $0x1b0] sm:$0xff]   ;;  %v11432_v59 = vld [vmem:[%s13621_s4 + $0x1f8] sm:$0xff]  }
 0x538   : > { %11067 = vmatpush3.bf16.msra.mxu1 %v11405_v7  ;;  %v11417_v7 = vld [vmem:[%s13621_s4 + $0x198] sm:$0xff]   ;;  %v7324_v41 = vrot.slane %v13283_v39, %v11988_v54 }
 0x539   : > { %11068 = vmatprep.subr.bf16.mxu1 %v11408_v21  ;;  %v11510_v10 = vpop.eup %11509  ;;  %v7434_v11 = vadd.f32 %v7433_v3, %v7432_v55  ;;  %v8016_v21 = vrot.slane %v8002_v2, %v11988_v54  ;;  %v7331_v51 = vrot.slane %v7317_v17, %v11988_v54  ;;  %v11431_v26 = vld [vmem:[%s13621_s4 + $0x138] sm:$0xff]  }
 0x53a   : > { %11047 = vmatpush3.bf16.msra.mxu0 %v11407_v19  ;;  %v11512_v61 = vpop.eup %11511  ;;  %v11419_v19 = vld [vmem:[%s13621_s4 + $0x120] sm:$0xff]   ;;  %v7332_v53 = vcombine.high %v7324_v41, %v7324_v41  ;;  %v7435_v55 = vsel %vm7350_vm0, %v7324_v41, 0.0 }
 0x53b   : > { %11048 = vmatprep.subr.bf16.mxu0 %v11410_v30  ;;  %v11514_v12 = vpop.eup %11513  ;;  %v7857_v5 = vcombine.low %v11510_v10, %v11512_v61  ;;  %v7475_v22 = vmul.f32 0.5, %v7434_v11  ;;  %v7538_v30 = vrot.slane %v7530_v14, %v11988_v54  ;;  %v8017_v33 = vcombine.low %v8009_v60, %v8016_v21  ;;  %v11434_v14 = vld [vmem:[%s13621_s4 + $0x1b8] sm:$0xff]  }
 0x53c   : > { %11069 = vmatpush3.bf16.msra.mxu1 %v11409_v52  ;;  %v11516_v42 = vpop.eup %11515  ;;  %v8153_v52 = vrot.slane %v8145_v6, %v11988_v54  ;;  %v7333_v61 = vcombine.high %v7331_v51, %v7331_v51  ;;  %v7449_v2 = vsel %vm7350_vm0, %v7331_v51, 0.0  ;;  %v11438_v51 = vld [vmem:[%s13621_s4 + $0x280] sm:$0xff]  }
 0x53d   : > { %11070 = vmatprep.subr.bf16.mxu1 %v11412_v34  ;;  %v7858_v48 = vcombine.low %v11514_v12, %v11516_v42  ;;  %v7865_v20 = vrot.slane %v7857_v5, %v11988_v54  ;;  %v7531_v28 = vcombine.low %v7474_v32, %v7475_v22  ;;  %v11435_v5 = vld [vmem:[%s13621_s4 + $0x240] sm:$0xff]   ;;  %v7450_v24 = vrot.slane %v7449_v2, 4 }
 0x53e   : > { %11049 = vmatpush3.bf16.msra.mxu0 %v11411_v31  ;;  %v11424_v31 = vld [vmem:[%s13621_s4 + $0x1e8] sm:$0xff]   ;;  %v13321_v11 = vsel %vm7350_vm0, %v7333_v61, 0.0 }
 0x53f   : > { %11050 = vmatprep.subr.bf16.mxu0 %v11414_v38  ;;  %v7872_v25 = vrot.slane %v7858_v48, %v11988_v54  ;;  %v7545_v34 = vrot.slane %v7531_v28, %v11988_v54  ;;  %v11440_v61 = vld [vmem:[%s13621_s4 + $0x208] sm:$0xff]  }
 0x540   : > { %11071 = vmatpush3.bf16.msra.mxu1 %v11413_v37  ;;  %v8161_v37 = vcombine.low %v8153_v52, %v8160_v27 }
 0x541   : > { %11072 = vmatprep.subr.bf16.mxu1 %v11416_v57  ;;  %v7873_v13 = vcombine.low %v7865_v20, %v7872_v25  ;;  %v7546_v38 = vcombine.low %v7538_v30, %v7545_v34  ;;  %v7436_v57 = vrot.slane %v7435_v55, 4  ;;  %v11437_v20 = vld [vmem:[%s13621_s4 + $0x2c0] sm:$0xff]  }
 0x542   : > { %11051 = vmatpush3.bf16.msra.mxu0 %v11415_v62  ;;  %v7442_v62 = vsel %vm7350_vm0, %v7332_v53, 0.0 }
 0x543   : > { %11052 = vmatprep.subr.bf16.mxu0 %v11418_v4  ;;  %v7913_v36 = vmul.f32 %v7873_v13, %v13147_v29  ;;  %v11427_v29 = vld [vmem:[%s13621_s4 + $0x130] sm:$0xff]   ;;  %v13296_v47 = vsub.f32 %v13171_v63, %v7546_v38  ;;  %v7437_v6 = vadd.f32 %v7436_v57, %v7435_v55 }
 0x544   : > { %11073 = vmatpush3.bf16.msra.mxu1 %v11417_v7  ;;  %v7443_v7 = vrot.slane %v7442_v62, 4 }
 0x545   : > { %11074 = vmatprep.subr.bf16.mxu1 %v11420_v15  ;;  %v8057_v43 = vmul.f32 %v8017_v33, %v7913_v36  ;;  %v7574_v63 = vmul.f32 %v13296_v47, %v13296_v47  ;;  %v7438_v22 = vrot.slane %v7437_v6, 2  ;;  %v11436_v36 = vld [vmem:[%s13621_s4 + $0x200] sm:$0xff]  }
 0x546   : > { %11053 = vmatpush3.bf16.msra.mxu0 %v11419_v19  ;;  %v7444_v25 = vadd.f32 %v7443_v7, %v7442_v62 }
 0x547   : > { %11054 = vmatprep.subr.bf16.mxu0 %v11422_v23  ;;  %v8201_v10 = vadd.f32 %v8161_v37, %v8057_v43  ;;  %v7614_v12 = vcombine.high %v7574_v63, %v7574_v63  ;;  %v7621_v4 = vrot.slane %v7574_v63, %v11988_v54  ;;  %v7439_v34 = vadd.f32 %v7438_v22, %v7437_v6 }
 0x548   : > { %11075 = vmatpush3.bf16.msra.mxu1 %v11421_v1  ;;  %v7445_v55 = vrot.slane %v7444_v25, 2 }
 0x549   : > { %11076 = vmatprep.subr.bf16.mxu1 %v11424_v31  ;;  %vm8205_vm2 = vcmp.ge.f32.partialorder %v8201_v10, 0.0  ;;  %v8209_v3 = vmul.f32 0.2, %v8201_v10  ;;  %v7628_v42 = vrot.slane %v7614_v12, %v11988_v54  ;;  %v7629_v15 = vcombine.high %v7621_v4, %v7621_v4 }
 0x54a   : > { %11055 = vmatpush3.bf16.msra.mxu0 %v11423_v45  ;;  %v7720_v60 = vsel %vm7350_vm0, %v7621_v4, 0.0  ;;  %v7440_v43 = vrot.slane %v7439_v34, 1  ;;  %v7457_v12 = vrot.slane %v13321_v11, 4 }
 0x54b   : > { %11056 = vmatprep.subr.bf16.mxu0 %v11426_v18  ;;  %v8213_v32 = vsel %vm8205_vm2, %v8201_v10, %v8209_v3  ;;  %v7721_v21 = vrot.slane %v7720_v60, 4  ;;  %v7630_v23 = vcombine.high %v7628_v42, %v7628_v42  ;;  %v7727_v52 = vsel %vm7350_vm0, %v7629_v15, 0.0  ;;  %v11441_v10 = vld [vmem:[%s13621_s4 + $0x2c8] sm:$0xff]  }
 0x54c   : > { %11077 = vmatpush3.bf16.msra.mxu1 %v11425_v0  ;;  %v8244_v19 = vrot.slane %v8213_v32, %v11988_v54  ;;  %v8237_v48 = vcombine.high %v8213_v32, %v8213_v32  ;;  %v7734_v1 = vsel %vm7350_vm0, %v7628_v42, 0.0  ;;  %v7728_v45 = vrot.slane %v7727_v52, 4 }
 0x54d   : > { %11078 = vmatprep.subr.bf16.mxu1 %v11428_v40  ;;  %v7722_v31 = vadd.f32 %v7721_v21, %v7720_v60  ;;  %v7735_v13 = vrot.slane %v7734_v1, 4  ;;  %v7741_v33 = vsel %vm7350_vm0, %v7630_v23, 0.0  ;;  %v11439_v40 = vld [vmem:[%s13621_s4 + $0x248] sm:$0xff]   ;;  %v7441_v7 = vadd.f32 %v7440_v43, %v7439_v34  ;;  %v11445_v60 = vld [vmem:[%s13621_s4 + $0x2d0] sm:$0xff]  }
 0x54e   : > { %11057 = vmatpush3.bf16.msra.mxu0 %v11427_v29  ;;  %v8252_v27 = vcombine.high %v8244_v19, %v8244_v19  ;;  %v8308_v28 = vpack.c.bf16 %v8244_v19, %v8244_v19  ;;  %v8251_v30 = vrot.slane %v8237_v48, %v11988_v54  ;;  %v7729_v17 = vadd.f32 %v7728_v45, %v7727_v52  ;;  %v11444_v21 = vld [vmem:[%s13621_s4 + $0x210] sm:$0xff]  }
 0x54f   : > { %11058 = vmatprep.subr.bf16.mxu0 %v11430_v49  ;;  %v7723_v38 = vrot.slane %v7722_v31, 2  ;;  %v7736_v41 = vadd.f32 %v7735_v13, %v7734_v1  ;;  %v7742_v29 = vrot.slane %v7741_v33, 4  ;;  %v7458_v15 = vadd.f32 %v7457_v12, %v13321_v11  ;;  %v11447_v11 = vld [vmem:[%s13621_s4 + $0x258] sm:$0xff]  }
 0x550   : > { %11079 = vmatpush3.bf16.msra.mxu1 %v11429_v35  ;;  %v8309_v18 = vpack.c.bf16 %v8252_v27, %v8252_v27  ;;  %v8253_v0 = vcombine.high %v8251_v30, %v8251_v30  ;;  %v8310_v37 = vpack.c.bf16 %v8251_v30, %v8251_v30  ;;  %v7451_v35 = vadd.f32 %v7450_v24, %v7449_v2  ;;  %v11443_v2 = vld [vmem:[%s13621_s4 + $0x250] sm:$0xff]   ;;  %v11442_v24 = vld [vmem:[%s13621_s4 + $0x288] sm:$0xff]  }
 0x551   : > { %11080 = vmatprep.subr.bf16.mxu1 %v11432_v59  ;;  %v7724_v53 = vadd.f32 %v7723_v38, %v7722_v31  ;;  %v7730_v63 = vrot.slane %v7729_v17, 2  ;;  %v7737_v57 = vrot.slane %v7736_v41, 2  ;;  %v7743_v59 = vadd.f32 %v7742_v29, %v7741_v33  ;;  %v11446_v31 = vld [vmem:[%s13621_s4 + $0x290] sm:$0xff]   ;;  %v11448_v38 = vld [vmem:[%s13621_s4 + $0x218] sm:$0xff]  }
 0x552   : > { %11059 = vmatpush3.bf16.msra.mxu0 %v11431_v26  ;;  %8951 = vmatprep.mubr.bf16.mxu0 %v8309_v18  ;;  %v8311_v49 = vpack.c.bf16 %v8253_v0, %v8253_v0  ;;  %v7446_v26 = vadd.f32 %v7445_v55, %v7444_v25  ;;  %v7452_v3 = vrot.slane %v7451_v35, 2  ;;  %v7459_v1 = vrot.slane %v7458_v15, 2  ;;  %v11449_v18 = vld [vmem:[%s13621_s4 + $0x2d8] sm:$0xff]  }
 0x553   : > { %11088 = vmatprep.subr.bf16.mxu0 %v11435_v5  ;;  %v7725_v62 = vrot.slane %v7724_v53, 1  ;;  %v7731_v4 = vadd.f32 %v7730_v63, %v7729_v17  ;;  %v7738_v5 = vadd.f32 %v7737_v57, %v7736_v41  ;;  %v7744_v6 = vrot.slane %v7743_v59, 2  ;;  %v11451_v17 = vld [vmem:[%s13621_s4 + $0x260] sm:$0xff]   ;;  %v13389_v57 = vld [vmem:[#allocation5 + $0x8] sm:$0xff] }
 0x554   : > { %11081 = vmatpush3.bf16.msra.mxu1 %v11434_v14  ;;  %8991 = vmatprep.mubr.bf16.mxu1 %v8311_v49  ;;  %v7447_v14 = vrot.slane %v7446_v26, 1  ;;  %v7453_v42 = vadd.f32 %v7452_v3, %v7451_v35  ;;  %v7476_v30 = vmul.f32 0.5, %v7441_v7  ;;  %v7460_v33 = vadd.f32 %v7459_v1, %v7458_v15  ;;  %v11450_v49 = vld [vmem:[%s13621_s4 + $0x298] sm:$0xff]   ;;  %v11453_v35 = vld [vmem:[%s13621_s4 + $0x2e0] sm:$0xff]  }
 0x555   : > { %11110 = vmatprep.subr.bf16.mxu1 %v11437_v20  ;;  %8952 = vmatmul.mubr.bf16.vlgmr.msra.gmra.mrb[4].mxu0 %v8308_v28  ;;  %v7726_v32 = vadd.f32 %v7725_v62, %v7724_v53  ;;  %v7732_v19 = vrot.slane %v7731_v4, 1  ;;  %v7739_v48 = vrot.slane %v7738_v5, 1  ;;  %v7745_v20 = vadd.f32 %v7744_v6, %v7743_v59  ;;  %v11452_v63 = vld [vmem:[%s13621_s4 + $0x220] sm:$0xff]  }
 0x556   : > { %11089 = vmatpush3.bf16.msra.mxu0 %v11436_v36  ;;  %v7448_v23 = vadd.f32 %v7447_v14, %v7446_v26  ;;  %v7454_v52 = vrot.slane %v7453_v42, 1  ;;  %v11454_v62 = vld [vmem:[%s13621_s4 + $0x2a0] sm:$0xff]   ;;  %v13397_v26 = vld [vmem:[#allocation7 + $0x8] sm:$0xff]  ;;  %v7963_v6 = vrot.slane %v13389_v57, %v13119_v8  ;;  %v7967_v7 = vrot.slane %v13389_v57, %v13122_v9  ;;  %v11459_v14 = vld [vmem:[%s13621_s4 + $0x270] sm:$0xff]  }
 0x557   : > { %8992 = vmatmul.mubr.bf16.vlgmr.msra.gmra.mrb[4].mxu1 %v8310_v37  ;;  %11090 = vmatprep.subr.bf16.mxu0 %v11439_v40  ;;  %v7784_v22 = vmul.f32 0.5, %v7726_v32  ;;  %v7733_v25 = vadd.f32 %v7732_v19, %v7731_v4  ;;  %v7740_v27 = vadd.f32 %v7739_v48, %v7738_v5  ;;  %v7746_v28 = vrot.slane %v7745_v20, 1  ;;  %v11458_v48 = vld [vmem:[%s13621_s4 + $0x2a8] sm:$0xff]  }
 0x558   : > { %11111 = vmatpush3.bf16.msra.mxu1 %v11438_v51  ;;  %v7455_v13 = vadd.f32 %v7454_v52, %v7453_v42  ;;  %v7477_v34 = vmul.f32 0.5, %v7448_v23  ;;  %v7461_v40 = vrot.slane %v7460_v33, 1  ;;  %v7955_v4 = vrot.slane %v13389_v57, %v13105_v58  ;;  %v11463_v52 = vld [vmem:[%s13621_s4 + $0x278] sm:$0xff]  }
 0x559   : > { %11112 = vmatprep.subr.bf16.mxu1 %v11441_v10  ;;  %v7800_v45 = vadd.f32 1e-05, %v7784_v22  ;;  %v7747_v0 = vadd.f32 %v7746_v28, %v7745_v20  ;;  %v7785_v36 = vmul.f32 0.5, %v7733_v25  ;;  %v7786_v37 = vmul.f32 0.5, %v7740_v27  ;;  %v11462_v27 = vld [vmem:[%s13621_s4 + $0x2b0] sm:$0xff]  }
 0x55a   : > { %11091 = vmatpush3.bf16.msra.mxu0 %v11440_v61  ;;  %v7462_v51 = vadd.f32 %v7461_v40, %v7460_v33  ;;  %v7478_v53 = vmul.f32 0.5, %v7455_v13  ;;  %v7547_v55 = vcombine.low %v7476_v30, %v7477_v34  ;;  %v11455_v61 = vld [vmem:[%s13621_s4 + $0x268] sm:$0xff]   ;;  %v7959_v5 = vrot.slane %v13389_v57, %v13116_v50  ;;  %v11464_v33 = vld [vmem:[%s13621_s4 + $0x238] sm:$0xff]   ;;  %v11468_v40 = vld [vmem:[%s13621_s4 + $0x340] sm:$0xff]  }
 0x55b   : > { %11092 = vmatprep.subr.bf16.mxu0 %v11443_v2  ;;  %v7787_v41 = vmul.f32 0.5, %v7747_v0  ;;  %v7801_v29 = vadd.f32 1e-05, %v7785_v36  ;;  %v7802_v43 = vadd.f32 1e-05, %v7786_v37  ;;  %11517 = vrsqrt.f32 %v7800_v45  ;;  %v11457_v2 = vld [vmem:[%s13621_s4 + $0x2e8] sm:$0xff]  }
 0x55c   : > { %11113 = vmatpush3.bf16.msra.mxu1 %v11442_v24  ;;  %v7479_v59 = vmul.f32 0.5, %v7462_v51  ;;  %v7555_v12 = vrot.slane %v7547_v55, %v11988_v54  ;;  %v11456_v24 = vld [vmem:[%s13621_s4 + $0x228] sm:$0xff]   ;;  %v8099_v42 = vrot.slane %v13397_v26, %v13105_v58  ;;  %v8103_v15 = vrot.slane %v13397_v26, %v13116_v50  ;;  %v11461_v58 = vld [vmem:[%s13621_s4 + $0x2f0] sm:$0xff]  }
 0x55d   : > { %11114 = vmatprep.subr.bf16.mxu1 %v11445_v60  ;;  %v7803_v10 = vadd.f32 1e-05, %v7787_v41  ;;  %11519 = vrsqrt.f32 %v7801_v29  ;;  %v8107_v60 = vrot.slane %v13397_v26, %v13119_v8  ;;  %v8111_v19 = vrot.slane %v13397_v26, %v13122_v9  ;;  %v11460_v8 = vld [vmem:[%s13621_s4 + $0x230] sm:$0xff]   ;;  %v11467_v41 = vld [vmem:[%s13621_s4 + $0x2b8] sm:$0xff]  }
 0x55e   : > { %11093 = vmatpush3.bf16.msra.mxu0 %v11444_v21  ;;  %11521 = vrsqrt.f32 %v7802_v43  ;;  %v7548_v3 = vcombine.low %v7478_v53, %v7479_v59  ;;  %v8018_v22 = vcombine.low %v7955_v4, %v7959_v5  ;;  %v8019_v50 = vcombine.low %v7963_v6, %v7967_v7  ;;  %v11470_v53 = vld [vmem:[%s13621_s4 + $0x3c0] sm:$0xff]  }
 0x55f   : > { %11094 = vmatprep.subr.bf16.mxu0 %v11447_v11  ;;  %11523 = vrsqrt.f32 %v7803_v10  ;;  %v8162_v1 = vcombine.low %v8099_v42, %v8103_v15  ;;  %v8163_v11 = vcombine.low %v8107_v60, %v8111_v19 }
 0x560   : > { %11115 = vmatpush3.bf16.msra.mxu1 %v11446_v31  ;;  %v7562_v32 = vrot.slane %v7548_v3, %v11988_v54  ;;  %v11465_v31 = vld [vmem:[%s13621_s4 + $0x2f8] sm:$0xff]   ;;  %v8026_v45 = vrot.slane %v8018_v22, %v11988_v54  ;;  %v8033_v13 = vrot.slane %v8019_v50, %v11988_v54 }
 0x561   : > { %11116 = vmatprep.subr.bf16.mxu1 %v11449_v18  ;;  %v8170_v37 = vrot.slane %v8162_v1, %v11988_v54 }
 0x562   : > { %11095 = vmatpush3.bf16.msra.mxu0 %v11448_v38  ;;  %v7563_v20 = vcombine.low %v7555_v12, %v7562_v32  ;;  %v8177_v38 = vrot.slane %v8163_v11, %v11988_v54  ;;  %v8034_v51 = vcombine.low %v8026_v45, %v8033_v13 }
 0x563   : > { %11096 = vmatprep.subr.bf16.mxu0 %v11451_v17 }
 0x564   : > { %11117 = vmatpush3.bf16.msra.mxu1 %v11450_v49  ;;  %v13436_v9 = vsub.f32 %v13283_v39, %v7563_v20 }
 0x565   : > { %11118 = vmatprep.subr.bf16.mxu1 %v11453_v35  ;;  %v11518_v21 = vpop.eup %11517 }
 0x566   : > { %11097 = vmatpush3.bf16.msra.mxu0 %v11452_v63  ;;  %v7575_v30 = vmul.f32 %v13436_v9, %v13436_v9 }
 0x567   : > { %11098 = vmatprep.subr.bf16.mxu0 %v11455_v61  ;;  %v11520_v23 = vpop.eup %11519 }
 0x568   : > { %11119 = vmatpush3.bf16.msra.mxu1 %v11454_v62  ;;  %v11522_v25 = vpop.eup %11521  ;;  %v7874_v28 = vcombine.low %v11518_v21, %v11520_v23  ;;  %v7631_v0 = vcombine.high %v7575_v30, %v7575_v30  ;;  %v7638_v36 = vrot.slane %v7575_v30, %v11988_v54 }
 0x569   : > { %11120 = vmatprep.subr.bf16.mxu1 %v11457_v2  ;;  %v11524_v39 = vpop.eup %11523  ;;  %v8178_v2 = vcombine.low %v8170_v37, %v8177_v38  ;;  %v11469_v37 = vld [vmem:[%s13621_s4 + $0x300] sm:$0xff]  }
 0x56a   : > { %11099 = vmatpush3.bf16.msra.mxu0 %v11456_v24  ;;  %v7875_v34 = vcombine.low %v11522_v25, %v11524_v39  ;;  %v7882_v18 = vrot.slane %v7874_v28, %v11988_v54  ;;  %v7645_v29 = vrot.slane %v7631_v0, %v11988_v54  ;;  %v7646_v43 = vcombine.high %v7638_v36, %v7638_v36 }
 0x56b   : > { %11100 = vmatprep.subr.bf16.mxu0 %v11459_v14  ;;  %v7748_v49 = vsel %vm7350_vm0, %v7638_v36, 0.0 }
 0x56c   : > { %11121 = vmatpush3.bf16.msra.mxu1 %v11458_v48  ;;  %v7889_v17 = vrot.slane %v7875_v34, %v11988_v54  ;;  %v7749_v55 = vrot.slane %v7748_v49, 4  ;;  %v7647_v10 = vcombine.high %v7645_v29, %v7645_v29  ;;  %v7755_v63 = vsel %vm7350_vm0, %v7646_v43, 0.0 }
 0x56d   : > { %11122 = vmatprep.subr.bf16.mxu1 %v11461_v58  ;;  %v7762_v59 = vsel %vm7350_vm0, %v7645_v29, 0.0  ;;  %v7756_v62 = vrot.slane %v7755_v63, 4 }
 0x56e   : > { %11101 = vmatpush3.bf16.msra.mxu0 %v11460_v8  ;;  %v7890_v35 = vcombine.low %v7882_v18, %v7889_v17  ;;  %v7750_v61 = vadd.f32 %v7749_v55, %v7748_v49  ;;  %v7763_v3 = vrot.slane %v7762_v59, 4  ;;  %v7769_v4 = vsel %vm7350_vm0, %v7647_v10, 0.0  ;;  %v11472_v17 = vld [vmem:[%s13621_s4 + $0x348] sm:$0xff]   ;;  %v11471_v49 = vld [vmem:[%s13621_s4 + $0x380] sm:$0xff]  }
 0x56f   : > { %11102 = vmatprep.subr.bf16.mxu0 %v11463_v52  ;;  %v7757_v6 = vadd.f32 %v7756_v62, %v7755_v63  ;;  %v7770_v24 = vrot.slane %v7769_v4, 4  ;;  %v11473_v55 = vld [vmem:[%s13621_s4 + $0x308] sm:$0xff]   ;;  %v11478_v63 = vld [vmem:[%s13621_s4 + $0x3d0] sm:$0xff]   ;;  %v7975_v62 = vrot.slane %v13389_v57, %v13161_v46 }
 0x570   : > { %11123 = vmatpush3.bf16.msra.mxu1 %v11462_v27  ;;  %v7914_v12 = vmul.f32 %v7890_v35, %v13296_v47  ;;  %v7751_v5 = vrot.slane %v7750_v61, 2  ;;  %v7764_v7 = vadd.f32 %v7763_v3, %v7762_v59  ;;  %v11476_v35 = vld [vmem:[%s13621_s4 + $0x350] sm:$0xff]   ;;  %v11475_v10 = vld [vmem:[%s13621_s4 + $0x388] sm:$0xff]   ;;  %v7979_v3 = vrot.slane %v13389_v57, %v13167_v56 }
 0x571   : > { %11124 = vmatprep.subr.bf16.mxu1 %v11465_v31  ;;  %v7758_v42 = vrot.slane %v7757_v6, 2  ;;  %v7771_v60 = vadd.f32 %v7770_v24, %v7769_v4  ;;  %v11477_v59 = vld [vmem:[%s13621_s4 + $0x310] sm:$0xff]  }
 0x572   : > { %11103 = vmatpush3.bf16.msra.mxu0 %v11464_v33  ;;  %v8058_v32 = vmul.f32 %v8034_v51, %v7914_v12  ;;  %v7752_v14 = vadd.f32 %v7751_v5, %v7750_v61  ;;  %v7765_v15 = vrot.slane %v7764_v7, 2  ;;  %v11474_v51 = vld [vmem:[%s13621_s4 + $0x3c8] sm:$0xff]   ;;  %v7971_v61 = vrot.slane %v13389_v57, %v13158_v44  ;;  %v11479_v4 = vld [vmem:[%s13621_s4 + $0x390] sm:$0xff]  }
 0x573   : > { %11132 = vmatprep.subr.bf16.mxu0 %v11468_v40  ;;  %v7759_v20 = vadd.f32 %v7758_v42, %v7757_v6  ;;  %v7772_v58 = vrot.slane %v7771_v60, 2  ;;  %v7983_v12 = vrot.slane %v13389_v57, %v13180_v16  ;;  %v8115_v5 = vrot.slane %v13397_v26, %v13158_v44  ;;  %v11481_v44 = vld [vmem:[%s13621_s4 + $0x318] sm:$0xff]  }
 0x574   : > { %11125 = vmatpush3.bf16.msra.mxu1 %v11467_v41  ;;  %v8202_v19 = vadd.f32 %v8178_v2, %v8058_v32  ;;  %v7753_v48 = vrot.slane %v7752_v14, 1  ;;  %v7766_v21 = vadd.f32 %v7765_v15, %v7764_v7  ;;  %v11480_v2 = vld [vmem:[%s13621_s4 + $0x358] sm:$0xff]   ;;  %v8119_v6 = vrot.slane %v13397_v26, %v13161_v46 }
 0x575   : > { %11154 = vmatprep.subr.bf16.mxu1 %v11470_v53  ;;  %v7760_v50 = vrot.slane %v7759_v20, 1  ;;  %v7773_v23 = vadd.f32 %v7772_v58, %v7771_v60  ;;  %v8123_v7 = vrot.slane %v13397_v26, %v13167_v56  ;;  %v8127_v57 = vrot.slane %v13397_v26, %v13180_v16  ;;  %v11482_v32 = vld [vmem:[%s13621_s4 + $0x3d8] sm:$0xff]   ;;  %v11484_v56 = vld [vmem:[%s13621_s4 + $0x360] sm:$0xff]  }
 0x576   : > { %vm8206_vm3 = vcmp.ge.f32.partialorder %v8202_v19, 0.0  ;;  %v8210_v47 = vmul.f32 0.2, %v8202_v19  ;;  %v7754_v22 = vadd.f32 %v7753_v48, %v7752_v14  ;;  %v7767_v8 = vrot.slane %v7766_v21, 1  ;;  %v11483_v26 = vld [vmem:[%s13621_s4 + $0x398] sm:$0xff]  }
 0x577   : > { %v7761_v25 = vadd.f32 %v7760_v50, %v7759_v20  ;;  %v7774_v28 = vrot.slane %v7773_v23, 1  ;;  %v8035_v42 = vcombine.low %v7971_v61, %v7975_v62  ;;  %v8036_v46 = vcombine.low %v7979_v3, %v7983_v12  ;;  %v11486_v20 = vld [vmem:[%s13621_s4 + $0x3e0] sm:$0xff]  }
 0x578   : > { %v8214_v52 = vsel %vm8206_vm3, %v8202_v19, %v8210_v47  ;;  %v7768_v27 = vadd.f32 %v7767_v8, %v7766_v21  ;;  %v7788_v30 = vmul.f32 0.5, %v7754_v22  ;;  %v8179_v60 = vcombine.low %v8115_v5, %v8119_v6  ;;  %v11485_v21 = vld [vmem:[%s13621_s4 + $0x320] sm:$0xff]   ;;  %v11488_v8 = vld [vmem:[%s13621_s4 + $0x368] sm:$0xff]  }
 0x579   : > { %v8261_v1 = vrot.slane %v8214_v52, %v11988_v54  ;;  %v8254_v11 = vcombine.high %v8214_v52, %v8214_v52  ;;  %v7789_v45 = vmul.f32 0.5, %v7761_v25  ;;  %v7775_v33 = vadd.f32 %v7774_v28, %v7773_v23  ;;  %v11487_v23 = vld [vmem:[%s13621_s4 + $0x3a0] sm:$0xff]   ;;  %v11490_v25 = vld [vmem:[%s13621_s4 + $0x3e8] sm:$0xff]  }
 0x57a   : > { %v7790_v34 = vmul.f32 0.5, %v7768_v27  ;;  %v7804_v18 = vadd.f32 1e-05, %v7788_v30  ;;  %v8180_v19 = vcombine.low %v8123_v7, %v8127_v57  ;;  %v8043_v22 = vrot.slane %v8035_v42, %v11988_v54  ;;  %v11489_v27 = vld [vmem:[%s13621_s4 + $0x328] sm:$0xff]   ;;  %v10734_v61 = vld [vmem:[#allocation8] ss:$0 sm:$0xff] }
 0x57b   : > { %v8269_v39 = vcombine.high %v8261_v1, %v8261_v1  ;;  %v8268_v31 = vrot.slane %v8254_v11, %v11988_v54  ;;  %v8312_v13 = vpack.c.bf16 %v8261_v1, %v8261_v1  ;;  %v7805_v38 = vadd.f32 1e-05, %v7789_v45 }
 0x57c   : > { %v7791_v41 = vmul.f32 0.5, %v7775_v33  ;;  %v7806_v29 = vadd.f32 1e-05, %v7790_v34  ;;  %11525 = vrsqrt.f32 %v7804_v18  ;;  %v8050_v50 = vrot.slane %v8036_v46, %v11988_v54  ;;  %v11494_v33 = vld [vmem:[%s13621_s4 + $0x3f0] sm:$0xff]  }
 0x57d   : > { %v8313_v0 = vpack.c.bf16 %v8269_v39, %v8269_v39  ;;  %v8270_v36 = vcombine.high %v8268_v31, %v8268_v31  ;;  %v8314_v40 = vpack.c.bf16 %v8268_v31, %v8268_v31  ;;  %11527 = vrsqrt.f32 %v7805_v38  ;;  %v11492_v39 = vld [vmem:[%s13621_s4 + $0x370] sm:$0xff]   ;;  %v11491_v31 = vld [vmem:[%s13621_s4 + $0x3a8] sm:$0xff]   ;;  %v11497_v38 = vld [vmem:[%s13621_s4 + $0x338] sm:$0xff]  }
 0x57e   : > { %v7807_v53 = vadd.f32 1e-05, %v7791_v41  ;;  %11529 = vrsqrt.f32 %v7806_v29  ;;  %v8187_v1 = vrot.slane %v8179_v60, %v11988_v54  ;;  %v8194_v11 = vrot.slane %v8180_v19, %v11988_v54  ;;  %v11493_v34 = vld [vmem:[%s13621_s4 + $0x330] sm:$0xff]   ;;  %v11500_v41 = vld [vmem:[%s13621_s4 + $0x3b8] sm:$0xff]  }
 0x57f   : > { %9554 = vmatprep.mubr.bf16.mxu0 %v8313_v0  ;;  %v8315_v43 = vpack.c.bf16 %v8270_v36, %v8270_v36  ;;  %v8051_v30 = vcombine.low %v8043_v22, %v8050_v50  ;;  %v11496_v0 = vld [vmem:[%s13621_s4 + $0x378] sm:$0xff]  }
 0x580   : > { %9555 = vmatmul.mubr.bf16.vlgmr.msra.gmra.mrb[8].mxu0 %v8312_v13  ;;  %11531 = vrsqrt.f32 %v7807_v53  ;;  %v8195_v13 = vcombine.low %v8187_v1, %v8194_v11 }
 0x581   : > { %9594 = vmatprep.mubr.bf16.mxu1 %v8315_v43  ;;  %11133 = vmatpush3.bf16.msra.mxu0 %v11469_v37  ;;  %v11498_v37 = vld [vmem:[%s13621_s4 + $0x3f8] sm:$0xff]  }
 0x582   : > { %9595 = vmatmul.mubr.bf16.vlgmr.msra.gmra.mrb[8].mxu1 %v8314_v40  ;;  %11134 = vmatprep.subr.bf16.mxu0 %v11472_v17 }
 0x583   : > { %11155 = vmatpush3.bf16.msra.mxu1 %v11471_v49 }
 0x584   : > { %11156 = vmatprep.subr.bf16.mxu1 %v11474_v51 }
 0x585   : > { %11135 = vmatpush3.bf16.msra.mxu0 %v11473_v55 }
 0x586   : > { %11136 = vmatprep.subr.bf16.mxu0 %v11476_v35  ;;  %v11526_v24 = vpop.eup %11525 }
 0x587   : > { %11157 = vmatpush3.bf16.msra.mxu1 %v11475_v10  ;;  %v11528_v14 = vpop.eup %11527 }
 0x588   : > { %11158 = vmatprep.subr.bf16.mxu1 %v11478_v63  ;;  %v11530_v15 = vpop.eup %11529  ;;  %v7891_v16 = vcombine.low %v11526_v24, %v11528_v14 }
 0x589   : > { %11137 = vmatpush3.bf16.msra.mxu0 %v11477_v59 }
 0x58a   : > { %11138 = vmatprep.subr.bf16.mxu0 %v11480_v2  ;;  %v11532_v48 = vpop.eup %11531  ;;  %v7899_v47 = vrot.slane %v7891_v16, %v11988_v54 }
 0x58b   : > { %11159 = vmatpush3.bf16.msra.mxu1 %v11479_v4  ;;  %v7892_v58 = vcombine.low %v11530_v15, %v11532_v48 }
 0x58c   : > { %11160 = vmatprep.subr.bf16.mxu1 %v11482_v32 }
 0x58d   : > { %11139 = vmatpush3.bf16.msra.mxu0 %v11481_v44  ;;  %v7906_v52 = vrot.slane %v7892_v58, %v11988_v54 }
 0x58e   : > { %11140 = vmatprep.subr.bf16.mxu0 %v11484_v56 }
 0x58f   : > { %11161 = vmatpush3.bf16.msra.mxu1 %v11483_v26  ;;  %v7907_v28 = vcombine.low %v7899_v47, %v7906_v52 }
 0x590   : > { %11162 = vmatprep.subr.bf16.mxu1 %v11486_v20 }
 0x591   : > { %11141 = vmatpush3.bf16.msra.mxu0 %v11485_v21  ;;  %v7915_v45 = vmul.f32 %v7907_v28, %v13436_v9  ;;  %v11495_v9 = vld [vmem:[%s13621_s4 + $0x3b0] sm:$0xff]   ;;  %v10927_v21 = vld [vmem:[#allocation8 + $0x1] ss:$0 sm:$0xff] }
 0x592   : > { %11142 = vmatprep.subr.bf16.mxu0 %v11488_v8 }
 0x593   : > { %11163 = vmatpush3.bf16.msra.mxu1 %v11487_v23  ;;  %v8059_v18 = vmul.f32 %v8051_v30, %v7915_v45 }
 0x594   : > { %11164 = vmatprep.subr.bf16.mxu1 %v11490_v25 }
 0x595   : > { %11143 = vmatpush3.bf16.msra.mxu0 %v11489_v27  ;;  %v8203_v36 = vadd.f32 %v8195_v13, %v8059_v18 }
 0x596   : > { %11144 = vmatprep.subr.bf16.mxu0 %v11492_v39 }
 0x597   : > { %11165 = vmatpush3.bf16.msra.mxu1 %v11491_v31  ;;  %vm8207_vm4 = vcmp.ge.f32.partialorder %v8203_v36, 0.0  ;;  %v8211_v40 = vmul.f32 0.2, %v8203_v36 }
 0x598   : > { %11166 = vmatprep.subr.bf16.mxu1 %v11494_v33 }
 0x599   : > { %11145 = vmatpush3.bf16.msra.mxu0 %v11493_v34  ;;  %v8215_v17 = vsel %vm8207_vm4, %v8203_v36, %v8211_v40 }
 0x59a   : > { %11146 = vmatprep.subr.bf16.mxu0 %v11496_v0  ;;  %v8278_v29 = vrot.slane %v8215_v17, %v11988_v54  ;;  %v8271_v43 = vcombine.high %v8215_v17, %v8215_v17 }
 0x59b   : > { %11167 = vmatpush3.bf16.msra.mxu1 %v11495_v9 }
 0x59c   : > { %11168 = vmatprep.subr.bf16.mxu1 %v11498_v37  ;;  %v8286_v49 = vcombine.high %v8278_v29, %v8278_v29  ;;  %v8285_v51 = vrot.slane %v8271_v43, %v11988_v54  ;;  %v8316_v53 = vpack.c.bf16 %v8278_v29, %v8278_v29 }
 0x59d   : > { %11147 = vmatpush3.bf16.msra.mxu0 %v11497_v38 }
 0x59e   : > { %v8317_v55 = vpack.c.bf16 %v8286_v49, %v8286_v49  ;;  %v8287_v35 = vcombine.high %v8285_v51, %v8285_v51  ;;  %v8318_v10 = vpack.c.bf16 %v8285_v51, %v8285_v51 }
 0x59f   : > { %11169 = vmatpush3.bf16.msra.mxu1 %v11500_v41 }
 0x5a0   : > { %9634 = vmatprep.mubr.bf16.mxu0 %v8317_v55  ;;  %v8319_v63 = vpack.c.bf16 %v8287_v35, %v8287_v35 }
 0x5a1   : > { %9635 = vmatmul.mubr.bf16.vlgmr.msra.gmra.mrb[12].mxu0 %v8316_v53 }
 0x5a2   : > { %9674 = vmatprep.mubr.bf16.mxu1 %v8319_v63 }
 0x5a3   : > { %9675 = vmatmul.mubr.bf16.vlgmr.msra.gmra.mrb[12].mxu1 %v8318_v10 }
 0x608   : > { %v11016_v59 = vpop.f32.mrb[0].mxu0 }
 0x609   : > { %v11017_v62 = vpop.f32.mrb[1].mxu0 }
 0x60a   : > { %v11018_v3 = vadd.f32 %v11017_v62, %v11016_v59  ;;  %v11019_v12 = vpop.f32.mrb[2].mxu0  ;;  %v11038_v2 = vpop.f32.mrb[0].mxu1 }
 0x60b   : > { %v11020_v4 = vpop.f32.mrb[3].mxu0  ;;  %v11039_v5 = vpop.f32.mrb[1].mxu1 }
 0x60c   : > { %v8874_v6 = vadd.f32 %v11018_v3, %v10734_v61  ;;  %v11040_v54 = vadd.f32 %v11039_v5, %v11038_v2  ;;  %v11041_v7 = vpop.f32.mrb[2].mxu1 }
 0x60d   : > { %v11042_v57 = vpop.f32.mrb[3].mxu1 }
 0x60e   : > { %v8914_v24 = vadd.f32 %v11040_v54, %v8874_v6 }
 0x628   : > { %v11060_v32 = vpop.f32.mrb[4].mxu0 }
 0x629   : > { %v11061_v14 = vpop.f32.mrb[5].mxu0 }
 0x62a   : > { %v11062_v44 = vadd.f32 %v11061_v14, %v11060_v32  ;;  %v11063_v42 = vpop.f32.mrb[6].mxu0  ;;  %v11082_v46 = vpop.f32.mrb[4].mxu1 }
 0x62b   : > { %v11064_v15 = vpop.f32.mrb[7].mxu0  ;;  %v11083_v56 = vpop.f32.mrb[5].mxu1 }
 0x62c   : > { %v8954_v16 = vadd.f32 %v11062_v44, %v8914_v24  ;;  %v11084_v26 = vadd.f32 %v11083_v56, %v11082_v46  ;;  %v11085_v60 = vpop.f32.mrb[6].mxu1 }
 0x62d   : > { %v11086_v19 = vpop.f32.mrb[7].mxu1 }
 0x62e   : > { %v8994_v48 = vadd.f32 %v11084_v26, %v8954_v16 }
 0x630   : > { %9000 = vst.msk [vmem:[%s13623_s6] sm:$0x3] %vm8999_vm5, %v8994_v48 }
 0x653   : > { %v11104_v20 = vpop.f32.mrb[8].mxu0 }
 0x654   : > { %v11105_v58 = vpop.f32.mrb[9].mxu0 }
 0x655   : > { %v11106_v47 = vadd.f32 %v11105_v58, %v11104_v20  ;;  %v11107_v22 = vpop.f32.mrb[10].mxu0  ;;  %v11126_v50 = vpop.f32.mrb[8].mxu1 }
 0x656   : > { %v11108_v8 = vpop.f32.mrb[11].mxu0  ;;  %v11127_v23 = vpop.f32.mrb[9].mxu1 }
 0x657   : > { %v9557_v52 = vadd.f32 %v11106_v47, %v10927_v21  ;;  %v11128_v1 = vadd.f32 %v11127_v23, %v11126_v50  ;;  %v11129_v11 = vpop.f32.mrb[10].mxu1 }
 0x658   : > { %v11130_v25 = vpop.f32.mrb[11].mxu1 }
 0x659   : > { %v9597_v27 = vadd.f32 %v11128_v1, %v9557_v52 }
 0x674   : > { %v11148_v28 = vpop.f32.mrb[12].mxu0 }
 0x675   : > { %v11149_v30 = vpop.f32.mrb[13].mxu0 }
 0x676   : > { %v11150_v39 = vadd.f32 %v11149_v30, %v11148_v28  ;;  %v11151_v31 = vpop.f32.mrb[14].mxu0  ;;  %v11170_v45 = vpop.f32.mrb[12].mxu1 }
 0x677   : > { %v11152_v13 = vpop.f32.mrb[15].mxu0  ;;  %v11171_v33 = vpop.f32.mrb[13].mxu1 }
 0x678   : > { %v9637_v34 = vadd.f32 %v11150_v39, %v9597_v27  ;;  %v11172_v18 = vadd.f32 %v11171_v33, %v11170_v45  ;;  %v11173_v0 = vpop.f32.mrb[14].mxu1 }
 0x679   : > { %v11174_v9 = vpop.f32.mrb[15].mxu1 }
 0x67a   : > { %v9677_v36 = vadd.f32 %v11172_v18, %v9637_v34 }
 0x67c   : > { %10992 = vst.msk [vmem:[%s13623_s6 + $0x2] sm:$0x3] %vm8999_vm5, %v9677_v36 }
 0x67d PF: > { %s21_s26 = sadd.s32 1, %s11705_s26   ;;  %s13637_s21 = smov %s11689_s22 }
 0x67e   : > { %p18_p10 = scmp.ge.s32.totalorder %s21_s26, 9   ;;  %s13638_s22 = smov %s11693_s23 }
 0x67f   : > { %s13639_s23 = smov %s11898_s13  ;;  %s13640_s24 = smov %s11701_s25 }
 0x680   : > { %s13641_s25 = smov %s13643_s27  ;;  %20 = sbr.rel (!%p18_p10) target bundleno = 6 (0x6), region = 116 }
 0x687   :  { %9706 = vsyncpa [#allocation4], 1 }
 0x688   :  { %9708 = vsyncpa [#allocation4 + $0x1], 1 }
 0x689   :  { %9709 = vsyncpa [#allocation6], 1 }
 0x68a   :  { %9710 = vsyncpa [#allocation9], 1 }

</bundles_post_ra>
